<compile_context>
chip_gen: v7x
topology: tpu7x:2x2x1
jax: 0.10.0
libtpu: 0.0.40
codegen_flags: <defaults>
</compile_context>

<pallas_src>
import functools

import jax
import jax.numpy as jnp
from jax import lax
from jax.experimental import pallas as pl
from jax.experimental.pallas import tpu as pltpu

OFFSET = 0.0195141        # GB dielectric offset (nm), as in the reference forward
GNN_CUTOFF = 0.6          # hard-coded `edge_attributes < 0.6` slice in the reference
COULOMB_KE = 138.935485   # kJ mol^-1 nm e^-2
PW_EPS = 1e-6             # torch.nn.PairwiseDistance default eps


# ----------------------------------------------------------------------------
# Fused kernel: one replica-batch per grid step, everything VMEM-resident.
# ----------------------------------------------------------------------------
def _fused_gnn_kernel(scal_ref, pos_ref, post_ref, prmc_ref, prmr_ref,
                      w1c1, b11, wd1, w21, b21,
                      w1c2, b12, wd2, w22, b22,
                      w1c3, b13, wd3, w23, b23,
                      out_ref, *, fraction, eps_solvent, ew_dtype):
    pos = pos_ref[...]        # (RB, A, 3) f32, atom index along sublanes
    post = post_ref[...]      # (RB, 3, A) f32, atom index along lanes (wrapper transpose)
    prmc = prmc_ref[...]      # (A, 3): [charge, offset_radius, scale]   column form
    prmr = prmr_ref[...]      # (3, A): same, lane-major row form
    RB, A, _ = pos.shape

    rows = lax.broadcasted_iota(jnp.int32, (A, A), 0)
    cols = lax.broadcasted_iota(jnp.int32, (A, A), 1)
    offdiag = (rows != cols).astype(jnp.float32)
    eye = (rows == cols).astype(jnp.float32)

    # ---- pairwise distances: direct broadcast differences -------------------
    # torch PairwiseDistance: d = ||x_i - x_j + eps||_2 (eps added per component).
    dx = pos[:, :, 0:1] - post[:, 0:1, :] + PW_EPS          # (RB, A, A)
    dy = pos[:, :, 1:2] - post[:, 1:2, :] + PW_EPS
    dz = pos[:, :, 2:3] - post[:, 2:3, :] + PW_EPS
    d = jnp.sqrt(dx * dx + dy * dy + dz * dz)               # (RB, A, A)
    # NOTE: diagonal is ~sqrt(3)*eps, not 0; every use below is masked by `offdiag`
    # or uses r = d + eye (diagonal overwritten).

    q_col, or_col, sc_col = prmc[:, 0:1], prmc[:, 1:2], prmc[:, 2:3]     # (A, 1)
    q_row, or_row = prmr[0:1, :], prmr[1:2, :]                           # (1, A)
    rho_row = or_row + OFFSET

    # ---- GBNeck_interaction: HCT descreening -> OBC Born radii --------------
    # Lane-major orientation: target atom i along lanes, source atom j along sublanes,
    # so the reduction lands in (1, A) row form and the OBC tanh runs lane-dense.
    r = d + eye                                   # keep diagonal finite; masked below
    sr_j = sc_col * or_col                        # scaled offset radius of source j (A,1)
    U = r + sr_j
    L = jnp.maximum(jnp.abs(r - sr_j), or_row)
    inv_l = 1.0 / L
    inv_u = 1.0 / U
    integral = 0.5 * (inv_l - inv_u
                      + 0.25 * (r - sr_j * sr_j / r) * (inv_u * inv_u - inv_l * inv_l)
                      + 0.5 * jnp.log(L * inv_u) / r)
    integral = jnp.where(or_row < U, integral, 0.0)
    integral = integral + jnp.where(or_row < (sr_j - r),
                                    2.0 * (1.0 / or_row - inv_l), 0.0)
    I_row = jnp.sum(integral * offdiag, axis=-2, keepdims=True)          # (RB, 1, A)

    psi = I_row * or_row
    # GB-Neck2 / OBC rescaling (alpha=1.0, beta=0.8, gamma=4.85); denominator clamped
    # to a positive floor so pathological descreening cannot produce negative/inf radii.
    denom = (1.0 / or_row
             - jnp.tanh(psi - 0.8 * psi * psi + 4.85 * psi * psi * psi) / rho_row)
    B_row = 1.0 / jnp.maximum(denom, 1e-6)                               # (RB, 1, A)
    B_col = jnp.sum(B_row * eye, axis=-1, keepdims=True)                 # (RB, A, 1)

    # ---- GNN sub-graph mask (edge_attributes < 0.6, no self loops) ----------
    gmask = offdiag * (d < GNN_CUTOFF).astype(jnp.float32)               # (RB, A, A)
    deg = jnp.sum(gmask, axis=-1, keepdims=True)                         # (RB, A, 1)
    gmask_e = gmask[..., None].astype(ew_dtype)                          # (RB, A, A, 1)
    d_e = d.astype(ew_dtype)

    # ---- IN_layer_all_swish_2pass (sum over j before the W2 matmul) ---------
    # out_i = (sum_j mask_ij * silu(hi_i + hj_j + d_ij*wd)) @ W2 + deg_i * b2
    def in_layer(x, w1c_ref, b1_ref, wd_ref, w2_ref, b2_ref):
        F = x.shape[-1]
        H = wd_ref.shape[-1]
        f_out = w2_ref.shape[-1]
        x2d = x.reshape(RB * A, F).astype(jnp.bfloat16)
        hcat = jnp.dot(x2d, w1c_ref[...],                                # fused [W1a|W1b]
                       preferred_element_type=jnp.float32).reshape(RB, A, 2 * H)
        hi = (hcat[..., :H] + b1_ref[...]).astype(ew_dtype)              # b1 folded here
        hj = hcat[..., H:].astype(ew_dtype)
        wd = wd_ref[...].reshape(1, 1, 1, H).astype(ew_dtype)
        # TODO(synk): for large A on v7x (64 MiB VMEM), tile this (RB, A, A, H) block
        # over the neighbor axis with an inner fori_loop accumulating `agg`.
        pre = (hi[:, :, None, :] + hj[:, None, :, :]
               + d_e[:, :, :, None] * wd)                                # (RB, A, A, H)
        act = (pre * jax.nn.sigmoid(pre)) * gmask_e                      # masked SiLU
        agg = jnp.sum(act, axis=2)                                       # (RB, A, H)
        out2d = jnp.dot(agg.reshape(RB * A, H).astype(jnp.bfloat16), w2_ref[...],
                        preferred_element_type=jnp.float32)              # (RB*A, f_out)
        return out2d.reshape(RB, A, f_out) + deg * b2_ref[...]

    # Bcn = [Born radius, charge, offset radius]
    x1 = jnp.concatenate([B_col,
                          jnp.broadcast_to(q_col[None], (RB, A, 1)),
                          jnp.broadcast_to(or_col[None], (RB, A, 1))], axis=-1)
    h = in_layer(x1, w1c1, b11, wd1, w21, b21)
    h = h * jax.nn.sigmoid(h)
    h = in_layer(h, w1c2, b12, wd2, w22, b22)
    h = h * jax.nn.sigmoid(h)
    h = in_layer(h, w1c3, b13, wd3, w23, b23)                            # (RB, A, 2)
    c_scale = h[..., 0:1]
    sa_out = h[..., 1:2]

    # ---- SA energies ---------------------------------------------------------
    sa_scale_p = scal_ref[0]
    sa_probe_p = scal_ref[1]
    radius_col = or_col + OFFSET
    sasa = (1.0 - 2.0 * jax.nn.sigmoid(sa_out)) * (radius_col + sa_probe_p) ** 2
    sa_e = sasa * sa_scale_p                                             # (RB, A, 1)

    # ---- GBNeck_energies with GNN-scaled Born radii --------------------------
    B_s_col = B_col * (fraction + jax.nn.sigmoid(c_scale) * (1.0 - fraction) * 2.0)
    B_s_row = jnp.sum(B_s_col * eye, axis=-2, keepdims=True)             # (RB, 1, A)

    r2 = r * r
    bb = B_s_col * B_s_row                                               # (RB, A, A)
    f_gb = jnp.sqrt(r2 + bb * jnp.exp(-r2 / (4.0 * bb)))
    cross = jnp.sum((q_col * q_row / f_gb) * offdiag, axis=-1, keepdims=True)  # (RB, A, 1)
    self_term = q_col * q_col / B_s_col
    pref = -0.5 * COULOMB_KE * (1.0 - 1.0 / eps_solvent)
    e = pref * (self_term + cross)                                       # (RB, A, 1)

    # one partial-sum scalar per grid step; summed over steps in the wrapper
    out_ref[0] = jnp.sum((e + sa_e).reshape(RB * A, 1), axis=0, keepdims=True)


# ----------------------------------------------------------------------------
# Wrapper
# ----------------------------------------------------------------------------
def _const_spec(shape):
    zeros = (0,) * len(shape)
    return pl.BlockSpec(shape, lambda s: zeros)


def gnn3_forward(pos, prm_col, prm_row, scal, params1, params2, params3, *,
                 fraction, eps_solvent, rb, ew_dtype):
    """pos: (R, A, 3); prm_col: (A, 3); prm_row: (3, A); scal: (2,) [sa_scale, probe_r]."""
    R, A, _ = pos.shape
    assert R % rb == 0
    steps = R // rb
    pos_t = jnp.swapaxes(pos, 1, 2)               # (R, 3, A), one-time layout plumbing

    kernel = functools.partial(_fused_gnn_kernel, fraction=fraction,
                               eps_solvent=eps_solvent, ew_dtype=ew_dtype)
    w_specs = [_const_spec(w.shape)
               for prms in (params1, params2, params3) for w in prms]
    out = pl.pallas_call(
        kernel,
        out_shape=jax.ShapeDtypeStruct((steps, 1, 1), jnp.float32),
        grid=(steps,),
        in_specs=[pl.BlockSpec(memory_space=pltpu.MemorySpace.SMEM),     # scal
                  pl.BlockSpec((rb, A, 3), lambda s: (s, 0, 0)),         # pos
                  pl.BlockSpec((rb, 3, A), lambda s: (s, 0, 0)),         # pos_t
                  _const_spec(prm_col.shape),                            # (A, 3)
                  _const_spec(prm_row.shape)] + w_specs,                 # (3, A) + weights
        out_specs=pl.BlockSpec((1, 1, 1), lambda s: (s, 0, 0)),
        compiler_params=pltpu.CompilerParams(
            dimension_semantics=("parallel",)),                          # steps independent
    )(scal, pos, pos_t, prm_col, prm_row, *params1, *params2, *params3)
    return jnp.sum(out)


def _choose_rb(num_reps, max_rb=8):
    """Largest replica-batch that divides R while keeping >= 2 grid steps (v7x cores)."""
    best = 1
    for rb in range(1, max_rb + 1):
        if num_reps % rb == 0 and num_reps // rb >= 2:
            best = rb
    return best


def _elementwise_dtype():
    """bf16 (A,A,H) elementwise math on v6e/v7x/v4; f32 on v2/v3/v5 (no bf16 VPU/EUP)."""
    try:
        kind = jax.devices()[0].device_kind.lower()
    except Exception:
        return jnp.float32
    if ("v2" in kind) or ("v3" in kind) or ("v5" in kind):
        return jnp.float32
    return jnp.bfloat16


# ----------------------------------------------------------------------------
# Parameter construction (deterministic, PyTorch-Linear-style uniform init)
# ----------------------------------------------------------------------------
def _linear_params(key, fan_in, fan_out):
    kw, kb = jax.random.split(key)
    bound = 1.0 / float(fan_in) ** 0.5
    W = jax.random.uniform(kw, (fan_in, fan_out), jnp.float32, -bound, bound)
    b = jax.random.uniform(kb, (1, fan_out), jnp.float32, -bound, bound)
    return W, b


def make_in_layer_params(key, f_node, hidden, f_out):
    """lin2(silu(lin1([x_i, x_j, d]))) weights, with [W1a|W1b] pre-fused to (F, 2H)."""
    k1, k2 = jax.random.split(key)
    W1, b1 = _linear_params(k1, 2 * f_node + 1, hidden)   # rows: [x_i | x_j | dist]
    W2, b2 = _linear_params(k2, hidden, f_out)
    W1cat = jnp.concatenate([W1[:f_node], W1[f_node:2 * f_node]], axis=1)  # (F, 2H)
    w1d = W1[2 * f_node:2 * f_node + 1]                                    # (1, H)
    return (W1cat.astype(jnp.bfloat16), b1, w1d, W2.astype(jnp.bfloat16), b2)


def make_gbparameters(key, num_atoms):
    kq, kr, ks = jax.random.split(key, 3)
    charge = jax.random.uniform(kq, (num_atoms, 1), jnp.float32, -0.5, 0.5)
    orad = jax.random.uniform(kr, (num_atoms, 1), jnp.float32, 0.11, 0.19)
    scale = jax.random.uniform(ks, (num_atoms, 1), jnp.float32, 0.70, 0.90)
    rest = jnp.zeros((num_atoms, 4), jnp.float32)
    return jnp.concatenate([charge, orad, scale, rest], axis=1)   # (A, 7)


# ----------------------------------------------------------------------------
# Model wrapper reproducing GNN3_scale_64_SA_flex_run.forward
# ----------------------------------------------------------------------------
class GNN3Scale64SAFlexPallas:
    def __init__(self, gbparameters, num_reps, hidden=64, fraction=0.5,
                 solvent_dielectric=78.5, key=None):
        if key is None:
            key = jax.random.PRNGKey(42)
        self.num_reps = num_reps
        self.num_atoms = gbparameters.shape[0]
        self.fraction = float(fraction)
        self.eps_solvent = float(solvent_dielectric)
        prm = gbparameters.astype(jnp.float32)
        # gbparameters identical per replica (reference: gbparameters.repeat(num_reps, 1))
        self.prm_col = prm[:, :3]                         # [charge, offset radius, scale]
        self.prm_row = jnp.transpose(self.prm_col)        # (3, A) lane-major rows
        k1, k2, k3 = jax.random.split(key, 3)
        self.p1 = make_in_layer_params(k1, 3, hidden, hidden)        # 3+3  -> hidden
        self.p2 = make_in_layer_params(k2, hidden, hidden, hidden)   # 2h   -> hidden
        self.p3 = make_in_layer_params(k3, hidden, hidden, 2)        # 2h   -> 2
        # nn.Parameter([0.0]) in the reference module
        self.sa_scale = jnp.zeros((1,), jnp.float32)
        self.sa_probe_radius = jnp.zeros((1,), jnp.float32)
        self._scal = jnp.concatenate([self.sa_scale, self.sa_probe_radius])   # (2,)
        self._rb = _choose_rb(num_reps)
        self._forward = jax.jit(functools.partial(
            gnn3_forward, fraction=self.fraction, eps_solvent=self.eps_solvent,
            rb=self._rb, ew_dtype=_elementwise_dtype()))

    def __call__(self, positions):
        R, A = self.num_reps, self.num_atoms
        pos = positions.astype(jnp.float32).reshape(R, A, 3)
        return self._forward(pos, self.prm_col, self.prm_row, self._scal,
                             self.p1, self.p2, self.p3)


if __name__ == "__main__":
    key = jax.random.PRNGKey(0)
    k_pos, k_prm, k_w = jax.random.split(key, 3)

    num_atoms = 16
    num_reps = 2
    hidden = 64

    gbparams = make_gbparameters(k_prm, num_atoms)                   # (16, 7)
    model = GNN3Scale64SAFlexPallas(gbparams, num_reps=num_reps,
                                    hidden=hidden, key=k_w)

    positions = jax.random.uniform(k_pos, (num_reps * num_atoms, 3),
                                   jnp.float32, 0.0, 0.7)            # nm

    energy = model(positions)
    jax.block_until_ready(energy)
    assert energy.shape == () and bool(jnp.isfinite(energy))
    print("KERNEL_OK")
</pallas_src>

<mosaic_0001>
module attributes {stable_mosaic.version = 11 : i64} {
  func.func @_fused_gnn_kernel(%arg0: i32, %arg1: memref<2xf32, #tpu.memory_space<smem>>, %arg2: memref<1x16x3xf32, #tpu.memory_space<vmem>>, %arg3: memref<1x3x16xf32, #tpu.memory_space<vmem>>, %arg4: memref<16x3xf32, #tpu.memory_space<vmem>>, %arg5: memref<3x16xf32, #tpu.memory_space<vmem>>, %arg6: memref<3x128xbf16, #tpu.memory_space<vmem>>, %arg7: memref<1x64xf32, #tpu.memory_space<vmem>>, %arg8: memref<1x64xf32, #tpu.memory_space<vmem>>, %arg9: memref<64x64xbf16, #tpu.memory_space<vmem>>, %arg10: memref<1x64xf32, #tpu.memory_space<vmem>>, %arg11: memref<64x128xbf16, #tpu.memory_space<vmem>>, %arg12: memref<1x64xf32, #tpu.memory_space<vmem>>, %arg13: memref<1x64xf32, #tpu.memory_space<vmem>>, %arg14: memref<64x64xbf16, #tpu.memory_space<vmem>>, %arg15: memref<1x64xf32, #tpu.memory_space<vmem>>, %arg16: memref<64x128xbf16, #tpu.memory_space<vmem>>, %arg17: memref<1x64xf32, #tpu.memory_space<vmem>>, %arg18: memref<1x64xf32, #tpu.memory_space<vmem>>, %arg19: memref<64x2xbf16, #tpu.memory_space<vmem>>, %arg20: memref<1x2xf32, #tpu.memory_space<vmem>>, %arg21: memref<1x1x1xf32, #tpu.memory_space<vmem>>) attributes {dimension_semantics = [#tpu.dimension_semantics<parallel>], iteration_bounds = array<i64: 2>, scalar_prefetch = 0 : i64, scratch_operands = 0 : i64, tpu.core_type = #tpu.core_type<tc>, window_params = [{transform_indices = @transform_0, window_bounds = array<i64: 2>}, {transform_indices = @transform_1, window_bounds = array<i64: 1, 16, 3>}, {transform_indices = @transform_2, window_bounds = array<i64: 1, 3, 16>}, {pipeline_mode = #tpu.pipeline_mode<synchronous>, transform_indices = @transform_3, window_bounds = array<i64: 16, 3>}, {pipeline_mode = #tpu.pipeline_mode<synchronous>, transform_indices = @transform_4, window_bounds = array<i64: 3, 16>}, {pipeline_mode = #tpu.pipeline_mode<synchronous>, transform_indices = @transform_5, window_bounds = array<i64: 3, 128>}, {pipeline_mode = #tpu.pipeline_mode<synchronous>, transform_indices = @transform_6, window_bounds = array<i64: 1, 64>}, {pipeline_mode = #tpu.pipeline_mode<synchronous>, transform_indices = @transform_7, window_bounds = array<i64: 1, 64>}, {pipeline_mode = #tpu.pipeline_mode<synchronous>, transform_indices = @transform_8, window_bounds = array<i64: 64, 64>}, {pipeline_mode = #tpu.pipeline_mode<synchronous>, transform_indices = @transform_9, window_bounds = array<i64: 1, 64>}, {pipeline_mode = #tpu.pipeline_mode<synchronous>, transform_indices = @transform_10, window_bounds = array<i64: 64, 128>}, {pipeline_mode = #tpu.pipeline_mode<synchronous>, transform_indices = @transform_11, window_bounds = array<i64: 1, 64>}, {pipeline_mode = #tpu.pipeline_mode<synchronous>, transform_indices = @transform_12, window_bounds = array<i64: 1, 64>}, {pipeline_mode = #tpu.pipeline_mode<synchronous>, transform_indices = @transform_13, window_bounds = array<i64: 64, 64>}, {pipeline_mode = #tpu.pipeline_mode<synchronous>, transform_indices = @transform_14, window_bounds = array<i64: 1, 64>}, {pipeline_mode = #tpu.pipeline_mode<synchronous>, transform_indices = @transform_15, window_bounds = array<i64: 64, 128>}, {pipeline_mode = #tpu.pipeline_mode<synchronous>, transform_indices = @transform_16, window_bounds = array<i64: 1, 64>}, {pipeline_mode = #tpu.pipeline_mode<synchronous>, transform_indices = @transform_17, window_bounds = array<i64: 1, 64>}, {pipeline_mode = #tpu.pipeline_mode<synchronous>, transform_indices = @transform_18, window_bounds = array<i64: 64, 2>}, {pipeline_mode = #tpu.pipeline_mode<synchronous>, transform_indices = @transform_19, window_bounds = array<i64: 1, 2>}, {transform_indices = @transform_20, window_bounds = array<i64: 1, 1, 1>}]} {
    %c0 = arith.constant 0 : index
    %c0_0 = arith.constant 0 : index
    %c0_1 = arith.constant 0 : index
    %0 = vector.load %arg2[%c0, %c0_0, %c0_1] : memref<1x16x3xf32, #tpu.memory_space<vmem>>, vector<1x16x3xf32>
    %c0_2 = arith.constant 0 : index
    %c0_3 = arith.constant 0 : index
    %c0_4 = arith.constant 0 : index
    %1 = vector.load %arg3[%c0_2, %c0_3, %c0_4] : memref<1x3x16xf32, #tpu.memory_space<vmem>>, vector<1x3x16xf32>
    %c0_5 = arith.constant 0 : index
    %c0_6 = arith.constant 0 : index
    %2 = vector.load %arg4[%c0_5, %c0_6] : memref<16x3xf32, #tpu.memory_space<vmem>>, vector<16x3xf32>
    %c0_7 = arith.constant 0 : index
    %c0_8 = arith.constant 0 : index
    %3 = vector.load %arg5[%c0_7, %c0_8] : memref<3x16xf32, #tpu.memory_space<vmem>>, vector<3x16xf32>
    %4 = tpu.iota {dimensions = array<i32: 0>} : vector<16x16xi32>
    %5 = tpu.iota {dimensions = array<i32: 1>} : vector<16x16xi32>
    %6 = arith.cmpi ne, %4, %5 : vector<16x16xi32>
    %7 = arith.extui %6 : vector<16x16xi1> to vector<16x16xi32>
    %8 = arith.sitofp %7 : vector<16x16xi32> to vector<16x16xf32>
    %9 = arith.cmpi eq, %4, %5 : vector<16x16xi32>
    %10 = arith.extui %9 : vector<16x16xi1> to vector<16x16xi32>
    %11 = arith.sitofp %10 : vector<16x16xi32> to vector<16x16xf32>
    %12 = vector.extract_strided_slice %0 {offsets = [0, 0, 0], sizes = [1, 16, 1], strides = [1, 1, 1]} : vector<1x16x3xf32> to vector<1x16x1xf32>
    %13 = vector.extract_strided_slice %1 {offsets = [0, 0, 0], sizes = [1, 1, 16], strides = [1, 1, 1]} : vector<1x3x16xf32> to vector<1x1x16xf32>
    %14 = vector.broadcast %12 : vector<1x16x1xf32> to vector<1x16x16xf32>
    %15 = vector.broadcast %13 : vector<1x1x16xf32> to vector<1x16x16xf32>
    %16 = arith.subf %14, %15 : vector<1x16x16xf32>
    %cst = arith.constant 9.99999997E-7 : f32
    %17 = vector.broadcast %cst : f32 to vector<1x16x16xf32>
    %18 = arith.addf %16, %17 : vector<1x16x16xf32>
    %19 = vector.extract_strided_slice %0 {offsets = [0, 0, 1], sizes = [1, 16, 1], strides = [1, 1, 1]} : vector<1x16x3xf32> to vector<1x16x1xf32>
    %20 = vector.extract_strided_slice %1 {offsets = [0, 1, 0], sizes = [1, 1, 16], strides = [1, 1, 1]} : vector<1x3x16xf32> to vector<1x1x16xf32>
    %21 = vector.broadcast %19 : vector<1x16x1xf32> to vector<1x16x16xf32>
    %22 = vector.broadcast %20 : vector<1x1x16xf32> to vector<1x16x16xf32>
    %23 = arith.subf %21, %22 : vector<1x16x16xf32>
    %cst_9 = arith.constant 9.99999997E-7 : f32
    %24 = vector.broadcast %cst_9 : f32 to vector<1x16x16xf32>
    %25 = arith.addf %23, %24 : vector<1x16x16xf32>
    %26 = vector.extract_strided_slice %0 {offsets = [0, 0, 2], sizes = [1, 16, 1], strides = [1, 1, 1]} : vector<1x16x3xf32> to vector<1x16x1xf32>
    %27 = vector.extract_strided_slice %1 {offsets = [0, 2, 0], sizes = [1, 1, 16], strides = [1, 1, 1]} : vector<1x3x16xf32> to vector<1x1x16xf32>
    %28 = vector.broadcast %26 : vector<1x16x1xf32> to vector<1x16x16xf32>
    %29 = vector.broadcast %27 : vector<1x1x16xf32> to vector<1x16x16xf32>
    %30 = arith.subf %28, %29 : vector<1x16x16xf32>
    %cst_10 = arith.constant 9.99999997E-7 : f32
    %31 = vector.broadcast %cst_10 : f32 to vector<1x16x16xf32>
    %32 = arith.addf %30, %31 : vector<1x16x16xf32>
    %33 = arith.mulf %18, %18 : vector<1x16x16xf32>
    %34 = arith.mulf %25, %25 : vector<1x16x16xf32>
    %35 = arith.addf %33, %34 : vector<1x16x16xf32>
    %36 = arith.mulf %32, %32 : vector<1x16x16xf32>
    %37 = arith.addf %35, %36 : vector<1x16x16xf32>
    %38 = math.sqrt %37 : vector<1x16x16xf32>
    %39 = vector.extract_strided_slice %2 {offsets = [0, 0], sizes = [16, 1], strides = [1, 1]} : vector<16x3xf32> to vector<16x1xf32>
    %40 = vector.extract_strided_slice %2 {offsets = [0, 1], sizes = [16, 1], strides = [1, 1]} : vector<16x3xf32> to vector<16x1xf32>
    %41 = vector.extract_strided_slice %2 {offsets = [0, 2], sizes = [16, 1], strides = [1, 1]} : vector<16x3xf32> to vector<16x1xf32>
    %42 = vector.extract_strided_slice %3 {offsets = [0, 0], sizes = [1, 16], strides = [1, 1]} : vector<3x16xf32> to vector<1x16xf32>
    %43 = vector.extract_strided_slice %3 {offsets = [1, 0], sizes = [1, 16], strides = [1, 1]} : vector<3x16xf32> to vector<1x16xf32>
    %cst_11 = arith.constant 1.951410e-02 : f32
    %44 = vector.broadcast %cst_11 : f32 to vector<1x16xf32>
    %45 = arith.addf %43, %44 : vector<1x16xf32>
    %46 = vector.shape_cast %11 : vector<16x16xf32> to vector<1x16x16xf32>
    %47 = arith.addf %38, %46 : vector<1x16x16xf32>
    %48 = arith.mulf %41, %40 : vector<16x1xf32>
    %49 = vector.shape_cast %48 : vector<16x1xf32> to vector<1x16x1xf32>
    %50 = vector.broadcast %49 : vector<1x16x1xf32> to vector<1x16x16xf32>
    %51 = arith.addf %47, %50 : vector<1x16x16xf32>
    %52 = vector.shape_cast %48 : vector<16x1xf32> to vector<1x16x1xf32>
    %53 = vector.broadcast %52 : vector<1x16x1xf32> to vector<1x16x16xf32>
    %54 = arith.subf %47, %53 : vector<1x16x16xf32>
    %55 = math.absf %54 : vector<1x16x16xf32>
    %56 = vector.shape_cast %43 : vector<1x16xf32> to vector<1x1x16xf32>
    %57 = vector.broadcast %56 : vector<1x1x16xf32> to vector<1x16x16xf32>
    %58 = arith.maximumf %55, %57 : vector<1x16x16xf32>
    %cst_12 = arith.constant 1.000000e+00 : f32
    %59 = vector.broadcast %cst_12 : f32 to vector<1x16x16xf32>
    %60 = arith.divf %59, %58 : vector<1x16x16xf32>
    %cst_13 = arith.constant 1.000000e+00 : f32
    %61 = vector.broadcast %cst_13 : f32 to vector<1x16x16xf32>
    %62 = arith.divf %61, %51 : vector<1x16x16xf32>
    %63 = arith.subf %60, %62 : vector<1x16x16xf32>
    %64 = arith.mulf %48, %48 : vector<16x1xf32>
    %65 = vector.shape_cast %64 : vector<16x1xf32> to vector<1x16x1xf32>
    %66 = vector.broadcast %65 : vector<1x16x1xf32> to vector<1x16x16xf32>
    %67 = arith.divf %66, %47 : vector<1x16x16xf32>
    %68 = arith.subf %47, %67 : vector<1x16x16xf32>
    %cst_14 = arith.constant 2.500000e-01 : f32
    %69 = vector.broadcast %cst_14 : f32 to vector<1x16x16xf32>
    %70 = arith.mulf %69, %68 : vector<1x16x16xf32>
    %71 = arith.mulf %62, %62 : vector<1x16x16xf32>
    %72 = arith.mulf %60, %60 : vector<1x16x16xf32>
    %73 = arith.subf %71, %72 : vector<1x16x16xf32>
    %74 = arith.mulf %70, %73 : vector<1x16x16xf32>
    %75 = arith.addf %63, %74 : vector<1x16x16xf32>
    %76 = arith.mulf %58, %62 : vector<1x16x16xf32>
    %77 = math.log %76 : vector<1x16x16xf32>
    %cst_15 = arith.constant 5.000000e-01 : f32
    %78 = vector.broadcast %cst_15 : f32 to vector<1x16x16xf32>
    %79 = arith.mulf %78, %77 : vector<1x16x16xf32>
    %80 = arith.divf %79, %47 : vector<1x16x16xf32>
    %81 = arith.addf %75, %80 : vector<1x16x16xf32>
    %cst_16 = arith.constant 5.000000e-01 : f32
    %82 = vector.broadcast %cst_16 : f32 to vector<1x16x16xf32>
    %83 = arith.mulf %82, %81 : vector<1x16x16xf32>
    %84 = vector.shape_cast %43 : vector<1x16xf32> to vector<1x1x16xf32>
    %85 = vector.broadcast %84 : vector<1x1x16xf32> to vector<1x16x16xf32>
    %86 = arith.cmpf olt, %85, %51 : vector<1x16x16xf32>
    %cst_17 = arith.constant 0.000000e+00 : f32
    %87 = vector.broadcast %cst_17 : f32 to vector<1x16x16xf32>
    %88 = arith.select %86, %83, %87 : vector<1x16x16xi1>, vector<1x16x16xf32>
    %89 = vector.shape_cast %48 : vector<16x1xf32> to vector<1x16x1xf32>
    %90 = vector.broadcast %89 : vector<1x16x1xf32> to vector<1x16x16xf32>
    %91 = arith.subf %90, %47 : vector<1x16x16xf32>
    %92 = vector.shape_cast %43 : vector<1x16xf32> to vector<1x1x16xf32>
    %93 = vector.broadcast %92 : vector<1x1x16xf32> to vector<1x16x16xf32>
    %94 = arith.cmpf olt, %93, %91 : vector<1x16x16xf32>
    %cst_18 = arith.constant 1.000000e+00 : f32
    %95 = vector.broadcast %cst_18 : f32 to vector<1x16xf32>
    %96 = arith.divf %95, %43 : vector<1x16xf32>
    %97 = vector.shape_cast %96 : vector<1x16xf32> to vector<1x1x16xf32>
    %98 = vector.broadcast %97 : vector<1x1x16xf32> to vector<1x16x16xf32>
    %99 = arith.subf %98, %60 : vector<1x16x16xf32>
    %cst_19 = arith.constant 2.000000e+00 : f32
    %100 = vector.broadcast %cst_19 : f32 to vector<1x16x16xf32>
    %101 = arith.mulf %100, %99 : vector<1x16x16xf32>
    %cst_20 = arith.constant 0.000000e+00 : f32
    %102 = vector.broadcast %cst_20 : f32 to vector<1x16x16xf32>
    %103 = arith.select %94, %101, %102 : vector<1x16x16xi1>, vector<1x16x16xf32>
    %104 = arith.addf %88, %103 : vector<1x16x16xf32>
    %105 = vector.shape_cast %8 : vector<16x16xf32> to vector<1x16x16xf32>
    %106 = arith.mulf %104, %105 : vector<1x16x16xf32>
    %cst_21 = arith.constant dense<0.000000e+00> : vector<1x16xf32>
    %107 = vector.multi_reduction <add>, %106, %cst_21 [1] : vector<1x16x16xf32> to vector<1x16xf32>
    %108 = vector.shape_cast %107 : vector<1x16xf32> to vector<1x1x16xf32>
    %109 = vector.shape_cast %43 : vector<1x16xf32> to vector<1x1x16xf32>
    %110 = arith.mulf %108, %109 : vector<1x1x16xf32>
    %cst_22 = arith.constant 1.000000e+00 : f32
    %111 = vector.broadcast %cst_22 : f32 to vector<1x16xf32>
    %112 = arith.divf %111, %43 : vector<1x16xf32>
    %cst_23 = arith.constant 8.000000e-01 : f32
    %113 = vector.broadcast %cst_23 : f32 to vector<1x1x16xf32>
    %114 = arith.mulf %113, %110 : vector<1x1x16xf32>
    %115 = arith.mulf %114, %110 : vector<1x1x16xf32>
    %116 = arith.subf %110, %115 : vector<1x1x16xf32>
    %cst_24 = arith.constant 4.850000e+00 : f32
    %117 = vector.broadcast %cst_24 : f32 to vector<1x1x16xf32>
    %118 = arith.mulf %117, %110 : vector<1x1x16xf32>
    %119 = arith.mulf %118, %110 : vector<1x1x16xf32>
    %120 = arith.mulf %119, %110 : vector<1x1x16xf32>
    %121 = arith.addf %116, %120 : vector<1x1x16xf32>
    %122 = math.tanh %121 : vector<1x1x16xf32>
    %123 = vector.shape_cast %45 : vector<1x16xf32> to vector<1x1x16xf32>
    %124 = arith.divf %122, %123 : vector<1x1x16xf32>
    %125 = vector.shape_cast %112 : vector<1x16xf32> to vector<1x1x16xf32>
    %126 = arith.subf %125, %124 : vector<1x1x16xf32>
    %cst_25 = arith.constant 9.99999997E-7 : f32
    %127 = vector.broadcast %cst_25 : f32 to vector<1x1x16xf32>
    %128 = arith.maximumf %126, %127 : vector<1x1x16xf32>
    %cst_26 = arith.constant 1.000000e+00 : f32
    %129 = vector.broadcast %cst_26 : f32 to vector<1x1x16xf32>
    %130 = arith.divf %129, %128 : vector<1x1x16xf32>
    %131 = vector.shape_cast %11 : vector<16x16xf32> to vector<1x16x16xf32>
    %132 = vector.broadcast %130 : vector<1x1x16xf32> to vector<1x16x16xf32>
    %133 = arith.mulf %132, %131 : vector<1x16x16xf32>
    %cst_27 = arith.constant dense<0.000000e+00> : vector<1x16xf32>
    %134 = vector.multi_reduction <add>, %133, %cst_27 [2] : vector<1x16x16xf32> to vector<1x16xf32>
    %135 = vector.shape_cast %134 : vector<1x16xf32> to vector<1x16x1xf32>
    %cst_28 = arith.constant 6.000000e-01 : f32
    %136 = vector.broadcast %cst_28 : f32 to vector<1x16x16xf32>
    %137 = arith.cmpf olt, %38, %136 : vector<1x16x16xf32>
    %138 = arith.extui %137 : vector<1x16x16xi1> to vector<1x16x16xi32>
    %139 = arith.sitofp %138 : vector<1x16x16xi32> to vector<1x16x16xf32>
    %140 = vector.shape_cast %8 : vector<16x16xf32> to vector<1x16x16xf32>
    %141 = arith.mulf %140, %139 : vector<1x16x16xf32>
    %cst_29 = arith.constant dense<0.000000e+00> : vector<1x16xf32>
    %142 = vector.multi_reduction <add>, %141, %cst_29 [2] : vector<1x16x16xf32> to vector<1x16xf32>
    %143 = vector.shape_cast %142 : vector<1x16xf32> to vector<1x16x1xf32>
    %144 = vector.shape_cast %141 : vector<1x16x16xf32> to vector<1x16x16x1xf32>
    %145 = arith.truncf %144 : vector<1x16x16x1xf32> to vector<1x16x16x1xbf16>
    %146 = arith.truncf %38 : vector<1x16x16xf32> to vector<1x16x16xbf16>
    %147 = vector.shape_cast %39 : vector<16x1xf32> to vector<1x16x1xf32>
    %148 = vector.shape_cast %40 : vector<16x1xf32> to vector<1x16x1xf32>
    %149 = tpu.concatenate %135, %147, %148 in 2 : vector<1x16x1xf32>, vector<1x16x1xf32>, vector<1x16x1xf32> -> vector<1x16x3xf32>
    %150 = vector.shape_cast %149 : vector<1x16x3xf32> to vector<16x3xf32>
    %151 = arith.truncf %150 : vector<16x3xf32> to vector<16x3xbf16>
    %c0_30 = arith.constant 0 : index
    %c0_31 = arith.constant 0 : index
    %152 = vector.load %arg6[%c0_30, %c0_31] : memref<3x128xbf16, #tpu.memory_space<vmem>>, vector<3x128xbf16>
    %cst_32 = arith.constant dense<0.000000e+00> : vector<16x128xf32>
    %153 = tpu.matmul %151, %152, %cst_32 {dimension_numbers = #tpu.dot_dimension_numbers<[1], [0], [0], [1], [0, 0, 1, 1], [], []>} : vector<16x3xbf16>, vector<3x128xbf16>, vector<16x128xf32> -> vector<16x128xf32>
    %154 = vector.shape_cast %153 : vector<16x128xf32> to vector<1x16x128xf32>
    %155 = vector.extract_strided_slice %154 {offsets = [0, 0, 0], sizes = [1, 16, 64], strides = [1, 1, 1]} : vector<1x16x128xf32> to vector<1x16x64xf32>
    %c0_33 = arith.constant 0 : index
    %c0_34 = arith.constant 0 : index
    %156 = vector.load %arg7[%c0_33, %c0_34] : memref<1x64xf32, #tpu.memory_space<vmem>>, vector<1x64xf32>
    %157 = vector.shape_cast %156 : vector<1x64xf32> to vector<1x1x64xf32>
    %158 = vector.broadcast %157 : vector<1x1x64xf32> to vector<1x16x64xf32>
    %159 = arith.addf %155, %158 : vector<1x16x64xf32>
    %160 = arith.truncf %159 : vector<1x16x64xf32> to vector<1x16x64xbf16>
    %161 = vector.extract_strided_slice %154 {offsets = [0, 0, 64], sizes = [1, 16, 64], strides = [1, 1, 1]} : vector<1x16x128xf32> to vector<1x16x64xf32>
    %162 = arith.truncf %161 : vector<1x16x64xf32> to vector<1x16x64xbf16>
    %c0_35 = arith.constant 0 : index
    %c0_36 = arith.constant 0 : index
    %163 = vector.load %arg8[%c0_35, %c0_36] : memref<1x64xf32, #tpu.memory_space<vmem>>, vector<1x64xf32>
    %164 = vector.shape_cast %163 : vector<1x64xf32> to vector<1x1x1x64xf32>
    %165 = arith.truncf %164 : vector<1x1x1x64xf32> to vector<1x1x1x64xbf16>
    %166 = vector.shape_cast %160 : vector<1x16x64xbf16> to vector<1x16x1x64xbf16>
    %167 = vector.shape_cast %162 : vector<1x16x64xbf16> to vector<1x1x16x64xbf16>
    %168 = vector.broadcast %166 : vector<1x16x1x64xbf16> to vector<1x16x16x64xbf16>
    %169 = vector.broadcast %167 : vector<1x1x16x64xbf16> to vector<1x16x16x64xbf16>
    %170 = arith.addf %168, %169 : vector<1x16x16x64xbf16>
    %171 = vector.shape_cast %146 : vector<1x16x16xbf16> to vector<1x16x16x1xbf16>
    %172 = vector.broadcast %171 : vector<1x16x16x1xbf16> to vector<1x16x16x64xbf16>
    %173 = vector.broadcast %165 : vector<1x1x1x64xbf16> to vector<1x16x16x64xbf16>
    %174 = arith.mulf %172, %173 : vector<1x16x16x64xbf16>
    %175 = arith.addf %170, %174 : vector<1x16x16x64xbf16>
    %176 = arith.negf %175 : vector<1x16x16x64xbf16>
    %177 = math.exp %176 : vector<1x16x16x64xbf16>
    %cst_37 = arith.constant 1.000000e+00 : bf16
    %178 = vector.broadcast %cst_37 : bf16 to vector<1x16x16x64xbf16>
    %179 = arith.addf %178, %177 : vector<1x16x16x64xbf16>
    %180 = arith.divf %178, %179 : vector<1x16x16x64xbf16>
    %181 = arith.mulf %175, %180 : vector<1x16x16x64xbf16>
    %182 = vector.broadcast %145 : vector<1x16x16x1xbf16> to vector<1x16x16x64xbf16>
    %183 = arith.mulf %181, %182 : vector<1x16x16x64xbf16>
    %184 = arith.extf %183 : vector<1x16x16x64xbf16> to vector<1x16x16x64xf32>
    %cst_38 = arith.constant dense<0.000000e+00> : vector<1x16x64xf32>
    %185 = vector.multi_reduction <add>, %184, %cst_38 [2] : vector<1x16x16x64xf32> to vector<1x16x64xf32>
    %186 = arith.truncf %185 : vector<1x16x64xf32> to vector<1x16x64xbf16>
    %187 = vector.shape_cast %186 : vector<1x16x64xbf16> to vector<16x64xbf16>
    %c0_39 = arith.constant 0 : index
    %c0_40 = arith.constant 0 : index
    %188 = vector.load %arg9[%c0_39, %c0_40] : memref<64x64xbf16, #tpu.memory_space<vmem>>, vector<64x64xbf16>
    %cst_41 = arith.constant dense<0.000000e+00> : vector<16x64xf32>
    %189 = tpu.matmul %187, %188, %cst_41 {dimension_numbers = #tpu.dot_dimension_numbers<[1], [0], [0], [1], [0, 0, 1, 1], [], []>} : vector<16x64xbf16>, vector<64x64xbf16>, vector<16x64xf32> -> vector<16x64xf32>
    %190 = vector.shape_cast %189 : vector<16x64xf32> to vector<1x16x64xf32>
    %c0_42 = arith.constant 0 : index
    %c0_43 = arith.constant 0 : index
    %191 = vector.load %arg10[%c0_42, %c0_43] : memref<1x64xf32, #tpu.memory_space<vmem>>, vector<1x64xf32>
    %192 = vector.shape_cast %191 : vector<1x64xf32> to vector<1x1x64xf32>
    %193 = vector.broadcast %143 : vector<1x16x1xf32> to vector<1x16x64xf32>
    %194 = vector.broadcast %192 : vector<1x1x64xf32> to vector<1x16x64xf32>
    %195 = arith.mulf %193, %194 : vector<1x16x64xf32>
    %196 = arith.addf %190, %195 : vector<1x16x64xf32>
    %197 = arith.negf %196 : vector<1x16x64xf32>
    %198 = math.exp %197 : vector<1x16x64xf32>
    %cst_44 = arith.constant 1.000000e+00 : f32
    %199 = vector.broadcast %cst_44 : f32 to vector<1x16x64xf32>
    %200 = arith.addf %199, %198 : vector<1x16x64xf32>
    %201 = arith.divf %199, %200 : vector<1x16x64xf32>
    %202 = arith.mulf %196, %201 : vector<1x16x64xf32>
    %203 = vector.shape_cast %202 : vector<1x16x64xf32> to vector<16x64xf32>
    %204 = arith.truncf %203 : vector<16x64xf32> to vector<16x64xbf16>
    %c0_45 = arith.constant 0 : index
    %c0_46 = arith.constant 0 : index
    %205 = vector.load %arg11[%c0_45, %c0_46] : memref<64x128xbf16, #tpu.memory_space<vmem>>, vector<64x128xbf16>
    %cst_47 = arith.constant dense<0.000000e+00> : vector<16x128xf32>
    %206 = tpu.matmul %204, %205, %cst_47 {dimension_numbers = #tpu.dot_dimension_numbers<[1], [0], [0], [1], [0, 0, 1, 1], [], []>} : vector<16x64xbf16>, vector<64x128xbf16>, vector<16x128xf32> -> vector<16x128xf32>
    %207 = vector.shape_cast %206 : vector<16x128xf32> to vector<1x16x128xf32>
    %208 = vector.extract_strided_slice %207 {offsets = [0, 0, 0], sizes = [1, 16, 64], strides = [1, 1, 1]} : vector<1x16x128xf32> to vector<1x16x64xf32>
    %c0_48 = arith.constant 0 : index
    %c0_49 = arith.constant 0 : index
    %209 = vector.load %arg12[%c0_48, %c0_49] : memref<1x64xf32, #tpu.memory_space<vmem>>, vector<1x64xf32>
    %210 = vector.shape_cast %209 : vector<1x64xf32> to vector<1x1x64xf32>
    %211 = vector.broadcast %210 : vector<1x1x64xf32> to vector<1x16x64xf32>
    %212 = arith.addf %208, %211 : vector<1x16x64xf32>
    %213 = arith.truncf %212 : vector<1x16x64xf32> to vector<1x16x64xbf16>
    %214 = vector.extract_strided_slice %207 {offsets = [0, 0, 64], sizes = [1, 16, 64], strides = [1, 1, 1]} : vector<1x16x128xf32> to vector<1x16x64xf32>
    %215 = arith.truncf %214 : vector<1x16x64xf32> to vector<1x16x64xbf16>
    %c0_50 = arith.constant 0 : index
    %c0_51 = arith.constant 0 : index
    %216 = vector.load %arg13[%c0_50, %c0_51] : memref<1x64xf32, #tpu.memory_space<vmem>>, vector<1x64xf32>
    %217 = vector.shape_cast %216 : vector<1x64xf32> to vector<1x1x1x64xf32>
    %218 = arith.truncf %217 : vector<1x1x1x64xf32> to vector<1x1x1x64xbf16>
    %219 = vector.shape_cast %213 : vector<1x16x64xbf16> to vector<1x16x1x64xbf16>
    %220 = vector.shape_cast %215 : vector<1x16x64xbf16> to vector<1x1x16x64xbf16>
    %221 = vector.broadcast %219 : vector<1x16x1x64xbf16> to vector<1x16x16x64xbf16>
    %222 = vector.broadcast %220 : vector<1x1x16x64xbf16> to vector<1x16x16x64xbf16>
    %223 = arith.addf %221, %222 : vector<1x16x16x64xbf16>
    %224 = vector.shape_cast %146 : vector<1x16x16xbf16> to vector<1x16x16x1xbf16>
    %225 = vector.broadcast %224 : vector<1x16x16x1xbf16> to vector<1x16x16x64xbf16>
    %226 = vector.broadcast %218 : vector<1x1x1x64xbf16> to vector<1x16x16x64xbf16>
    %227 = arith.mulf %225, %226 : vector<1x16x16x64xbf16>
    %228 = arith.addf %223, %227 : vector<1x16x16x64xbf16>
    %229 = arith.negf %228 : vector<1x16x16x64xbf16>
    %230 = math.exp %229 : vector<1x16x16x64xbf16>
    %cst_52 = arith.constant 1.000000e+00 : bf16
    %231 = vector.broadcast %cst_52 : bf16 to vector<1x16x16x64xbf16>
    %232 = arith.addf %231, %230 : vector<1x16x16x64xbf16>
    %233 = arith.divf %231, %232 : vector<1x16x16x64xbf16>
    %234 = arith.mulf %228, %233 : vector<1x16x16x64xbf16>
    %235 = vector.broadcast %145 : vector<1x16x16x1xbf16> to vector<1x16x16x64xbf16>
    %236 = arith.mulf %234, %235 : vector<1x16x16x64xbf16>
    %237 = arith.extf %236 : vector<1x16x16x64xbf16> to vector<1x16x16x64xf32>
    %cst_53 = arith.constant dense<0.000000e+00> : vector<1x16x64xf32>
    %238 = vector.multi_reduction <add>, %237, %cst_53 [2] : vector<1x16x16x64xf32> to vector<1x16x64xf32>
    %239 = arith.truncf %238 : vector<1x16x64xf32> to vector<1x16x64xbf16>
    %240 = vector.shape_cast %239 : vector<1x16x64xbf16> to vector<16x64xbf16>
    %c0_54 = arith.constant 0 : index
    %c0_55 = arith.constant 0 : index
    %241 = vector.load %arg14[%c0_54, %c0_55] : memref<64x64xbf16, #tpu.memory_space<vmem>>, vector<64x64xbf16>
    %cst_56 = arith.constant dense<0.000000e+00> : vector<16x64xf32>
    %242 = tpu.matmul %240, %241, %cst_56 {dimension_numbers = #tpu.dot_dimension_numbers<[1], [0], [0], [1], [0, 0, 1, 1], [], []>} : vector<16x64xbf16>, vector<64x64xbf16>, vector<16x64xf32> -> vector<16x64xf32>
    %243 = vector.shape_cast %242 : vector<16x64xf32> to vector<1x16x64xf32>
    %c0_57 = arith.constant 0 : index
    %c0_58 = arith.constant 0 : index
    %244 = vector.load %arg15[%c0_57, %c0_58] : memref<1x64xf32, #tpu.memory_space<vmem>>, vector<1x64xf32>
    %245 = vector.shape_cast %244 : vector<1x64xf32> to vector<1x1x64xf32>
    %246 = vector.broadcast %143 : vector<1x16x1xf32> to vector<1x16x64xf32>
    %247 = vector.broadcast %245 : vector<1x1x64xf32> to vector<1x16x64xf32>
    %248 = arith.mulf %246, %247 : vector<1x16x64xf32>
    %249 = arith.addf %243, %248 : vector<1x16x64xf32>
    %250 = arith.negf %249 : vector<1x16x64xf32>
    %251 = math.exp %250 : vector<1x16x64xf32>
    %cst_59 = arith.constant 1.000000e+00 : f32
    %252 = vector.broadcast %cst_59 : f32 to vector<1x16x64xf32>
    %253 = arith.addf %252, %251 : vector<1x16x64xf32>
    %254 = arith.divf %252, %253 : vector<1x16x64xf32>
    %255 = arith.mulf %249, %254 : vector<1x16x64xf32>
    %256 = vector.shape_cast %255 : vector<1x16x64xf32> to vector<16x64xf32>
    %257 = arith.truncf %256 : vector<16x64xf32> to vector<16x64xbf16>
    %c0_60 = arith.constant 0 : index
    %c0_61 = arith.constant 0 : index
    %258 = vector.load %arg16[%c0_60, %c0_61] : memref<64x128xbf16, #tpu.memory_space<vmem>>, vector<64x128xbf16>
    %cst_62 = arith.constant dense<0.000000e+00> : vector<16x128xf32>
    %259 = tpu.matmul %257, %258, %cst_62 {dimension_numbers = #tpu.dot_dimension_numbers<[1], [0], [0], [1], [0, 0, 1, 1], [], []>} : vector<16x64xbf16>, vector<64x128xbf16>, vector<16x128xf32> -> vector<16x128xf32>
    %260 = vector.shape_cast %259 : vector<16x128xf32> to vector<1x16x128xf32>
    %261 = vector.extract_strided_slice %260 {offsets = [0, 0, 0], sizes = [1, 16, 64], strides = [1, 1, 1]} : vector<1x16x128xf32> to vector<1x16x64xf32>
    %c0_63 = arith.constant 0 : index
    %c0_64 = arith.constant 0 : index
    %262 = vector.load %arg17[%c0_63, %c0_64] : memref<1x64xf32, #tpu.memory_space<vmem>>, vector<1x64xf32>
    %263 = vector.shape_cast %262 : vector<1x64xf32> to vector<1x1x64xf32>
    %264 = vector.broadcast %263 : vector<1x1x64xf32> to vector<1x16x64xf32>
    %265 = arith.addf %261, %264 : vector<1x16x64xf32>
    %266 = arith.truncf %265 : vector<1x16x64xf32> to vector<1x16x64xbf16>
    %267 = vector.extract_strided_slice %260 {offsets = [0, 0, 64], sizes = [1, 16, 64], strides = [1, 1, 1]} : vector<1x16x128xf32> to vector<1x16x64xf32>
    %268 = arith.truncf %267 : vector<1x16x64xf32> to vector<1x16x64xbf16>
    %c0_65 = arith.constant 0 : index
    %c0_66 = arith.constant 0 : index
    %269 = vector.load %arg18[%c0_65, %c0_66] : memref<1x64xf32, #tpu.memory_space<vmem>>, vector<1x64xf32>
    %270 = vector.shape_cast %269 : vector<1x64xf32> to vector<1x1x1x64xf32>
    %271 = arith.truncf %270 : vector<1x1x1x64xf32> to vector<1x1x1x64xbf16>
    %272 = vector.shape_cast %266 : vector<1x16x64xbf16> to vector<1x16x1x64xbf16>
    %273 = vector.shape_cast %268 : vector<1x16x64xbf16> to vector<1x1x16x64xbf16>
    %274 = vector.broadcast %272 : vector<1x16x1x64xbf16> to vector<1x16x16x64xbf16>
    %275 = vector.broadcast %273 : vector<1x1x16x64xbf16> to vector<1x16x16x64xbf16>
    %276 = arith.addf %274, %275 : vector<1x16x16x64xbf16>
    %277 = vector.shape_cast %146 : vector<1x16x16xbf16> to vector<1x16x16x1xbf16>
    %278 = vector.broadcast %277 : vector<1x16x16x1xbf16> to vector<1x16x16x64xbf16>
    %279 = vector.broadcast %271 : vector<1x1x1x64xbf16> to vector<1x16x16x64xbf16>
    %280 = arith.mulf %278, %279 : vector<1x16x16x64xbf16>
    %281 = arith.addf %276, %280 : vector<1x16x16x64xbf16>
    %282 = arith.negf %281 : vector<1x16x16x64xbf16>
    %283 = math.exp %282 : vector<1x16x16x64xbf16>
    %cst_67 = arith.constant 1.000000e+00 : bf16
    %284 = vector.broadcast %cst_67 : bf16 to vector<1x16x16x64xbf16>
    %285 = arith.addf %284, %283 : vector<1x16x16x64xbf16>
    %286 = arith.divf %284, %285 : vector<1x16x16x64xbf16>
    %287 = arith.mulf %281, %286 : vector<1x16x16x64xbf16>
    %288 = vector.broadcast %145 : vector<1x16x16x1xbf16> to vector<1x16x16x64xbf16>
    %289 = arith.mulf %287, %288 : vector<1x16x16x64xbf16>
    %290 = arith.extf %289 : vector<1x16x16x64xbf16> to vector<1x16x16x64xf32>
    %cst_68 = arith.constant dense<0.000000e+00> : vector<1x16x64xf32>
    %291 = vector.multi_reduction <add>, %290, %cst_68 [2] : vector<1x16x16x64xf32> to vector<1x16x64xf32>
    %292 = arith.truncf %291 : vector<1x16x64xf32> to vector<1x16x64xbf16>
    %293 = vector.shape_cast %292 : vector<1x16x64xbf16> to vector<16x64xbf16>
    %c0_69 = arith.constant 0 : index
    %c0_70 = arith.constant 0 : index
    %294 = vector.load %arg19[%c0_69, %c0_70] : memref<64x2xbf16, #tpu.memory_space<vmem>>, vector<64x2xbf16>
    %cst_71 = arith.constant dense<0.000000e+00> : vector<16x2xf32>
    %295 = tpu.matmul %293, %294, %cst_71 {dimension_numbers = #tpu.dot_dimension_numbers<[1], [0], [0], [1], [0, 0, 1, 1], [], []>} : vector<16x64xbf16>, vector<64x2xbf16>, vector<16x2xf32> -> vector<16x2xf32>
    %296 = vector.shape_cast %295 : vector<16x2xf32> to vector<1x16x2xf32>
    %c0_72 = arith.constant 0 : index
    %c0_73 = arith.constant 0 : index
    %297 = vector.load %arg20[%c0_72, %c0_73] : memref<1x2xf32, #tpu.memory_space<vmem>>, vector<1x2xf32>
    %298 = vector.shape_cast %297 : vector<1x2xf32> to vector<1x1x2xf32>
    %299 = vector.broadcast %143 : vector<1x16x1xf32> to vector<1x16x2xf32>
    %300 = vector.broadcast %298 : vector<1x1x2xf32> to vector<1x16x2xf32>
    %301 = arith.mulf %299, %300 : vector<1x16x2xf32>
    %302 = arith.addf %296, %301 : vector<1x16x2xf32>
    %303 = vector.extract_strided_slice %302 {offsets = [0, 0, 0], sizes = [1, 16, 1], strides = [1, 1, 1]} : vector<1x16x2xf32> to vector<1x16x1xf32>
    %304 = vector.extract_strided_slice %302 {offsets = [0, 0, 1], sizes = [1, 16, 1], strides = [1, 1, 1]} : vector<1x16x2xf32> to vector<1x16x1xf32>
    %c0_74 = arith.constant 0 : index
    %305 = memref.load %arg1[%c0_74] : memref<2xf32, #tpu.memory_space<smem>>
    %c1 = arith.constant 1 : index
    %306 = memref.load %arg1[%c1] : memref<2xf32, #tpu.memory_space<smem>>
    %cst_75 = arith.constant 1.951410e-02 : f32
    %307 = vector.broadcast %cst_75 : f32 to vector<16x1xf32>
    %308 = arith.addf %40, %307 : vector<16x1xf32>
    %309 = arith.negf %304 : vector<1x16x1xf32>
    %310 = math.exp %309 : vector<1x16x1xf32>
    %cst_76 = arith.constant 1.000000e+00 : f32
    %311 = vector.broadcast %cst_76 : f32 to vector<1x16x1xf32>
    %312 = arith.addf %311, %310 : vector<1x16x1xf32>
    %313 = arith.divf %311, %312 : vector<1x16x1xf32>
    %cst_77 = arith.constant 2.000000e+00 : f32
    %314 = vector.broadcast %cst_77 : f32 to vector<1x16x1xf32>
    %315 = arith.mulf %314, %313 : vector<1x16x1xf32>
    %cst_78 = arith.constant 1.000000e+00 : f32
    %316 = vector.broadcast %cst_78 : f32 to vector<1x16x1xf32>
    %317 = arith.subf %316, %315 : vector<1x16x1xf32>
    %318 = vector.broadcast %306 : f32 to vector<16x1xf32>
    %319 = arith.addf %308, %318 : vector<16x1xf32>
    %320 = arith.mulf %319, %319 : vector<16x1xf32>
    %321 = vector.shape_cast %320 : vector<16x1xf32> to vector<1x16x1xf32>
    %322 = arith.mulf %317, %321 : vector<1x16x1xf32>
    %323 = vector.broadcast %305 : f32 to vector<1x16x1xf32>
    %324 = arith.mulf %322, %323 : vector<1x16x1xf32>
    %325 = arith.negf %303 : vector<1x16x1xf32>
    %326 = math.exp %325 : vector<1x16x1xf32>
    %cst_79 = arith.constant 1.000000e+00 : f32
    %327 = vector.broadcast %cst_79 : f32 to vector<1x16x1xf32>
    %328 = arith.addf %327, %326 : vector<1x16x1xf32>
    %329 = arith.divf %327, %328 : vector<1x16x1xf32>
    %cst_80 = arith.constant 5.000000e-01 : f32
    %330 = vector.broadcast %cst_80 : f32 to vector<1x16x1xf32>
    %331 = arith.mulf %329, %330 : vector<1x16x1xf32>
    %cst_81 = arith.constant 2.000000e+00 : f32
    %332 = vector.broadcast %cst_81 : f32 to vector<1x16x1xf32>
    %333 = arith.mulf %331, %332 : vector<1x16x1xf32>
    %cst_82 = arith.constant 5.000000e-01 : f32
    %334 = vector.broadcast %cst_82 : f32 to vector<1x16x1xf32>
    %335 = arith.addf %334, %333 : vector<1x16x1xf32>
    %336 = arith.mulf %135, %335 : vector<1x16x1xf32>
    %337 = vector.shape_cast %11 : vector<16x16xf32> to vector<1x16x16xf32>
    %338 = vector.broadcast %336 : vector<1x16x1xf32> to vector<1x16x16xf32>
    %339 = arith.mulf %338, %337 : vector<1x16x16xf32>
    %cst_83 = arith.constant dense<0.000000e+00> : vector<1x16xf32>
    %340 = vector.multi_reduction <add>, %339, %cst_83 [1] : vector<1x16x16xf32> to vector<1x16xf32>
    %341 = vector.shape_cast %340 : vector<1x16xf32> to vector<1x1x16xf32>
    %342 = arith.mulf %47, %47 : vector<1x16x16xf32>
    %343 = vector.broadcast %336 : vector<1x16x1xf32> to vector<1x16x16xf32>
    %344 = vector.broadcast %341 : vector<1x1x16xf32> to vector<1x16x16xf32>
    %345 = arith.mulf %343, %344 : vector<1x16x16xf32>
    %cst_84 = arith.constant 0.000000e+00 : f32
    %346 = vector.broadcast %cst_84 : f32 to vector<1x16x16xf32>
    %347 = arith.subf %346, %342 : vector<1x16x16xf32>
    %cst_85 = arith.constant 4.000000e+00 : f32
    %348 = vector.broadcast %cst_85 : f32 to vector<1x16x16xf32>
    %349 = arith.mulf %348, %345 : vector<1x16x16xf32>
    %350 = arith.divf %347, %349 : vector<1x16x16xf32>
    %351 = math.exp %350 : vector<1x16x16xf32>
    %352 = arith.mulf %345, %351 : vector<1x16x16xf32>
    %353 = arith.addf %342, %352 : vector<1x16x16xf32>
    %354 = math.sqrt %353 : vector<1x16x16xf32>
    %355 = vector.broadcast %39 : vector<16x1xf32> to vector<16x16xf32>
    %356 = vector.broadcast %42 : vector<1x16xf32> to vector<16x16xf32>
    %357 = arith.mulf %355, %356 : vector<16x16xf32>
    %358 = vector.shape_cast %357 : vector<16x16xf32> to vector<1x16x16xf32>
    %359 = arith.divf %358, %354 : vector<1x16x16xf32>
    %360 = vector.shape_cast %8 : vector<16x16xf32> to vector<1x16x16xf32>
    %361 = arith.mulf %359, %360 : vector<1x16x16xf32>
    %cst_86 = arith.constant dense<0.000000e+00> : vector<1x16xf32>
    %362 = vector.multi_reduction <add>, %361, %cst_86 [2] : vector<1x16x16xf32> to vector<1x16xf32>
    %363 = vector.shape_cast %362 : vector<1x16xf32> to vector<1x16x1xf32>
    %364 = arith.mulf %39, %39 : vector<16x1xf32>
    %365 = vector.shape_cast %364 : vector<16x1xf32> to vector<1x16x1xf32>
    %366 = arith.divf %365, %336 : vector<1x16x1xf32>
    %367 = arith.addf %366, %363 : vector<1x16x1xf32>
    %cst_87 = arith.constant -6.858280e+01 : f32
    %368 = vector.broadcast %cst_87 : f32 to vector<1x16x1xf32>
    %369 = arith.mulf %368, %367 : vector<1x16x1xf32>
    %370 = arith.addf %369, %324 : vector<1x16x1xf32>
    %371 = vector.shape_cast %370 : vector<1x16x1xf32> to vector<16x1xf32>
    %cst_88 = arith.constant dense<0.000000e+00> : vector<1xf32>
    %372 = vector.multi_reduction <add>, %371, %cst_88 [0] : vector<16x1xf32> to vector<1xf32>
    %373 = vector.shape_cast %372 : vector<1xf32> to vector<1x1xf32>
    %c0_89 = arith.constant 0 : index
    %c0_90 = arith.constant 0 : index
    %c0_91 = arith.constant 0 : index
    %374 = vector.load %arg21[%c0_89, %c0_90, %c0_91] : memref<1x1x1xf32, #tpu.memory_space<vmem>>, vector<1x1x1xf32>
    %375 = vector.shape_cast %374 : vector<1x1x1xf32> to vector<1x1xf32>
    %376 = vector.shape_cast %373 : vector<1x1xf32> to vector<1x1x1xf32>
    tpu.vector_store %arg21[%c0_89, %c0_90, %c0_91], %376 {strides = array<i32>} : memref<1x1x1xf32, #tpu.memory_space<vmem>>, vector<1x1x1xf32>,
    return
  }
  func.func @transform_0(%arg0: i32) -> i32 {
    %c0_i32 = arith.constant 0 : i32
    %c0_i32_0 = arith.constant 0 : i32
    return %c0_i32 : i32
  }
  func.func @transform_1(%arg0: i32) -> (i32, i32, i32) {
    %c0_i32 = arith.constant 0 : i32
    %c0_i32_0 = arith.constant 0 : i32
    %c0_i32_1 = arith.constant 0 : i32
    return %arg0, %c0_i32, %c0_i32_0 : i32, i32, i32
  }
  func.func @transform_2(%arg0: i32) -> (i32, i32, i32) {
    %c0_i32 = arith.constant 0 : i32
    %c0_i32_0 = arith.constant 0 : i32
    %c0_i32_1 = arith.constant 0 : i32
    return %arg0, %c0_i32, %c0_i32_0 : i32, i32, i32
  }
  func.func @transform_3(%arg0: i32) -> (i32, i32) {
    %c0_i32 = arith.constant 0 : i32
    %c0_i32_0 = arith.constant 0 : i32
    %c0_i32_1 = arith.constant 0 : i32
    return %c0_i32, %c0_i32_0 : i32, i32
  }
  func.func @transform_4(%arg0: i32) -> (i32, i32) {
    %c0_i32 = arith.constant 0 : i32
    %c0_i32_0 = arith.constant 0 : i32
    %c0_i32_1 = arith.constant 0 : i32
    return %c0_i32, %c0_i32_0 : i32, i32
  }
  func.func @transform_5(%arg0: i32) -> (i32, i32) {
    %c0_i32 = arith.constant 0 : i32
    %c0_i32_0 = arith.constant 0 : i32
    %c0_i32_1 = arith.constant 0 : i32
    return %c0_i32, %c0_i32_0 : i32, i32
  }
  func.func @transform_6(%arg0: i32) -> (i32, i32) {
    %c0_i32 = arith.constant 0 : i32
    %c0_i32_0 = arith.constant 0 : i32
    %c0_i32_1 = arith.constant 0 : i32
    return %c0_i32, %c0_i32_0 : i32, i32
  }
  func.func @transform_7(%arg0: i32) -> (i32, i32) {
    %c0_i32 = arith.constant 0 : i32
    %c0_i32_0 = arith.constant 0 : i32
    %c0_i32_1 = arith.constant 0 : i32
    return %c0_i32, %c0_i32_0 : i32, i32
  }
  func.func @transform_8(%arg0: i32) -> (i32, i32) {
    %c0_i32 = arith.constant 0 : i32
    %c0_i32_0 = arith.constant 0 : i32
    %c0_i32_1 = arith.constant 0 : i32
    return %c0_i32, %c0_i32_0 : i32, i32
  }
  func.func @transform_9(%arg0: i32) -> (i32, i32) {
    %c0_i32 = arith.constant 0 : i32
    %c0_i32_0 = arith.constant 0 : i32
    %c0_i32_1 = arith.constant 0 : i32
    return %c0_i32, %c0_i32_0 : i32, i32
  }
  func.func @transform_10(%arg0: i32) -> (i32, i32) {
    %c0_i32 = arith.constant 0 : i32
    %c0_i32_0 = arith.constant 0 : i32
    %c0_i32_1 = arith.constant 0 : i32
    return %c0_i32, %c0_i32_0 : i32, i32
  }
  func.func @transform_11(%arg0: i32) -> (i32, i32) {
    %c0_i32 = arith.constant 0 : i32
    %c0_i32_0 = arith.constant 0 : i32
    %c0_i32_1 = arith.constant 0 : i32
    return %c0_i32, %c0_i32_0 : i32, i32
  }
  func.func @transform_12(%arg0: i32) -> (i32, i32) {
    %c0_i32 = arith.constant 0 : i32
    %c0_i32_0 = arith.constant 0 : i32
    %c0_i32_1 = arith.constant 0 : i32
    return %c0_i32, %c0_i32_0 : i32, i32
  }
  func.func @transform_13(%arg0: i32) -> (i32, i32) {
    %c0_i32 = arith.constant 0 : i32
    %c0_i32_0 = arith.constant 0 : i32
    %c0_i32_1 = arith.constant 0 : i32
    return %c0_i32, %c0_i32_0 : i32, i32
  }
  func.func @transform_14(%arg0: i32) -> (i32, i32) {
    %c0_i32 = arith.constant 0 : i32
    %c0_i32_0 = arith.constant 0 : i32
    %c0_i32_1 = arith.constant 0 : i32
    return %c0_i32, %c0_i32_0 : i32, i32
  }
  func.func @transform_15(%arg0: i32) -> (i32, i32) {
    %c0_i32 = arith.constant 0 : i32
    %c0_i32_0 = arith.constant 0 : i32
    %c0_i32_1 = arith.constant 0 : i32
    return %c0_i32, %c0_i32_0 : i32, i32
  }
  func.func @transform_16(%arg0: i32) -> (i32, i32) {
    %c0_i32 = arith.constant 0 : i32
    %c0_i32_0 = arith.constant 0 : i32
    %c0_i32_1 = arith.constant 0 : i32
    return %c0_i32, %c0_i32_0 : i32, i32
  }
  func.func @transform_17(%arg0: i32) -> (i32, i32) {
    %c0_i32 = arith.constant 0 : i32
    %c0_i32_0 = arith.constant 0 : i32
    %c0_i32_1 = arith.constant 0 : i32
    return %c0_i32, %c0_i32_0 : i32, i32
  }
  func.func @transform_18(%arg0: i32) -> (i32, i32) {
    %c0_i32 = arith.constant 0 : i32
    %c0_i32_0 = arith.constant 0 : i32
    %c0_i32_1 = arith.constant 0 : i32
    return %c0_i32, %c0_i32_0 : i32, i32
  }
  func.func @transform_19(%arg0: i32) -> (i32, i32) {
    %c0_i32 = arith.constant 0 : i32
    %c0_i32_0 = arith.constant 0 : i32
    %c0_i32_1 = arith.constant 0 : i32
    return %c0_i32, %c0_i32_0 : i32, i32
  }
  func.func @transform_20(%arg0: i32) -> (i32, i32, i32) {
    %c0_i32 = arith.constant 0 : i32
    %c0_i32_0 = arith.constant 0 : i32
    %c0_i32_1 = arith.constant 0 : i32
    return %arg0, %c0_i32, %c0_i32_0 : i32, i32, i32
  }
}

</mosaic_0001>

<bundles_post_ra>
// kernel: gnn3_forward.1
= control target key start
LH: loop header
LB: loop body
LE: loop exit
PB: predicated region body
PF: predicated region fallthrough
CT: control target
= control target key end

     0   :  { %s6808_s0 = inlined_call_operand.vmem [shape: f32[2], index: 0, kind: input, shape index: {}]   ;;  %s6809_s1 = inlined_call_operand.vmem [shape: f32[2,16,3], index: 1, kind: input, shape index: {}]   ;;  %s6810_s2 = inlined_call_operand.vmem [shape: f32[2,3,16], index: 2, kind: input, shape index: {}]   ;;  %s6811_s3 = inlined_call_operand.vmem [shape: f32[16,3], index: 3, kind: input, shape index: {}]   ;;  %s6812_s4 = inlined_call_operand.hbm [shape: f32[3,16], index: 4, kind: input, shape index: {}]   ;;  %s6813_s5 = inlined_call_operand.hbm [shape: bf16[3,128], index: 5, kind: input, shape index: {}]   ;;  %s6814_s6 = inlined_call_operand.hbm [shape: f32[1,64], index: 6, kind: input, shape index: {}]   ;;  %s6815_s7 = inlined_call_operand.hbm [shape: f32[1,64], index: 7, kind: input, shape index: {}]   ;;  %s6816_s8 = inlined_call_operand.vmem [shape: bf16[64,64], index: 8, kind: input, shape index: {}]   ;;  %s6817_s9 = inlined_call_operand.hbm [shape: f32[1,64], index: 9, kind: input, shape index: {}]   ;;  %s6818_s10 = inlined_call_operand.vmem [shape: bf16[64,128], index: 10, kind: input, shape index: {}]   ;;  %s6819_s11 = inlined_call_operand.vmem [shape: f32[1,64], index: 11, kind: input, shape index: {}]   ;;  %s6820_s12 = inlined_call_operand.vmem [shape: f32[1,64], index: 12, kind: input, shape index: {}]   ;;  %s6821_s13 = inlined_call_operand.vmem [shape: bf16[64,64], index: 13, kind: input, shape index: {}]   ;;  %s6822_s14 = inlined_call_operand.vmem [shape: f32[1,64], index: 14, kind: input, shape index: {}]   ;;  %s6823_s15 = inlined_call_operand.vmem [shape: bf16[64,128], index: 15, kind: input, shape index: {}]   ;;  %s6824_s16 = inlined_call_operand.vmem [shape: f32[1,64], index: 16, kind: input, shape index: {}]   ;;  %s6825_s17 = inlined_call_operand.vmem [shape: f32[1,64], index: 17, kind: input, shape index: {}]   ;;  %s6826_s18 = inlined_call_operand.vmem [shape: bf16[64,2], index: 18, kind: input, shape index: {}]   ;;  %s6827_s19 = inlined_call_operand.vmem [shape: f32[1,2], index: 19, kind: input, shape index: {}]   ;;  %s6828_s20 = inlined_call_operand.vmem [shape: f32[2,1,1], index: 20, kind: output, shape index: {}]  }
   0x1   :  { %6894 = sst [smem:[#allocation54_spill]] %s6808_s0 }
   0x2   :  { %6895 = sst [smem:[#allocation55_spill]] %s6809_s1 }
   0x3   :  { %6896 = sst [smem:[#allocation56_spill]] %s6810_s2 }
   0x4   :  { %6897 = sst [smem:[#allocation57_spill]] %s6811_s3 }
   0x5   :  { %6898 = sst [smem:[#allocation58_spill]] %s6812_s4 }
   0x6   :  { %6899 = sst [smem:[#allocation59_spill]] %s6813_s5 }
   0x7   :  { %6900 = sst [smem:[#allocation60_spill]] %s6827_s19 }
   0x8   :  { %6901 = sst [smem:[#allocation61_spill]] %s6828_s20 }
   0x9   :  { %25 = vsyncpa [#allocation4], 0 }
   0xa   :  { %26 = vsyncpa [#allocation3], 0 }
   0xb   :  { %27 = vsyncpa [#allocation7], 0 }
   0xc   :  { %28 = vsyncpa [#allocation10], 0  ;;  %s5124_s1 = smov 0  }
   0xd LB: > { %6902 = sst [smem:[#allocation16_spill]] %s5001_s1  ;;  %s5003_s22 = smov [#allocation6]   ;;  %s5001_s1 = sphi %s5124_s1, %s34_s1  }
   0xe   : > { %s533_s23 = sshll.u32 %s5003_s22, 4  ;;  %s5130_s24 = sadd.s32 4294967295, %s5001_s1   ;;  %s5135_s23 = int_to_ptr.vmem [resolvable:$true] %s533_s23 }
   0xf   : > { %p4217_p0 = scmp.ge.s32.totalorder %s5001_s1, 1  ;;  %p495_p1 = scmp.lt.s32.totalorder %s5001_s1, 3 }
  0x10   : > { %p6832_p2 = scmp.eq.s32.totalorder %s5130_s24, 0  ;;  %s5004_s25 = smov [#allocation9]  }
  0x11   : > { %p5137_p3 = pnand %p4217_p0, %p495_p1  ;;  %s555_s3 = sshll.u32 %s5004_s25, 4  ;;  %s5146_s3 = int_to_ptr.vmem [resolvable:$true] %s555_s3 }
  0x12   : > { %s6904_s28 = sld [smem:[#allocation54_spill]]  ;;  %s5005_s30 = smov [#allocation5]  }
  0x13   : > { %s6903_s2 = scalar_select %p5137_p3, 1, 0 }
  0x14   : > { %p4475_p4 = pneg %p5137_p3  ;;  %s522_s0 = sshll.u32 %s5005_s30, 4  ;;  %s5156_s0 = int_to_ptr.vmem [resolvable:$true] %s522_s0 }
  0x15   : > { %s6906_s5 = sld [smem:[#allocation59_spill]] }
  0x16   : > { %p5152_p5 = pnand %p6832_p2, %p4475_p4 }
  0x18   : > { %s508_s4 = sshll.u32 %s6904_s28, 4  ;;  %p5166_p7 = pneg %p5152_p5  ;;  %s5148_s4 = int_to_ptr.vmem [resolvable:$true] %s508_s4 }
  0x1b   : > { %s4824_s25 = scalar_lea.hbm %s6906_s5, 32 }
  0x1c   : > { %p4825_p6 = scmp.ne.s32.totalorder %s6906_s5, %s4824_s25  ;;  %p4831_p10 = scmp.lt.u32.totalorder %s4824_s25, %s6906_s5 }
  0x1e   : > { %p4827_p8 = pnand %p5166_p7, %p4825_p6 }
  0x20   : > { %p4828_p9 = pneg %p4827_p8 }
  0x22   : > { %p4833_p11 = pnand %p4831_p10, %p4828_p9 }
  0x24   : > { %4836 = shalt.err (!%p4833_p11)
}
  0x25   : > { %s4837_s21 = scalar_lea.vmem %s5135_s23, 32  ;;  %p4845_p1 = scmp.lt.s32.totalorder %s5135_s23, %s5135_s23 }
  0x26   : > { %p4838_p12 = scmp.ne.s32.totalorder %s5135_s23, %s4837_s21  ;;  %p4846_p4 = scmp.lt.s32.totalorder %s4837_s21, %s4837_s21 }
  0x28   : > { %p4840_p13 = pnand %p4838_p12, %p5166_p7  ;;  %p4847_p6 = por %p4846_p4, %p4845_p1 }
  0x2a   : > { %p4841_p0 = pneg %p4840_p13 }
  0x2c   : > { %p4848_p8 = pnand %p4847_p6, %p4841_p0 }
  0x2e   : > { %4851 = shalt.err (!%p4848_p8)
}
  0x2f   : > { %4484 = dma.hbm_to_vmem [thread:$0]  (!%p5152_p5), %s6906_s5, 32, %s5135_s23, [#allocation7]  }
  0x30   : > { %s4852_s27 = scalar_lea.hbm %s6815_s7, 16 }
  0x31   : > { %p4853_p9 = scmp.ne.s32.totalorder %s6815_s7, %s4852_s27  ;;  %p4859_p12 = scmp.lt.u32.totalorder %s4852_s27, %s6815_s7 }
  0x33   : > { %p4855_p10 = pnand %p4853_p9, %p5166_p7 }
  0x35   : > { %p4856_p11 = pneg %p4855_p10 }
  0x37   : > { %p4861_p13 = pnand %p4859_p12, %p4856_p11 }
  0x39   : > { %4864 = shalt.err (!%p4861_p13)
}
  0x3a   : > { %s4865_s23 = scalar_lea.vmem %s5146_s3, 16  ;;  %s4872_s20 = scalar_lea.vmem %s5146_s3, 32 }
  0x3b   : > { %p4866_p0 = scmp.ne.s32.totalorder %s5146_s3, %s4865_s23  ;;  %p4873_p6 = scmp.lt.s32.totalorder %s5146_s3, %s5146_s3 }
  0x3c   : > { %p4874_p8 = scmp.lt.s32.totalorder %s4872_s20, %s4865_s23 }
  0x3d   : > { %p4868_p1 = pnand %p4866_p0, %p5166_p7 }
  0x3e   : > { %p4875_p9 = por %p4874_p8, %p4873_p6 }
  0x3f   : > { %p4869_p4 = pneg %p4868_p1 }
  0x41   : > { %p4876_p10 = pnand %p4875_p9, %p4869_p4 }
  0x43   : > { %4879 = shalt.err (!%p4876_p10)
}
  0x44   : > { %4490 = dma.hbm_to_vmem [thread:$0]  (!%p5152_p5), %s6815_s7, 16, %s5146_s3, [#allocation10]  }
  0x45   : > { %s4880_s22 = scalar_lea.vmem %s5148_s4, 16  ;;  %p4888_p0 = scmp.lt.s32.totalorder %s5148_s4, %s5148_s4 }
  0x46   : > { %p4881_p11 = scmp.ne.s32.totalorder %s5148_s4, %s4880_s22  ;;  %p4889_p1 = scmp.lt.s32.totalorder %s4880_s22, %s4880_s22 }
  0x48   : > { %p4883_p12 = pnand %p4881_p11, %p5166_p7  ;;  %p4890_p4 = por %p4889_p1, %p4888_p0 }
  0x4a   : > { %p4884_p13 = pneg %p4883_p12 }
  0x4c   : > { %p4891_p6 = pnand %p4890_p4, %p4884_p13 }
  0x4e   : > { %4894 = shalt.err (!%p4891_p6)
}
  0x4f   : > { %s5006_s25 = smov [#allocation2]   ;;  %s6908_s3 = sld [smem:[#allocation58_spill]] }
  0x50   : > { %4478 = dma.vmem_to_smem (!%p5152_p5), %s5148_s4, 16, %s5006_s25, [#allocation4]  }
  0x55   : > { %s4895_s30 = scalar_lea.hbm %s6908_s3, 64 }
  0x56   : > { %p4896_p8 = scmp.ne.s32.totalorder %s6908_s3, %s4895_s30  ;;  %p4902_p11 = scmp.lt.u32.totalorder %s4895_s30, %s6908_s3 }
  0x58   : > { %p4898_p9 = pnand %p4896_p8, %p5166_p7 }
  0x5a   : > { %p4899_p10 = pneg %p4898_p9 }
  0x5c   : > { %p4904_p12 = pnand %p4902_p11, %p4899_p10 }
  0x5e   : > { %4907 = shalt.err (!%p4904_p12)
}
  0x5f   : > { %s4908_s4 = scalar_lea.vmem %s5156_s0, 64  ;;  %p4916_p4 = scmp.lt.s32.totalorder %s5156_s0, %s5156_s0 }
  0x60   : > { %p4909_p13 = scmp.ne.s32.totalorder %s5156_s0, %s4908_s4  ;;  %p4917_p6 = scmp.lt.s32.totalorder %s4908_s4, %s4908_s4 }
  0x62   : > { %p4911_p0 = pnand %p4909_p13, %p5166_p7  ;;  %p4918_p8 = por %p4917_p6, %p4916_p4 }
  0x64   : > { %p4912_p1 = pneg %p4911_p0 }
  0x66   : > { %p4919_p9 = pnand %p4918_p8, %p4912_p1 }
  0x68   : > { %4922 = shalt.err (!%p4919_p9)
}
  0x69   : > { %4481 = dma.hbm_to_vmem [thread:$0]  (!%p5152_p5), %s6908_s3, 64, %s5156_s0, [#allocation3]  }
  0x6a   : > { %s5007_s25 = smov [#allocation8]   ;;  %s5008_s27 = smov [#allocation11]  }
  0x6b   : > { %s544_s26 = sshll.u32 %s5007_s25, 4  ;;  %s569_s30 = sshll.u32 %s5008_s27, 4  ;;  %s545_s26 = int_to_ptr.vmem [resolvable:$true] %s544_s26  ;;  %s570_s30 = int_to_ptr.vmem [resolvable:$true] %s569_s30 }
  0x6c   : > { %s4923_s20 = scalar_lea.hbm %s6814_s6, 16 }
  0x6d   : > { %p4924_p10 = scmp.ne.s32.totalorder %s6814_s6, %s4923_s20  ;;  %p4930_p13 = scmp.lt.u32.totalorder %s4923_s20, %s6814_s6 }
  0x6f   : > { %p4926_p11 = pnand %p4924_p10, %p5166_p7 }
  0x71   : > { %p4927_p12 = pneg %p4926_p11 }
  0x73   : > { %p4932_p0 = pnand %p4930_p13, %p4927_p12 }
  0x75   : > { %4935 = shalt.err (!%p4932_p0)
}
  0x76   : > { %s4936_s0 = scalar_lea.vmem %s545_s26, 16  ;;  %s4943_s22 = scalar_lea.vmem %s545_s26, 32 }
  0x77   : > { %p4937_p1 = scmp.ne.s32.totalorder %s545_s26, %s4936_s0  ;;  %p4944_p8 = scmp.lt.s32.totalorder %s545_s26, %s545_s26 }
  0x78   : > { %p4945_p9 = scmp.lt.s32.totalorder %s4943_s22, %s4936_s0 }
  0x79   : > { %p4939_p4 = pnand %p4937_p1, %p5166_p7 }
  0x7a   : > { %p4946_p2 = por %p4945_p9, %p4944_p8 }
  0x7b   : > { %p4940_p6 = pneg %p4939_p4 }
  0x7d   : > { %p4947_p3 = pnand %p4946_p2, %p4940_p6 }
  0x7f   : > { %4950 = shalt.err (!%p4947_p3)
}
  0x80   : > { %4487 = dma.hbm_to_vmem [thread:$0]  (!%p5152_p5), %s6814_s6, 16, %s545_s26, [#allocation7]  }
  0x81   : > { %s4951_s23 = scalar_lea.hbm %s6817_s9, 16 }
  0x82   : > { %p4952_p10 = scmp.ne.s32.totalorder %s6817_s9, %s4951_s23  ;;  %p4958_p3 = scmp.lt.u32.totalorder %s4951_s23, %s6817_s9 }
  0x84   : > { %p4954_p11 = pnand %p4952_p10, %p5166_p7 }
  0x86   : > { %p4955_p2 = pneg %p4954_p11 }
  0x88   : > { %p4960_p12 = pnand %p4958_p3, %p4955_p2 }
  0x8a   : > { %4963 = shalt.err (!%p4960_p12)
}
  0x8b   : > { %s4964_s0 = scalar_lea.vmem %s570_s30, 16  ;;  %s4971_s26 = scalar_lea.vmem %s570_s30, 32 }
  0x8c   : > { %p4965_p13 = scmp.ne.s32.totalorder %s570_s30, %s4964_s0  ;;  %p4972_p4 = scmp.lt.s32.totalorder %s570_s30, %s570_s30 }
  0x8d   : > { %p4973_p6 = scmp.lt.s32.totalorder %s4971_s26, %s4964_s0 }
  0x8e   : > { %p4967_p0 = pnand %p4965_p13, %p5166_p7 }
  0x8f   : > { %p4974_p8 = por %p4973_p6, %p4972_p4 }
  0x90   : > { %p4968_p1 = pneg %p4967_p0 }
  0x92   : > { %p4975_p9 = pnand %p4974_p8, %p4968_p1 }
  0x94   : > { %4978 = shalt.err (!%p4975_p9)
}
  0x95   : > { %4493 = dma.hbm_to_vmem [thread:$0]  (!%p5152_p5), %s6817_s9, 16, %s570_s30, [#allocation10]  }
  0x96   : > { %p6909_p10 = scmp.ne.s32.totalorder %s6903_s2, 0 }
  0x98   : > { %627 = sbr.rel (%p6909_p10) target bundleno = 3129 (0xc39), region = 100 }
  0x9f   : > { %p6910_p11 = scmp.eq.s32.totalorder %s5130_s24, 0 }
  0xa1   : > { %4984 = dma.done.wait (%p6910_p11), [#allocation4], 16   ;;  %p6911_p7 = pmov %p6910_p11 }
  0xa3   : > { %4986 = vsyncadd (%p6911_p7), [#allocation4], 4294967280  ;;  %p6912_p2 = pmov %p6911_p7 }
  0xa5   : > { %4988 = dma.done.wait (%p6912_p2), [#allocation3], 64   ;;  %p6913_p3 = pmov %p6912_p2 }
  0xa6   : > { %p6914_p12 = pmov %p6912_p2 }
  0xa7   : > { %4990 = vsyncadd (%p6913_p3), [#allocation3], 4294967232 }
  0xa8   : > { %4992 = dma.done.wait (%p6914_p12), [#allocation7], 48   ;;  %p6915_p5 = pmov %p6912_p2 }
  0xa9   : > { %p6916_p13 = pmov %p6912_p2 }
  0xaa   : > { %4994 = vsyncadd (%p6915_p5), [#allocation7], 4294967248 }
  0xab   : > { %4996 = dma.done.wait (%p6916_p13), [#allocation10], 32   ;;  %p6917_p0 = pmov %p6912_p2 }
  0xad   : > { %4998 = vsyncadd (%p6917_p0), [#allocation10], 4294967264 }
  0xae   : > { %653 = sfence }
  0xaf   : > { %s6918_s28 = sld [smem:[#allocation57_spill]]  ;;  %p708_p1 = scmp.lt.s32.totalorder %s5130_s24, 1  ;;  %v5010_v1 = vmov 0   ;;  %v5011_v3 = vmov 1   ;;  %v5012_v6 = vmov 2   ;;  %v6834_v7 = vmov 0.0  }
  0xb0   : > { %s5009_s30 = smov 1   ;;  %4530 = vset.pattern.permute.xlu1 %v5010_v1  ;;  %4531 = vset.pattern.permute.xlu0 %v5011_v3  ;;  %s6919_s19 = sld [smem:[#allocation55_spill]]  ;;  %v728_v13 = vlaneseq  ;;  %vm932_vm13 = vcmask 130048   ;;  %vm1188_vm14 = vcmask 1040384   ;;  %vm1189_vm15 = vcmask 1041408  }
  0xb1   : > { %s7041_s24 = smov (!%p708_p1, %s5130_s24), 1  ;;  %4385 = vmatprep.subr.bf16.mxu0 %v6834_v7  ;;  %4391 = vmatprep.subr.bf16.mxu1 %v6834_v7  ;;  %s6920_s22 = sld [smem:[#allocation56_spill]] }
  0xb2   : > { %s4357_s21 = sshll.u32 %s7041_s24, 4  ;;  %s4234_s1 = sshll.u32 %s7041_s24, 2  ;;  %v5320_v15 = vshrl.u32 %v728_v13, 7  ;;  %v5337_v51 = vand.u32 127, %v728_v13 }
  0xb3   : > { %s5016_s2 = smov 64   ;;  %s4352_s29 = sld [smem:[#allocation2 + $0x1]] }
  0xb4   : > { %v5326_v16 = vsub.s32 0, %v5320_v15  ;;  %v5329_v17 = vsub.s32 1, %v5320_v15  ;;  %v5332_v20 = vsub.s32 2, %v5320_v15  ;;  %v730_v52 = vadd.s32 8, %v5320_v15  ;;  %s5018_s27 = smov 127   ;;  %s7038_s23 = sld [smem:[#allocation61_spill]] }
  0xb5   : > { %v725_v0 = vld [vmem:[%s6918_s28] sm:$0xff]  ;;  %v726_v2 = vld [vmem:[%s6918_s28 + $0x8] sm:$0xff]  ;;  %vm739_vm6 = vcmp.eq.s32.totalorder %v5320_v15, %v5337_v51  ;;  %vm733_vm10 = vcmp.ne.s32.totalorder %v5320_v15, %v5337_v51 }
  0xb6   : > { %824 = vrot.lane.b32.xlu0 %v725_v0, %s5009_s30  ;;  %s712_s4 = scalar_lea.vmem %s6919_s19, %s4357_s21  ;;  %vm734_vm2 = vcmp.ne.s32.totalorder %v730_v52, %v5337_v51  ;;  %vm740_vm7 = vcmp.eq.s32.totalorder %v730_v52, %v5337_v51 }
  0xb7   : > { %v722_v4 = vld [vmem:[%s712_s4] sm:$0xff]  ;;  %v723_v5 = vld [vmem:[%s712_s4 + $0x8] sm:$0xff]  ;;  %s716_s25 = scalar_lea.vmem %s6920_s22, %s4234_s1  ;;  %v5342_v61 = vsel %vm734_vm2, 1.0, %v6834_v7  ;;  %vm1176_vm2 = vcmask 7168   ;;  %s7029_s1 = sld [smem:[#allocation60_spill]] }
  0xb8   : > { %747 = vperm.xlu1 %4530, %v722_v4   ;;  %v724_v18 = vld [vmem:[%s716_s25] sm:$0x7]  ;;  %6921 = vst [vmem:[#allocation17_spill] sm:$0xff] %v5342_v61 }
  0xb9   : > { %v758_v21 = vrot.slane %v724_v18, %v5326_v16  ;;  %v774_v22 = vrot.slane %v724_v18, %v5329_v17  ;;  %v790_v25 = vrot.slane %v724_v18, %v5332_v20 }
  0xba   : > { %826 = vrot.lane.b32.xlu0 %v726_v2, %s5009_s30  ;;  %s3944_s30 = sld [smem:[#allocation2]]  ;;  %s719_s20 = scalar_lea.vmem %s7038_s23, %s7041_s24 }
  0xbc   : > { %752 = vperm.xlu1 %4530, %v723_v5  }
  0xbe   : > { %764 = vperm.xlu0 %4531, %v722_v4  }
  0xc0   : > { %4532 = vset.pattern.permute.xlu1 %v5011_v3  ;;  %v5354_v3 = vsub.s32 5, %v5320_v15 }
  0xc1   : > { %768 = vperm.xlu1 %4532, %v723_v5  }
  0xc2   : > { %4534 = vset.pattern.permute.xlu0 %v5012_v6 }
  0xc3   : > { %784 = vperm.xlu0 %4534, %v723_v5  }
  0xc5   : > { %4533 = vset.pattern.permute.xlu1 %v5012_v6 }
  0xc6   : > { %780 = vperm.xlu1 %4533, %v722_v4   ;;  %v5357_v4 = vsub.s32 6, %v5320_v15 }
 0x128   : > { %v5313_v8 = vpop.permute.xlu0 %824 }
 0x129   : > { %v830_v9 = vmul.f32 %v5313_v8, %v725_v0  ;;  %v5346_v0 = vsub.s32 4, %v5320_v15 }
 0x12b   : > { %834 = vperm.xlu1 %4533, %v830_v9   ;;  %v864_v10 = vmul.f32 %v830_v9, %v830_v9 }
 0x12c   : > { %v5316_v11 = vpop.permute.xlu0 %826 }
 0x12d   : > { %v831_v12 = vmul.f32 %v5316_v11, %v726_v2  ;;  %868 = vperm.xlu0 %4534, %v864_v10  }
 0x12f   : > { %839 = vperm.xlu1 %4533, %v831_v12   ;;  %v865_v14 = vmul.f32 %v831_v12, %v831_v12  ;;  %v5375_v12 = vsub.s32 7, %v5320_v15 }
 0x131   : > { %4536 = vset.pattern.permute.xlu0 %v5010_v1 }
 0x133   : > { %873 = vperm.xlu1 %4533, %v865_v14   ;;  %v5384_v14 = vsel %vm739_vm6, 1.0, %v6834_v7  ;;  %vm2061_vm6 = vcmask 1041409  }
 0x134   : > { %6922 = vst [vmem:[#allocation18_spill] sm:$0xff] %v5384_v14 }
 0x137   : > { %4535 = vset.pattern.permute.xlu1 %v5010_v1  ;;  %v748_v19 = vpop.permute.xlu1 %747 }
 0x138   : > { %v759_v26 = vsub.f32 %v748_v19, %v758_v21  ;;  %v5391_v19 = vld [vmem:[#allocation5] sm:$0x7] }
 0x13a   : > { %v761_v32 = vadd.f32 1e-06, %v759_v26 }
 0x13b   : > { %v753_v24 = vpop.permute.xlu1 %752 }
 0x13c   : > { %v760_v27 = vsub.f32 %v753_v24, %v758_v21  ;;  %v795_v39 = vmul.f32 %v761_v32, %v761_v32 }
 0x13d   : > { %v765_v23 = vpop.permute.xlu0 %764 }
 0x13e   : > { %v775_v28 = vsub.f32 %v765_v23, %v774_v22  ;;  %v762_v30 = vadd.f32 1e-06, %v760_v27 }
 0x140   : > { %v777_v33 = vadd.f32 1e-06, %v775_v28  ;;  %v769_v34 = vpop.permute.xlu1 %768  ;;  %v796_v37 = vmul.f32 %v762_v30, %v762_v30 }
 0x141   : > { %v776_v35 = vsub.f32 %v769_v34, %v774_v22  ;;  %v5396_v22 = vsel %vm740_vm7, 1.0, %v6834_v7  ;;  %vm2063_vm7 = vcmask 1042434  }
 0x142   : > { %v785_v29 = vpop.permute.xlu0 %784  ;;  %v797_v40 = vmul.f32 %v777_v33, %v777_v33  ;;  %6924 = vst [vmem:[#allocation20_spill] sm:$0xff] %v5396_v22 }
 0x143   : > { %v792_v31 = vsub.f32 %v785_v29, %v790_v25  ;;  %v778_v38 = vadd.f32 1e-06, %v776_v35 }
 0x144   : > { %v799_v46 = vadd.f32 %v797_v40, %v795_v39 }
 0x145   : > { %v794_v36 = vadd.f32 1e-06, %v792_v31  ;;  %v798_v41 = vmul.f32 %v778_v38, %v778_v38  ;;  %v781_v43 = vpop.permute.xlu1 %780 }
 0x146   : > { %v791_v44 = vsub.f32 %v781_v43, %v790_v25  ;;  %v5406_v25 = vrot.slane %v5391_v19, %v5329_v17 }
 0x147   : > { %v802_v42 = vmul.f32 %v794_v36, %v794_v36  ;;  %v800_v45 = vadd.f32 %v798_v41, %v796_v37 }
 0x148   : > { %v793_v47 = vadd.f32 1e-06, %v791_v44 }
 0x149   : > { %v804_v48 = vadd.f32 %v802_v42, %v800_v45 }
 0x14a   : > { %v801_v49 = vmul.f32 %v793_v47, %v793_v47 }
 0x14b   : > { %4557 = vrsqrt.f32 %v804_v48  ;;  %vm814_vm0 = vcmp.eq.f32.partialorder %v804_v48, inf  ;;  %v817_v54 = vand.u32 2147483648, %v804_v48  ;;  %vm816_vm1 = vcmp.eq.f32.partialorder %v804_v48, 0.0 }
 0x14c   : > { %v803_v50 = vadd.f32 %v801_v49, %v799_v46 }
 0x14e   : > { %4559 = vrsqrt.f32 %v803_v50  ;;  %vm807_vm3 = vcmp.eq.f32.partialorder %v803_v50, inf  ;;  %v810_v58 = vand.u32 2147483648, %v803_v50  ;;  %vm809_vm4 = vcmp.eq.f32.partialorder %v803_v50, 0.0 }
 0x155   : > { %v4558_v53 = vpop.eup %4557 }
 0x156   : > { %v813_v55 = vmul.f32 %v4558_v53, %v804_v48 }
 0x158   : > { %v4560_v56 = vpop.eup %4559  ;;  %v815_v57 = vsel %vm814_vm0, %v804_v48, %v813_v55  ;;  %vm5015_vm0 = vmmov 0  }
 0x159   : > { %v806_v59 = vmul.f32 %v4560_v56, %v803_v50  ;;  %v818_v60 = vsel %vm816_vm1, %v817_v54, %v815_v57  ;;  %4387 = vmatprep.mubr.msk.bf16.mxu0 %vm5015_vm0, %v6834_v7  ;;  %4399 = vmatprep.mubr.msk.bf16.mxu1 %vm5015_vm0, %v6834_v7 }
 0x15a   : > { %vm970_vm5 = vcmp.lt.f32.partialorder %v818_v60, 0.6  ;;  %v5410_v27 = vadd.f32 %v5396_v22, %v818_v60 }
 0x15b   : > { %v808_v62 = vsel %vm807_vm3, %v803_v50, %v806_v59  ;;  %v4240_v63 = vsel %vm970_vm5, 1.0, %v6834_v7  ;;  %vm1179_vm3 = vcmask 15360   ;;  %vm1860_vm5 = vcmask 523264  }
 0x15c   : > { %v5348_v1 = vsel %vm809_vm4, %v810_v58, %v808_v62  ;;  %v5351_v2 = vmul.f32 %v4240_v63, %v5342_v61  ;;  %6925 = vst [vmem:[#allocation21_spill] sm:$0xff] %v5410_v27  ;;  %vm1184_vm4 = vcmask 23552  }
 0x15d   : > { %v5360_v5 = vpack.c.bf16 %v818_v60, %v5348_v1  ;;  %v5389_v18 = vadd.f32 %v5384_v14, %v5348_v1  ;;  %vm969_vm1 = vcmp.lt.f32.partialorder %v5348_v1, 0.6 }
 0x15e   : > { %v5364_v6 = vrot.slane %v5351_v2, %v5346_v0  ;;  %v5368_v9 = vrot.slane %v5351_v2, %v5354_v3  ;;  %v5372_v10 = vrot.slane %v5351_v2, %v5357_v4  ;;  %v5379_v13 = vrot.slane %v5351_v2, %v5375_v12 }
 0x15f   : > { %6923 = vst [vmem:[#allocation19_spill] sm:$0xff] %v5389_v18 }
 0x1aa   : > { %v5393_v21 = vpop.permute.xlu1 %834 }
 0x1ab   : > { %v5400_v23 = vadd.f32 %v5393_v21, %v5389_v18  ;;  %v844_v24 = vsub.f32 %v5389_v18, %v5393_v21 }
 0x1ac   : > { %v869_v36 = vpop.permute.xlu0 %868 }
 0x1ad   : > { %v846_v26 = vand.u32 2147483647, %v844_v24  ;;  %4561 = vrcp.f32 %v5400_v23  ;;  %vm908_vm8 = vcmp.lt.f32.partialorder %v5406_v25, %v5400_v23  ;;  %v5445_v23 = vsel %vm733_vm10, 1.0, %v6834_v7 }
 0x1ae   : > { %v5412_v28 = vpop.permute.xlu1 %839  ;;  %4563 = vrcp.f32 %v5389_v18  ;;  %6926 = vst [vmem:[#allocation22_spill] sm:$0xff] %v5445_v23  ;;  %vm2069_vm10 = vcmask 1045509  }
 0x1af   : > { %v852_v29 = vmax.f32 %v846_v26, %v5406_v25  ;;  %v5417_v30 = vadd.f32 %v5412_v28, %v5410_v27  ;;  %v845_v31 = vsub.f32 %v5410_v27, %v5412_v28 }
 0x1b1   : > { %4565 = vrcp.f32 %v852_v29  ;;  %v847_v32 = vand.u32 2147483647, %v845_v31  ;;  %vm909_vm11 = vcmp.lt.f32.partialorder %v5406_v25, %v5417_v30 }
 0x1b2   : > { %4567 = vrcp.f32 %v5417_v30  ;;  %v874_v43 = vpop.permute.xlu1 %873 }
 0x1b3   : > { %v853_v33 = vmax.f32 %v847_v32, %v5406_v25  ;;  %4569 = vrcp.f32 %v5410_v27 }
 0x1b5   : > { %4571 = vrcp.f32 %v853_v33 }
 0x1b6   : > { %4573 = vrcp.f32 %v5391_v19 }
 0x1b7   : > { %v4562_v34 = vpop.eup %4561 }
 0x1b8   : > { %v894_v35 = vmul.f32 %v4562_v34, %v852_v29  ;;  %v4564_v37 = vpop.eup %4563  ;;  %v884_v47 = vmul.f32 %v4562_v34, %v4562_v34 }
 0x1b9   : > { %v877_v39 = vmul.f32 %v4564_v37, %v869_v36  ;;  %v912_v36 = vsub.f32 %v5393_v21, %v5389_v18 }
 0x1ba   : > { %4575 = vlog2.f32 %v894_v35 }
 0x1bb   : > { %v4566_v38 = vpop.eup %4565  ;;  %v880_v46 = vsub.f32 %v5389_v18, %v877_v39  ;;  %vm914_vm9 = vcmp.lt.f32.partialorder %v5406_v25, %v912_v36 }
 0x1bc   : > { %v4568_v40 = vpop.eup %4567  ;;  %v886_v41 = vmul.f32 %v4566_v38, %v4566_v38  ;;  %v862_v63 = vsub.f32 %v4566_v38, %v4562_v34 }
 0x1bd   : > { %v895_v42 = vmul.f32 %v4568_v40, %v853_v33  ;;  %v4570_v44 = vpop.eup %4569  ;;  %v882_v53 = vmul.f32 0.25, %v880_v46  ;;  %v885_v56 = vmul.f32 %v4568_v40, %v4568_v40 }
 0x1be   : > { %v879_v48 = vmul.f32 %v4570_v44, %v874_v43  ;;  %v888_v50 = vsub.f32 %v884_v47, %v886_v41 }
 0x1bf   : > { %v4572_v45 = vpop.eup %4571  ;;  %4577 = vlog2.f32 %v895_v42 }
 0x1c0   : > { %v5427_v49 = vpop.eup %4573  ;;  %v887_v52 = vmul.f32 %v4572_v45, %v4572_v45  ;;  %v881_v57 = vsub.f32 %v5410_v27, %v879_v48  ;;  %v890_v59 = vmul.f32 %v888_v50, %v882_v53  ;;  %v863_v46 = vsub.f32 %v4572_v45, %v4568_v40 }
 0x1c1   : > { %v921_v55 = vrot.slane %v5427_v49, %v5329_v17 }
 0x1c2   : > { %v889_v60 = vsub.f32 %v885_v56, %v887_v52  ;;  %v883_v26 = vmul.f32 0.25, %v881_v57  ;;  %v892_v31 = vadd.f32 %v890_v59, %v862_v63 }
 0x1c3   : > { %v922_v24 = vsub.f32 %v921_v55, %v4566_v38  ;;  %v923_v43 = vsub.f32 %v921_v55, %v4572_v45 }
 0x1c4   : > { %v4576_v54 = vpop.eup %4575  ;;  %v891_v35 = vmul.f32 %v889_v60, %v883_v26 }
 0x1c5   : > { %v897_v58 = vmul.f32 0.6931472, %v4576_v54  ;;  %v924_v41 = vmul.f32 2.0, %v922_v24  ;;  %v925_v52 = vmul.f32 2.0, %v923_v43 }
 0x1c6   : > { %v893_v38 = vadd.f32 %v891_v35, %v863_v46 }
 0x1c7   : > { %v900_v62 = vmul.f32 0.5, %v897_v58  ;;  %v926_v50 = vsel %vm914_vm9, %v924_v41, 0.0  ;;  %vm2067_vm9 = vcmask 1044484  }
 0x1c9   : > { %v4578_v29 = vpop.eup %4577  ;;  %v902_v32 = vmul.f32 %v4564_v37, %v900_v62  ;;  %v913_v37 = vsub.f32 %v5412_v28, %v5410_v27 }
 0x1ca   : > { %v899_v33 = vmul.f32 0.6931472, %v4578_v29  ;;  %v819_v29 = vadd.f32 0.0195141, %v5391_v19 }
 0x1cb   : > { %v904_v39 = vadd.f32 %v902_v32, %v892_v31  ;;  %vm915_vm12 = vcmp.lt.f32.partialorder %v5406_v25, %v913_v37 }
 0x1cc   : > { %v901_v42 = vmul.f32 0.5, %v899_v33  ;;  %4579 = vrcp.f32 %v819_v29 }
 0x1cd   : > { %v906_v47 = vmul.f32 0.5, %v904_v39 }
 0x1ce   : > { %v903_v34 = vmul.f32 %v4570_v44, %v901_v42  ;;  %v927_v44 = vsel %vm915_vm12, %v925_v52, 0.0  ;;  %vm2073_vm12 = vcmask 1047559  }
 0x1cf   : > { %v910_v48 = vsel %vm908_vm8, %v906_v47, 0.0  ;;  %vm2065_vm8 = vcmask 1043459  }
 0x1d0   : > { %v905_v21 = vadd.f32 %v903_v34, %v893_v38  ;;  %v928_v53 = vadd.f32 %v926_v50, %v910_v48  ;;  %v1528_v50 = vpack.i.b16 %v5360_v5, %v5360_v5 }
 0x1d2   : > { %v907_v40 = vmul.f32 0.5, %v905_v21  ;;  %v930_v28 = vmul.f32 %v5445_v23, %v928_v53  ;;  %v1537_v21 = vshrl.u32 %v5360_v5, 16  ;;  %v1183_v53 = vld [vmem:[#allocation6] sm:$0x3] }
 0x1d4   : > { %v911_v45 = vsel %vm909_vm11, %v907_v40, 0.0  ;;  %v933_v51 = vsel %vm932_vm13, %v930_v28, 0.0  ;;  %v1538_v28 = vpack.i.b16 %v1537_v21, %v1537_v21  ;;  %vm2071_vm11 = vcmask 1046534  }
 0x1d5   : > { %v929_v54 = vadd.f32 %v927_v44, %v911_v45  ;;  %v1533_v45 = vrot.slane %v1528_v50, %v5326_v16 }
 0x1d6   : > { %v4580_v39 = vpop.eup %4579  ;;  %v1543_v5 = vrot.slane %v1538_v28, %v5326_v16  ;;  %v1641_v1 = vrot.slane %v1538_v28, %v5375_v12 }
 0x1d7   : > { %v931_v55 = vmul.f32 %v5342_v61, %v929_v54  ;;  %v1592_v54 = vrot.slane %v1528_v50, %v5346_v0 }
 0x1d9   : > { %v934_v56 = vsel %vm932_vm13, %v931_v55, 0.0  ;;  %v1550_v55 = vrot.slane %v1528_v50, %v5329_v17 }
 0x1da   : > { %v935_v57 = vadd.f32 %v934_v56, %v933_v51  ;;  %v1599_v51 = vrot.slane %v1538_v28, %v5346_v0  ;;  %v1557_v56 = vrot.slane %v1538_v28, %v5329_v17 }
 0x1dc   : > { %v936_v58 = vrot.slane %v935_v57, 4 }
 0x1de   : > { %v937_v30 = vadd.f32 %v936_v58, %v935_v57  ;;  %v1606_v57 = vrot.slane %v1528_v50, %v5354_v3  ;;  %v1564_v58 = vrot.slane %v1528_v50, %v5332_v20 }
 0x1e0   : > { %v938_v59 = vrot.slane %v937_v30, 2 }
 0x1e2   : > { %v939_v25 = vadd.f32 %v938_v59, %v937_v30  ;;  %v1613_v30 = vrot.slane %v1538_v28, %v5354_v3  ;;  %v1571_v59 = vrot.slane %v1538_v28, %v5332_v20 }
 0x1e4   : > { %v940_v60 = vrot.slane %v939_v25, 1 }
 0x1e6   : > { %v941_v62 = vadd.f32 %v940_v60, %v939_v25  ;;  %v1018_v25 = vsub.s32 3, %v5320_v15  ;;  %v1620_v60 = vrot.slane %v1528_v50, %v5357_v4 }
 0x1e8   : > { %v942_v63 = vmul.f32 %v941_v62, %v5391_v19  ;;  %v1578_v62 = vrot.slane %v1528_v50, %v1018_v25  ;;  %v1585_v29 = vrot.slane %v1538_v28, %v1018_v25 }
 0x1ea   : > { %v943_v24 = vmul.f32 0.8, %v942_v63  ;;  %v946_v26 = vmul.f32 4.85, %v942_v63 }
 0x1ec   : > { %v944_v31 = vmul.f32 %v943_v24, %v942_v63  ;;  %v947_v32 = vmul.f32 %v946_v26, %v942_v63  ;;  %v1627_v24 = vrot.slane %v1538_v28, %v5357_v4 }
 0x1ee   : > { %v945_v33 = vsub.f32 %v942_v63, %v944_v31  ;;  %v948_v35 = vmul.f32 %v947_v32, %v942_v63  ;;  %v4239_v63 = vsel %vm969_vm1, 1.0, %v6834_v7  ;;  %v1634_v31 = vrot.slane %v1528_v50, %v5375_v12  ;;  %v4242_v50 = vld [vmem:[#allocation8] ss:$0 sm:$0xff] }
 0x1ef   : > { %v975_v26 = vmul.f32 %v4239_v63, %v5445_v23 }
 0x1f0   : > { %v949_v36 = vadd.f32 %v948_v35, %v945_v33  ;;  %v1074_v35 = vrot.slane %v5351_v2, %v5326_v16 }
 0x1f1   : > { %v986_v32 = vrot.slane %v975_v26, %v5326_v16  ;;  %v997_v33 = vrot.slane %v975_v26, %v5329_v17 }
 0x1f2   : > { %4581 = vtanh.f32 %v949_v36  ;;  %v1085_v36 = vrot.slane %v5351_v2, %v5329_v17 }
 0x1fc   : > { %v4582_v41 = vpop.eup %4581 }
 0x1fd   : > { %v952_v42 = vmul.f32 %v4582_v41, %v4580_v39  ;;  %v1008_v39 = vrot.slane %v975_v26, %v5332_v20  ;;  %v1096_v41 = vrot.slane %v5351_v2, %v5332_v20  ;;  %v1052_v20 = vrot.slane %v975_v26, %v5357_v4 }
 0x1ff   : > { %v953_v43 = vsub.f32 %v5427_v49, %v952_v42  ;;  %v5014_v49 = vmov 65535   ;;  %v1019_v42 = vrot.slane %v975_v26, %v1018_v25 }
 0x200   : > { %v1190_v52 = vsel %vm1188_vm14, 4294967295, %v5014_v49 }
 0x201   : > { %v954_v46 = vmax.f32 %v953_v43, 1e-06  ;;  %v1191_v40 = vsel %vm1189_vm15, %v1190_v52, 0  ;;  %v1107_v43 = vrot.slane %v5351_v2, %v1018_v25  ;;  %v4539_v25 = vld [vmem:[%s6816_s8 + $0x10] sm:$0xff]  }
 0x202   : > { %v1193_v44 = vand.u32 %v1191_v40, %v1183_v53 }
 0x203   : > { %4583 = vrcp.f32 %v954_v46  ;;  %v1030_v46 = vrot.slane %v975_v26, %v5346_v0 }
 0x204   : > { %4386 = vmatpush3.bf16.msra.mxu0 %v1193_v44 }
 0x205   : > { %4403 = vmatprep.subr.bf16.mxu0 %v6834_v7 }
 0x20d   : > { %v4584_v47 = vpop.eup %4583 }
 0x20e   : > { %v960_v34 = vrot.slane %v4584_v47, %v5329_v17  ;;  %v1041_v17 = vrot.slane %v975_v26, %v5354_v3  ;;  %v1063_v47 = vrot.slane %v975_v26, %v5375_v12 }
 0x210   : > { %v962_v38 = vmul.f32 %v5396_v22, %v960_v34  ;;  %v961_v19 = vmul.f32 %v5384_v14, %v960_v34 }
 0x212   : > { %v966_v48 = vsel %vm932_vm13, %v962_v38, 0.0  ;;  %v963_v37 = vsel %vm932_vm13, %v961_v19, 0.0 }
 0x213   : > { %967 = vadd.xlane.f32.xlu1 %v966_v48  ;;  %964 = vadd.xlane.f32.xlu0 %v963_v37  ;;  %v977_v48 = vsel %vm932_vm13, %v975_v26, 0.0  ;;  %v4540_v26 = vld [vmem:[%s6816_s8 + $0x18] sm:$0xff]  }
 0x224   : > { %1535 = vbcast.lane.c.b16.xlu1 %v1533_v45, 256 }
 0x228   : > { %1594 = vbcast.lane.c.b16.xlu1 %v1592_v54, 256 }
 0x229   : > { %1545 = vbcast.lane.c.b16.xlu0 %v1543_v5, 256 }
 0x22c   : > { %1552 = vbcast.lane.c.b16.xlu1 %v1550_v55, 256 }
 0x22d   : > { %1601 = vbcast.lane.c.b16.xlu0 %v1599_v51, 256 }
 0x230   : > { %1559 = vbcast.lane.c.b16.xlu1 %v1557_v56, 256 }
 0x231   : > { %1608 = vbcast.lane.c.b16.xlu0 %v1606_v57, 256 }
 0x234   : > { %1566 = vbcast.lane.c.b16.xlu1 %v1564_v58, 256  ;;  %v4538_v58 = vld [vmem:[%s6816_s8 + $0x8] sm:$0xff]  }
 0x235   : > { %1615 = vbcast.lane.c.b16.xlu0 %v1613_v30, 256 }
 0x238   : > { %1573 = vbcast.lane.c.b16.xlu1 %v1571_v59, 256  ;;  %v980_v59 = vsel %vm932_vm13, %v5351_v2, 0.0 }
 0x239   : > { %1622 = vbcast.lane.c.b16.xlu0 %v1620_v60, 256  ;;  %v5017_v60 = vmov 1966171168  }
 0x23c   : > { %1580 = vbcast.lane.c.b16.xlu1 %v1578_v62, 256  ;;  %v1252_v62 = vunpack.c.l.s4 %v5017_v60 }
 0x23d   : > { %1629 = vbcast.lane.c.b16.xlu0 %v1627_v24, 256 }
 0x23e   : > { %v1253_v2 = vunpack.c.0.s8 %v1252_v62 }
 0x240   : > { %1587 = vbcast.lane.c.b16.xlu1 %v1585_v29, 256 }
 0x241   : > { %1636 = vbcast.lane.c.b16.xlu0 %v1634_v31, 256 }
 0x244   : > { %988 = vbcast.lane.b32.xlu1 %v986_v32, 256 }
 0x245   : > { %1643 = vbcast.lane.c.b16.xlu0 %v1641_v1, 256 }
 0x248   : > { %999 = vbcast.lane.b32.xlu1 %v997_v33, 256 }
 0x249   : > { %992 = vbcast.lane.b32.xlu0 %v986_v32, 264  ;;  %v5573_v32 = vsub.s32 %v1253_v2, %v5320_v15 }
 0x24b   : > { %6940 = vst [vmem:[#allocation36_spill] sm:$0xff] %v5573_v32 }
 0x24c   : > { %1076 = vbcast.lane.b32.xlu1 %v1074_v35, 256 }
 0x24d   : > { %1003 = vbcast.lane.b32.xlu0 %v997_v33, 264 }
 0x250   : > { %1087 = vbcast.lane.b32.xlu1 %v1085_v36, 256 }
 0x251   : > { %1080 = vbcast.lane.b32.xlu0 %v1074_v35, 264 }
 0x254   : > { %1010 = vbcast.lane.b32.xlu1 %v1008_v39, 256 }
 0x255   : > { %1091 = vbcast.lane.b32.xlu0 %v1085_v36, 264 }
 0x258   : > { %1098 = vbcast.lane.b32.xlu1 %v1096_v41, 256 }
 0x259   : > { %1014 = vbcast.lane.b32.xlu0 %v1008_v39, 264 }
 0x25c   : > { %1021 = vbcast.lane.b32.xlu1 %v1019_v42, 256 }
 0x25d   : > { %1102 = vbcast.lane.b32.xlu0 %v1096_v41, 264 }
 0x260   : > { %1109 = vbcast.lane.b32.xlu1 %v1107_v43, 256 }
 0x264   : > { %1032 = vbcast.lane.b32.xlu1 %v1030_v46, 256 }
 0x268   : > { %1120 = vbcast.lane.b32.xlu1 %v5364_v6, 256 }
 0x26c   : > { %1043 = vbcast.lane.b32.xlu1 %v1041_v17, 256 }
 0x270   : > { %1131 = vbcast.lane.b32.xlu1 %v5368_v9, 256 }
 0x274   : > { %1054 = vbcast.lane.b32.xlu1 %v1052_v20, 256 }
 0x278   : > { %1142 = vbcast.lane.b32.xlu1 %v5372_v10, 256 }
 0x27c   : > { %1065 = vbcast.lane.b32.xlu1 %v1063_v47, 256 }
 0x280   : > { %1153 = vbcast.lane.b32.xlu1 %v5379_v13, 256 }
 0x2a0   : > { %v5503_v0 = vpop.xlane.xlu1 %967  ;;  %v5505_v34 = vpop.xlane.xlu0 %964 }
 0x2a1   : > { %6927 = vst [vmem:[#allocation23_spill] sm:$0xff] %v5503_v0  ;;  %6928 = vst [vmem:[#allocation24_spill] sm:$0xff] %v5505_v34  ;;  %v1178_v3 = vsel %vm1176_vm2, %v5503_v0, %v5316_v11  ;;  %v1177_v4 = vsel %vm1176_vm2, %v5505_v34, %v5313_v8 }
 0x2a2   : > { %v1181_v38 = vsel %vm1179_vm3, %v1178_v3, %v5316_v11  ;;  %v1180_v12 = vsel %vm1179_vm3, %v1177_v4, %v5313_v8 }
 0x2a3   : > { %v1182_v19 = vpack.c.bf16 %v1181_v38, %v1180_v12  ;;  %v1247_v38 = vld [vmem:[#allocation9] sm:$0x1] }
 0x2a4   : > { %978 = vadd.xlane.f32.xlu1 %v977_v48  ;;  %v5521_v8 = vpop.permute.xlu0 %1545  ;;  %v5526_v28 = vpop.permute.xlu1 %1535 }
 0x2a5   : > { %4388 = vmatmul.mubr.msk.bf16.vlgmr.msra.gmra.mrb[0].mxu0 %vm1184_vm4, %v1182_v19 }
 0x2a6   : > { %4411 = vmatprep.mubr.msk.bf16.mxu0 %vm5015_vm0, %v6834_v7 }
 0x2a8   : > { %v5524_v45 = vpop.permute.xlu0 %1601  ;;  %v5531_v5 = vpop.permute.xlu1 %1594 }
 0x2ac   : > { %v5529_v54 = vpop.permute.xlu0 %1608  ;;  %v5535_v55 = vpop.permute.xlu1 %1552 }
 0x2ad   : > { %6929 = vst [vmem:[#allocation25_spill] sm:$0xff] %v5529_v54  ;;  %6931 = vst [vmem:[#allocation27_spill] sm:$0xff] %v5535_v55 }
 0x2b0   : > { %v5539_v51 = vpop.permute.xlu1 %1559 }
 0x2b1   : > { %6933 = vst [vmem:[#allocation29_spill] sm:$0xff] %v5539_v51 }
 0x2b4   : > { %v5543_v56 = vpop.permute.xlu1 %1566 }
 0x2b5   : > { %6935 = vst [vmem:[#allocation31_spill] sm:$0xff] %v5543_v56 }
 0x2b8   : > { %v5554_v30 = vpop.permute.xlu1 %1573 }
 0x2b9   : > { %6937 = vst [vmem:[#allocation33_spill] sm:$0xff] %v5554_v30 }
 0x2bc   : > { %v5564_v24 = vpop.permute.xlu1 %1580 }
 0x2bd   : > { %6939 = vst [vmem:[#allocation35_spill] sm:$0xff] %v5564_v24 }
 0x2c0   : > { %v5576_v1 = vpop.permute.xlu1 %1587 }
 0x2c1   : > { %6941 = vst [vmem:[#allocation37_spill] sm:$0xff] %v5576_v1 }
 0x2c4   : > { %v5582_v39 = vpop.permute.xlu1 %988 }
 0x378   : > { %v1229_v37 = vpop.f32.mrb[0].mxu0 }
 0x379   : > { %v4389_v49 = vpop.f32.mrb[1].mxu0  ;;  %v1243_v21 = vadd.f32 %v4242_v50, %v1229_v37 }
 0x37a   : > { %v1232_v52 = vpop.f32.mrb[2].mxu0  ;;  %v1248_v49 = vpack.c.bf16 %v1247_v38, %v1247_v38 }
 0x37b   : > { %v1244_v53 = vadd.f32 %v4242_v50, %v1232_v52  ;;  %v1246_v40 = vpack.c.bf16 %v1232_v52, %v1229_v37  ;;  %v4390_v44 = vpop.f32.mrb[3].mxu0 }
 0x37d   : > { %v1245_v11 = vpack.c.bf16 %v1244_v53, %v1243_v21  ;;  %1508 = vrot.lane.b32.xlu0 %v1246_v40, %s5016_s2  ;;  %v4243_v31 = vpack.c.bf16 %v1244_v53, %v1244_v53 }
 0x37f   : > { %v1257_v33 = vrot.slane %v1245_v11, %v5573_v32  ;;  %v1264_v35 = vrot.slane %v4243_v31, %v5573_v32 }
 0x381   : > { %1025 = vbcast.lane.b32.xlu0 %v1019_v42, 264  ;;  %v1265_v41 = vcombine.high %v1257_v33, %v1257_v33  ;;  %v1266_v42 = vcombine.high %v1264_v35, %v1264_v35  ;;  %v5588_v15 = vrot.slane %v1264_v35, %v5573_v32 }
 0x383   : > { %v1296_v4 = vcombine.high %v5588_v15, %v5588_v15 }
 0x385   : > { %1113 = vbcast.lane.b32.xlu0 %v1107_v43, 264  ;;  %v5585_v43 = vrot.slane %v1257_v33, %v5573_v32  ;;  %v1312_v50 = vunpack.i.h.s16 %v1296_v4  ;;  %v4250_v11 = vpack.i.b16 %v1296_v4, %v1296_v4 }
 0x387   : > { %v1295_v3 = vcombine.high %v5585_v43, %v5585_v43  ;;  %v1382_v35 = vrot.slane %v4250_v11, %v5326_v16 }
 0x389   : > { %1036 = vbcast.lane.b32.xlu0 %v1030_v46, 264  ;;  %v1304_v37 = vunpack.i.h.s16 %v1295_v3  ;;  %v4246_v40 = vpack.i.b16 %v1295_v3, %v1295_v3 }
 0x38b   : > { %v1350_v33 = vrot.slane %v4246_v40, %v5326_v16 }
 0x38d   : > { %1124 = vbcast.lane.b32.xlu0 %v5364_v6, 264  ;;  %v5533_v6 = vpop.permute.xlu0 %1615 }
 0x38e   : > { %6930 = vst [vmem:[#allocation26_spill] sm:$0xff] %v5533_v6 }
 0x391   : > { %1047 = vbcast.lane.b32.xlu0 %v1041_v17, 264  ;;  %v5593_v17 = vrot.slane %v1265_v41, %v5573_v32 }
 0x393   : > { %v1302_v12 = vunpack.i.h.s16 %v5593_v17  ;;  %v1297_v21 = vcombine.high %v5593_v17, %v5593_v17 }
 0x395   : > { %1135 = vbcast.lane.b32.xlu0 %v5368_v9, 264  ;;  %v5537_v9 = vpop.permute.xlu0 %1622  ;;  %v1318_v53 = vpack.i.b16 %v1302_v12, %v1302_v12  ;;  %v1306_v62 = vunpack.i.h.s16 %v1297_v21 }
 0x396   : > { %6932 = vst [vmem:[#allocation28_spill] sm:$0xff] %v5537_v9 }
 0x397   : > { %v1346_v2 = vrot.slane %v1318_v53, %v5326_v16  ;;  %v1322_v12 = vpack.i.b16 %v1306_v62, %v1306_v62 }
 0x399   : > { %1058 = vbcast.lane.b32.xlu0 %v1052_v20, 264  ;;  %v5596_v20 = vrot.slane %v1266_v42, %v5573_v32 }
 0x39b   : > { %v1310_v19 = vunpack.i.h.s16 %v5596_v20 }
 0x39d   : > { %1146 = vbcast.lane.b32.xlu0 %v5372_v10, 264  ;;  %v5541_v10 = vpop.permute.xlu0 %1629  ;;  %v1326_v44 = vpack.i.b16 %v1310_v19, %v1310_v19 }
 0x39e   : > { %6934 = vst [vmem:[#allocation30_spill] sm:$0xff] %v5541_v10 }
 0x39f   : > { %v1378_v31 = vrot.slane %v1326_v44, %v5326_v16 }
 0x3a1   : > { %1069 = vbcast.lane.b32.xlu0 %v1063_v47, 264  ;;  %v5548_v57 = vpop.permute.xlu0 %1636  ;;  %v5598_v47 = vpop.permute.xlu1 %999 }
 0x3a2   : > { %6936 = vst [vmem:[#allocation32_spill] sm:$0xff] %v5548_v57 }
 0x3a5   : > { %1157 = vbcast.lane.b32.xlu0 %v5379_v13, 264  ;;  %v4537_v13 = vld [vmem:[%s6816_s8] sm:$0xff]   ;;  %v5562_v63 = vpop.permute.xlu0 %1643  ;;  %v5608_v52 = vpop.permute.xlu1 %1076 }
 0x3a6   : > { %4392 = vmatpush3.bf16.msra.mxu1 %v4537_v13  ;;  %6938 = vst [vmem:[#allocation34_spill] sm:$0xff] %v5562_v63  ;;  %v1298_v13 = vcombine.high %v5596_v20, %v5596_v20 }
 0x3a7   : > { %4393 = vmatprep.subr.bf16.mxu1 %v6834_v7 }
 0x3a8   : > { %v4251_v42 = vpack.i.b16 %v1298_v13, %v1298_v13  ;;  %v1314_v40 = vunpack.i.h.s16 %v1298_v13 }
 0x3a9   : > { %v5570_v29 = vpop.permute.xlu0 %992  ;;  %v5620_v41 = vpop.permute.xlu1 %1087 }
 0x3aa   : > { %4394 = vmatpush3.bf16.msra.mxu1 %v4538_v58  ;;  %v1320_v58 = vpack.i.b16 %v1304_v37, %v1304_v37  ;;  %v1417_v37 = vpack.i.b16 %v1346_v2, %v1346_v2  ;;  %v1330_v61 = vpack.i.b16 %v1314_v40, %v1314_v40 }
 0x3ab   : > { %4395 = vmatprep.subr.bf16.mxu1 %v6834_v7 }
 0x3ac   : > { %v1354_v3 = vrot.slane %v1320_v58, %v5326_v16 }
 0x3ad   : > { %v5580_v36 = vpop.permute.xlu0 %1003  ;;  %v5643_v2 = vpop.permute.xlu1 %1010 }
 0x3ae   : > { %4396 = vmatpush3.bf16.msra.mxu1 %v4539_v25  ;;  %v1646_v25 = vpack.i.b16 %v1248_v49, %v1248_v49  ;;  %v1424_v49 = vpack.i.b16 %v1350_v33, %v1350_v33  ;;  %v1431_v44 = vpack.i.b16 %v1354_v3, %v1354_v3  ;;  %v1362_v33 = vrot.slane %v1322_v12, %v5326_v16 }
 0x3af   : > { %4397 = vmatprep.subr.bf16.mxu1 %v6834_v7 }
 0x3b0   : > { %v5625_v38 = vrot.slane %v1646_v25, %v5326_v16  ;;  %v1429_v3 = vrot.slane %v1424_v49, %v5326_v16  ;;  %v1436_v27 = vrot.slane %v1431_v44, %v5326_v16  ;;  %v1445_v14 = vpack.i.b16 %v1362_v33, %v1362_v33 }
 0x3b1   : > { %v5590_v46 = vpop.permute.xlu0 %1080  ;;  %v4244_v33 = vpack.i.b16 %v5585_v43, %v5585_v43 }
 0x3b2   : > { %4398 = vmatpush3.bf16.msra.mxu1 %v4540_v26  ;;  %v4247_v26 = vpack.i.b16 %v1297_v21, %v1297_v21  ;;  %v1480_v21 = vpack.i.b16 %v1382_v35, %v1382_v35  ;;  %v1655_v58 = vmul.bf16 %v5625_v38, %v5539_v51  ;;  %v1656_v25 = vmul.bf16 %v5625_v38, %v5543_v56 }
 0x3b3   : > { %4415 = vmatprep.subr.bf16.mxu1 %v6834_v7  ;;  %v1390_v7 = vrot.slane %v4251_v42, %v5326_v16  ;;  %v1664_v62 = vmul.bf16 %v5625_v38, %v5537_v9  ;;  %v1665_v13 = vmul.bf16 %v5625_v38, %v5541_v10  ;;  %v1422_v35 = vrot.slane %v1417_v37, %v5326_v16 }
 0x3b4   : > { %v1358_v19 = vrot.slane %v4247_v26, %v5326_v16  ;;  %v1657_v26 = vmul.bf16 %v5625_v38, %v5554_v30 }
 0x3b5   : > { %v5606_v48 = vpop.permute.xlu0 %1091  ;;  %v1494_v22 = vpack.i.b16 %v1390_v7, %v1390_v7 }
 0x3b9   : > { %v5614_v60 = vpop.permute.xlu0 %1014 }
 0x3bd   : > { %v5628_v53 = vpop.permute.xlu0 %1102 }
 0x3c4   : > { %981 = vadd.xlane.f32.xlu0 %v980_v59  ;;  %v1328_v59 = vpack.i.b16 %v1312_v50, %v1312_v50  ;;  %v1473_v50 = vpack.i.b16 %v1378_v31, %v1378_v31  ;;  %v1438_v31 = vpack.i.b16 %v1358_v19, %v1358_v19 }
 0x3c6   : > { %v1386_v4 = vrot.slane %v1328_v59, %v5326_v16  ;;  %v1663_v59 = vmul.bf16 %v5625_v38, %v5533_v6  ;;  %v1478_v42 = vrot.slane %v1473_v50, %v5326_v16  ;;  %v1443_v40 = vrot.slane %v1438_v31, %v5326_v16 }
 0x3c8   : > { %v1487_v11 = vpack.i.b16 %v1386_v4, %v1386_v4  ;;  %v1485_v4 = vrot.slane %v1480_v21, %v5326_v16 }
 0x3ca   : > { %v1492_v18 = vrot.slane %v1487_v11, %v5326_v16 }
 0x3ef   : > { %v5650_v23 = vpop.permute.xlu0 %1508 }
 0x3f0   : > { %v1514_v19 = vadd.bf16 %v5650_v23, %v1422_v35  ;;  %v1522_v12 = vadd.bf16 %v5650_v23, %v1478_v42  ;;  %v1515_v37 = vadd.bf16 %v5650_v23, %v1429_v3  ;;  %v1523_v50 = vadd.bf16 %v5650_v23, %v1485_v4  ;;  %v5669_v35 = vpop.permute.xlu1 %1098 }
 0x3f1   : > { %v1516_v49 = vadd.bf16 %v5650_v23, %v1436_v27  ;;  %v1524_v21 = vadd.bf16 %v5650_v23, %v1492_v18  ;;  %v1300_v42 = vunpack.i.h.s16 %v5585_v43  ;;  %v1517_v18 = vadd.bf16 %v5650_v23, %v1443_v40 }
 0x3f2   : > { %v5661_v0 = vadd.bf16 %v1655_v58, %v1514_v19  ;;  %v5663_v44 = vadd.bf16 %v1663_v59, %v1522_v12  ;;  %v5665_v7 = vadd.bf16 %v1656_v25, %v1515_v37  ;;  %v5667_v11 = vadd.bf16 %v1664_v62, %v1523_v50 }
 0x3f3   : > { %v5672_v3 = vadd.bf16 %v1657_v26, %v1516_v49  ;;  %v5674_v27 = vadd.bf16 %v1665_v13, %v1524_v21  ;;  %v1499_v25 = vrot.slane %v1494_v22, %v5326_v16  ;;  %v1658_v62 = vmul.bf16 %v5625_v38, %v5564_v24  ;;  %v5690_v37 = vpop.permute.xlu0 %1025 }
 0x3f4   : > { %v4255_v31 = vmul.bf16 3216621497, %v5661_v0  ;;  %v4263_v58 = vmul.bf16 3216621497, %v5663_v44  ;;  %v4256_v59 = vmul.bf16 3216621497, %v5665_v7  ;;  %v1450_v13 = vrot.slane %v1445_v14, %v5326_v16  ;;  %v5700_v40 = vpop.permute.xlu1 %1021 }
 0x3f5   : > { %v4264_v26 = vmul.bf16 3216621497, %v5667_v11  ;;  %v4257_v4 = vmul.bf16 3216621497, %v5672_v3  ;;  %v1525_v19 = vadd.bf16 %v5650_v23, %v1499_v25  ;;  %v1394_v12 = vrot.slane %v1330_v61, %v5326_v16 }
 0x3f6   : > { %4585 = vpow.bf16 %v4255_v31  ;;  %v4265_v22 = vmul.bf16 3216621497, %v5674_v27  ;;  %v5693_v50 = vadd.bf16 %v1658_v62, %v1517_v18  ;;  %v1518_v43 = vadd.bf16 %v5650_v23, %v1450_v13 }
 0x3f7   : > { %4587 = vpow.bf16 %v4263_v58  ;;  %v1666_v49 = vmul.bf16 %v5625_v38, %v5548_v57  ;;  %v1316_v14 = vpack.i.b16 %v1300_v42, %v1300_v42  ;;  %v1659_v21 = vmul.bf16 %v5625_v38, %v5576_v1 }
 0x3f8   : > { %4589 = vpow.bf16 %v4256_v59  ;;  %v1308_v61 = vunpack.i.h.s16 %v5588_v15  ;;  %v4245_v31 = vpack.i.b16 %v5593_v17, %v5593_v17  ;;  %v4248_v18 = vpack.i.b16 %v5588_v15, %v5588_v15  ;;  %v5715_v17 = vpop.permute.xlu0 %1113 }
 0x3f9   : > { %4591 = vpow.bf16 %v4264_v26  ;;  %v1334_v58 = vrot.slane %v4244_v33, %v5326_v16  ;;  %v5708_v25 = vadd.bf16 %v1666_v49, %v1525_v19  ;;  %v4258_v42 = vmul.bf16 3216621497, %v5693_v50 }
 0x3fa   : > { %4593 = vpow.bf16 %v4257_v4  ;;  %v5711_v59 = vadd.bf16 %v1659_v21, %v1518_v43  ;;  %v1501_v62 = vpack.i.b16 %v1394_v12, %v1394_v12  ;;  %v1338_v13 = vrot.slane %v1316_v14, %v5326_v16  ;;  %v5719_v4 = vpop.permute.xlu1 %1109 }
 0x3fb   : > { %4595 = vpow.bf16 %v4265_v22  ;;  %v1342_v34 = vrot.slane %v4245_v31, %v5326_v16  ;;  %v1324_v26 = vpack.i.b16 %v1308_v61, %v1308_v61  ;;  %v1366_v15 = vrot.slane %v4248_v18, %v5326_v16 }
 0x3fc   : > { %v1396_v1 = vpack.i.b16 %v1334_v58, %v1334_v58  ;;  %v4266_v33 = vmul.bf16 3216621497, %v5708_v25  ;;  %v4249_v19 = vpack.i.b16 %v5596_v20, %v5596_v20  ;;  %4597 = vpow.bf16 %v4258_v42  ;;  %v1037_v30 = vpop.permute.xlu0 %1036 }
 0x3fd   : > { %v4259_v12 = vmul.bf16 3216621497, %v5711_v59  ;;  %v1506_v22 = vrot.slane %v1501_v62, %v5326_v16  ;;  %v1652_v43 = vmul.bf16 %v5625_v38, %v5526_v28  ;;  %v1403_v49 = vpack.i.b16 %v1338_v13, %v1338_v13 }
 0x3fe   : > { %v1653_v21 = vmul.bf16 %v5625_v38, %v5521_v8  ;;  %v1667_v61 = vmul.bf16 %v5625_v38, %v5562_v63  ;;  %v1410_v31 = vpack.i.b16 %v1342_v34, %v1342_v34  ;;  %v1401_v58 = vrot.slane %v1396_v1, %v5326_v16  ;;  %v1033_v1 = vpop.permute.xlu1 %1032 }
 0x3ff   : > { %v1526_v18 = vadd.bf16 %v5650_v23, %v1506_v22  ;;  %v1452_v42 = vpack.i.b16 %v1366_v15, %v1366_v15  ;;  %4599 = vpow.bf16 %v4266_v33  ;;  %v1370_v24 = vrot.slane %v1324_v26, %v5326_v16 }
 0x400   : > { %v1374_v13 = vrot.slane %v4249_v19, %v5326_v16  ;;  %4601 = vpow.bf16 %v4259_v12  ;;  %v1408_v63 = vrot.slane %v1403_v49, %v5326_v16  ;;  %v1511_v22 = vadd.bf16 %v5650_v23, %v1401_v58 }
 0x401   : > { %v4586_v14 = vpop.eup %4585  ;;  %v1415_v15 = vrot.slane %v1410_v31, %v5326_v16  ;;  %v1457_v19 = vrot.slane %v1452_v42, %v5326_v16  ;;  %v1459_v49 = vpack.i.b16 %v1370_v24, %v1370_v24 }
 0x402   : > { %v4588_v20 = vpop.eup %4587  ;;  %v1751_v57 = vadd.bf16 1065369472, %v4586_v14  ;;  %v5738_v14 = vadd.bf16 %v1667_v61, %v1526_v18  ;;  %v1125_v61 = vpop.permute.xlu0 %1124 }
 0x403   : > { %v4590_v62 = vpop.eup %4589  ;;  %v1759_v10 = vadd.bf16 1065369472, %v4588_v20  ;;  %v1512_v20 = vadd.bf16 %v5650_v23, %v1408_v63  ;;  %v1513_v58 = vadd.bf16 %v5650_v23, %v1415_v15  ;;  %v1519_v31 = vadd.bf16 %v5650_v23, %v1457_v19  ;;  %v1121_v42 = vpop.permute.xlu1 %1120 }
 0x404   : > { %v4592_v9 = vpop.eup %4591  ;;  %4603 = vrcp.bf16 %v1751_v57  ;;  %v1752_v34 = vadd.bf16 1065369472, %v4590_v62  ;;  %v1466_v62 = vpack.i.b16 %v1374_v13, %v1374_v13  ;;  %v1660_v63 = vmul.bf16 %v5625_v38, %v5531_v5 }
 0x405   : > { %v4594_v56 = vpop.eup %4593  ;;  %4605 = vrcp.bf16 %v1759_v10  ;;  %v1760_v33 = vadd.bf16 1065369472, %v4592_v9  ;;  %v5744_v10 = vadd.bf16 %v1652_v43, %v1511_v22  ;;  %v1654_v9 = vmul.bf16 %v5625_v38, %v5535_v55 }
 0x406   : > { %v4596_v26 = vpop.eup %4595  ;;  %4607 = vrcp.bf16 %v1752_v34  ;;  %v1753_v12 = vadd.bf16 1065369472, %v4594_v56  ;;  %v4267_v56 = vmul.bf16 3216621497, %v5738_v14  ;;  %v5751_v24 = vadd.bf16 %v1653_v21, %v1512_v20 }
 0x407   : > { %4609 = vrcp.bf16 %v1760_v33  ;;  %v1761_v57 = vadd.bf16 1065369472, %v4596_v26  ;;  %v4598_v18 = vpop.eup %4597  ;;  %v1464_v13 = vrot.slane %v1459_v49, %v5326_v16  ;;  %v5754_v34 = vadd.bf16 %v1654_v9, %v1513_v58  ;;  %v1048_v9 = vpop.permute.xlu0 %1047 }
 0x408   : > { %4611 = vrcp.bf16 %v1753_v12  ;;  %v1471_v43 = vrot.slane %v1466_v62, %v5326_v16  ;;  %v5757_v22 = vadd.bf16 %v1660_v63, %v1519_v31  ;;  %v4252_v15 = vmul.bf16 3216621497, %v5744_v10 }
 0x409   : > { %4613 = vrcp.bf16 %v1761_v57  ;;  %v1754_v26 = vadd.bf16 1065369472, %v4598_v18  ;;  %v1520_v19 = vadd.bf16 %v5650_v23, %v1464_v13  ;;  %v1661_v21 = vmul.bf16 %v5625_v38, %v5524_v45 }
 0x40a   : > { %v4600_v33 = vpop.eup %4599  ;;  %4615 = vpow.bf16 %v4267_v56  ;;  %v1662_v20 = vmul.bf16 %v5625_v38, %v5529_v54  ;;  %v1521_v49 = vadd.bf16 %v5650_v23, %v1471_v43  ;;  %v4253_v57 = vmul.bf16 3216621497, %v5751_v24  ;;  %v1044_v43 = vpop.permute.xlu1 %1043 }
 0x40b   : > { %v5761_v12 = vpop.eup %4601  ;;  %v5771_v62 = vpack.c.bf16 %v5690_v37, %v5700_v40  ;;  %v5775_v31 = vpack.c.bf16 %v5715_v17, %v5719_v4  ;;  %v4254_v56 = vmul.bf16 3216621497, %v5754_v34  ;;  %v5778_v38 = vpack.c.bf16 %v1037_v30, %v1033_v1 }
 0x40c   : > { %4617 = vpow.bf16 %v4252_v15  ;;  %v4260_v23 = vmul.bf16 3216621497, %v5757_v22  ;;  %v1762_v37 = vadd.bf16 1065369472, %v4600_v33  ;;  %v5781_v40 = vadd.bf16 %v1661_v21, %v1520_v19 }
 0x40d   : > { %6942 = vst [vmem:[#allocation38_spill] sm:$0xff] %v5771_v62  ;;  %6943 = vst [vmem:[#allocation39_spill] sm:$0xff] %v5775_v31  ;;  %4619 = vrcp.bf16 %v1754_v26  ;;  %v5784_v54 = vadd.bf16 %v1662_v20, %v1521_v49  ;;  %v5787_v15 = vpack.c.bf16 %v1125_v61, %v1121_v42  ;;  %v1136_v20 = vpop.permute.xlu0 %1135  ;;  %v1755_v49 = vadd.bf16 1065369472, %v5761_v12 }
 0x40e   : > { %6944 = vst [vmem:[#allocation40_spill] sm:$0xff] %v5778_v38  ;;  %4621 = vpow.bf16 %v4253_v57  ;;  %v1132_v42 = vpop.permute.xlu1 %1131 }
 0x40f   : > { %v4604_v58 = vpop.eup %4603  ;;  %6945 = vst [vmem:[#allocation41_spill] sm:$0xff] %v5787_v15  ;;  %4623 = vpow.bf16 %v4254_v56 }
 0x410   : > { %v4606_v18 = vpop.eup %4605  ;;  %v1771_v63 = vmul.bf16 1065369472, %v4604_v58  ;;  %4625 = vpow.bf16 %v4260_v23 }
 0x411   : > { %v4608_v13 = vpop.eup %4607  ;;  %v1787_v6 = vmul.bf16 1065369472, %v4606_v18  ;;  %4627 = vrcp.bf16 %v1762_v37 }
 0x412   : > { %v4610_v51 = vpop.eup %4609  ;;  %v1799_v17 = vmul.bf16 %v1771_v63, %v5661_v0  ;;  %v1773_v4 = vmul.bf16 1065369472, %v4608_v13  ;;  %4629 = vrcp.bf16 %v1755_v49 }
 0x413   : > { %v4612_v58 = vpop.eup %4611  ;;  %v1807_v30 = vmul.bf16 %v1787_v6, %v5663_v44  ;;  %v1789_v1 = vmul.bf16 1065369472, %v4610_v51 }
 0x414   : > { %v4614_v55 = vpop.eup %4613  ;;  %v1815_v26 = vmul.bf16 %v1799_v17, %v5771_v62  ;;  %v1800_v33 = vmul.bf16 %v1773_v4, %v5665_v7  ;;  %v1775_v19 = vmul.bf16 1065369472, %v4612_v58 }
 0x415   : > { %v1823_v0 = vmul.bf16 %v1807_v30, %v5775_v31  ;;  %v1808_v21 = vmul.bf16 %v1789_v1, %v5667_v11  ;;  %v1791_v61 = vmul.bf16 1065369472, %v4614_v55  ;;  %v4616_v63 = vpop.eup %4615 }
 0x416   : > { %v1834_v6 = vunpack.c.l.bf16 %v1815_v26  ;;  %v1835_v51 = vunpack.c.h.bf16 %v1815_v26  ;;  %v1816_v44 = vmul.bf16 %v1800_v33, %v5778_v38  ;;  %v1801_v18 = vmul.bf16 %v1775_v19, %v5672_v3 }
 0x417   : > { %v1850_v57 = vunpack.c.l.bf16 %v1823_v0  ;;  %v1851_v56 = vunpack.c.h.bf16 %v1823_v0  ;;  %v1824_v7 = vmul.bf16 %v1808_v21, %v5787_v15  ;;  %v4618_v3 = vpop.eup %4617  ;;  %v1809_v0 = vmul.bf16 %v1791_v61, %v5674_v27  ;;  %v1059_v21 = vpop.permute.xlu0 %1058 }
 0x418   : > { %v1888_v23 = vsel %vm1860_vm5, %v1834_v6, 0.0  ;;  %v1889_v11 = vsel %vm1860_vm5, %v1835_v51, 0.0  ;;  %v1836_v13 = vunpack.c.l.bf16 %v1816_v44  ;;  %v1837_v37 = vunpack.c.h.bf16 %v1816_v44  ;;  %v4620_v51 = vpop.eup %4619 }
 0x419   : > { %v1890_v12 = vadd.f32 %v1889_v11, %v1888_v23  ;;  %v1960_v17 = vsel %vm1860_vm5, %v1850_v57, 0.0  ;;  %v1961_v4 = vsel %vm1860_vm5, %v1851_v56, 0.0  ;;  %v1852_v55 = vunpack.c.l.bf16 %v1824_v7  ;;  %v4622_v23 = vpop.eup %4621  ;;  %v1055_v11 = vpop.permute.xlu1 %1054 }
 0x41a   : > { %v1962_v58 = vadd.f32 %v1961_v4, %v1960_v17  ;;  %v1897_v30 = vsel %vm1860_vm5, %v1836_v13, 0.0  ;;  %v1898_v1 = vsel %vm1860_vm5, %v1837_v37, 0.0  ;;  %v1853_v26 = vunpack.c.h.bf16 %v1824_v7  ;;  %v4624_v17 = vpop.eup %4623 }
 0x41b   : > { %v1891_v33 = vrot.slane %v1890_v12, 4  ;;  %v1899_v19 = vadd.f32 %v1898_v1, %v1897_v30  ;;  %v1763_v6 = vadd.bf16 1065369472, %v4616_v63  ;;  %v5804_v44 = vpack.c.bf16 %v1048_v9, %v1044_v43  ;;  %v4626_v9 = vpop.eup %4625 }
 0x41c   : > { %v5806_v57 = vpack.c.bf16 %v1136_v20, %v1132_v42  ;;  %v4261_v56 = vmul.bf16 3216621497, %v5781_v40  ;;  %v1963_v13 = vrot.slane %v1962_v58, 4  ;;  %v1969_v37 = vsel %vm1860_vm5, %v1852_v55, 0.0  ;;  %v4628_v63 = vpop.eup %4627  ;;  %v1147_v55 = vpop.permute.xlu0 %1146 }
 0x41d   : > { %6946 = vst [vmem:[#allocation42_spill] sm:$0xff] %v5804_v44  ;;  %v1970_v7 = vsel %vm1860_vm5, %v1853_v26, 0.0  ;;  %v1892_v4 = vadd.f32 %v1891_v33, %v1890_v12  ;;  %v1817_v27 = vmul.bf16 %v1801_v18, %v5804_v44  ;;  %v4262_v61 = vmul.bf16 3216621497, %v5784_v54  ;;  %v1143_v18 = vpop.permute.xlu1 %1142 }
 0x41e   : > { %6947 = vst [vmem:[#allocation43_spill] sm:$0xff] %v5806_v57  ;;  %v1900_v43 = vrot.slane %v1899_v19, 4  ;;  %v1825_v20 = vmul.bf16 %v1809_v0, %v5806_v57  ;;  %v1777_v42 = vmul.bf16 1065369472, %v4620_v51  ;;  %4631 = vrcp.bf16 %v1763_v6 }
 0x41f   : > { %v1971_v30 = vadd.f32 %v1970_v7, %v1969_v37  ;;  %v1748_v1 = vadd.bf16 1065369472, %v4618_v3  ;;  %v1964_v15 = vadd.f32 %v1963_v13, %v1962_v58  ;;  %4633 = vpow.bf16 %v4261_v56 }
 0x420   : > { %v1749_v26 = vadd.bf16 1065369472, %v4622_v23  ;;  %v1750_v49 = vadd.bf16 1065369472, %v4624_v17  ;;  %v1893_v31 = vrot.slane %v1892_v4, 2  ;;  %v1838_v12 = vunpack.c.l.bf16 %v1817_v27 }
 0x421   : > { %v1839_v33 = vunpack.c.h.bf16 %v1817_v27  ;;  %4635 = vpow.bf16 %v4262_v61  ;;  %v1901_v44 = vadd.f32 %v1900_v43, %v1899_v19  ;;  %v1854_v38 = vunpack.c.l.bf16 %v1825_v20  ;;  %v1070_v27 = vpop.permute.xlu0 %1069  ;;  %v4630_v61 = vpop.eup %4629 }
 0x422   : > { %v1855_v62 = vunpack.c.h.bf16 %v1825_v20  ;;  %v1802_v0 = vmul.bf16 %v1777_v42, %v5693_v50  ;;  %v1972_v51 = vrot.slane %v1971_v30, 4  ;;  %v1793_v6 = vmul.bf16 1065369472, %v4628_v63 }
 0x423   : > { %4637 = vrcp.bf16 %v1748_v1  ;;  %v1965_v37 = vrot.slane %v1964_v15, 2  ;;  %v5815_v3 = vpack.c.bf16 %v1059_v21, %v1055_v11  ;;  %v1756_v58 = vadd.bf16 1065369472, %v4626_v9  ;;  %v1066_v9 = vpop.permute.xlu1 %1065 }
 0x424   : > { %4639 = vrcp.bf16 %v1749_v26  ;;  %v1894_v56 = vadd.f32 %v1893_v31, %v1892_v4  ;;  %v1906_v23 = vsel %vm1860_vm5, %v1838_v12, 0.0  ;;  %v1907_v13 = vsel %vm1860_vm5, %v1839_v33, 0.0 }
 0x425   : > { %6948 = vst [vmem:[#allocation44_spill] sm:$0xff] %v5815_v3  ;;  %4641 = vrcp.bf16 %v1750_v49  ;;  %v1902_v7 = vrot.slane %v1901_v44, 2  ;;  %v1978_v19 = vsel %vm1860_vm5, %v1854_v38, 0.0  ;;  %v1979_v17 = vsel %vm1860_vm5, %v1855_v62, 0.0 }
 0x426   : > { %v1818_v50 = vmul.bf16 %v1802_v0, %v5815_v3  ;;  %v5824_v21 = vpack.c.bf16 %v5570_v29, %v5582_v39  ;;  %v1973_v11 = vadd.f32 %v1972_v51, %v1971_v30  ;;  %v1810_v31 = vmul.bf16 %v1793_v6, %v5708_v25  ;;  %v1158_v0 = vpop.permute.xlu0 %1157 }
 0x427   : > { %v5829_v4 = vpack.c.bf16 %v5580_v36, %v5598_v47  ;;  %v1966_v43 = vadd.f32 %v1965_v37, %v1964_v15  ;;  %v1908_v38 = vadd.f32 %v1907_v13, %v1906_v23  ;;  %4643 = vrcp.bf16 %v1756_v58  ;;  %v1154_v6 = vpop.permute.xlu1 %1153 }
 0x428   : > { %v1895_v20 = vrot.slane %v1894_v56, 1  ;;  %v1980_v42 = vadd.f32 %v1979_v17, %v1978_v19  ;;  %v5831_v63 = vpack.c.bf16 %v1147_v55, %v1143_v18  ;;  %v5833_v1 = vpack.c.bf16 %v1070_v27, %v1066_v9 }
 0x429   : > { %v4632_v62 = vpop.eup %4631  ;;  %v1903_v29 = vadd.f32 %v1902_v7, %v1901_v44  ;;  %v1840_v39 = vunpack.c.l.bf16 %v1818_v50  ;;  %v1841_v30 = vunpack.c.h.bf16 %v1818_v50  ;;  %v1779_v26 = vmul.bf16 1065369472, %v4630_v61 }
 0x42a   : > { %6949 = vst [vmem:[#allocation45_spill] sm:$0xff] %v5831_v63  ;;  %6950 = vst [vmem:[#allocation46_spill] sm:$0xff] %v5833_v1  ;;  %v4634_v25 = vpop.eup %4633  ;;  %v5837_v36 = vpack.c.bf16 %v5590_v46, %v5608_v52  ;;  %v5841_v47 = vpack.c.bf16 %v5606_v48, %v5620_v41  ;;  %v1974_v15 = vrot.slane %v1973_v11, 2  ;;  %v1826_v49 = vmul.bf16 %v1810_v31, %v5831_v63 }
 0x42b   : > { %v1967_v12 = vrot.slane %v1966_v43, 1  ;;  %v1909_v33 = vrot.slane %v1908_v38, 4  ;;  %v1803_v44 = vmul.bf16 %v1779_v26, %v5711_v59  ;;  %v1795_v18 = vmul.bf16 1065369472, %v4632_v62 }
 0x42c   : > { %6951 = vst [vmem:[#allocation47_spill] sm:$0xff] %v5837_v36  ;;  %6952 = vst [vmem:[#allocation48_spill] sm:$0xff] %v5841_v47  ;;  %v4636_v55 = vpop.eup %4635  ;;  %v5847_v51 = vpack.c.bf16 %v5614_v60, %v5643_v2  ;;  %v5851_v46 = vpack.c.bf16 %v5628_v53, %v5669_v35  ;;  %v5853_v48 = vadd.f32 %v1895_v20, %v1894_v56  ;;  %v1981_v52 = vrot.slane %v1980_v42, 4 }
 0x42d   : > { %v1904_v37 = vrot.slane %v1903_v29, 1  ;;  %v1915_v58 = vsel %vm1860_vm5, %v1840_v39, 0.0  ;;  %v1916_v59 = vsel %vm1860_vm5, %v1841_v30, 0.0  ;;  %v1819_v23 = vmul.bf16 %v1803_v44, %v5833_v1 }
 0x42e   : > { %6953 = vst [vmem:[#allocation49_spill] sm:$0xff] %v5847_v51  ;;  %6954 = vst [vmem:[#allocation50_spill] sm:$0xff] %v5851_v46  ;;  %v4638_v41 = vpop.eup %4637  ;;  %v1856_v7 = vunpack.c.l.bf16 %v1826_v49  ;;  %v1857_v60 = vunpack.c.h.bf16 %v1826_v49  ;;  %v1811_v2 = vmul.bf16 %v1795_v18, %v5738_v14  ;;  %v5859_v19 = vpack.c.bf16 %v1158_v0, %v1154_v6 }
 0x42f   : > { %v4640_v13 = vpop.eup %4639  ;;  %v5861_v35 = vadd.f32 %v1967_v12, %v1966_v43  ;;  %v5863_v56 = vadd.f32 %v1974_v15, %v1973_v11  ;;  %v1910_v17 = vadd.f32 %v1909_v33, %v1908_v38  ;;  %v1757_v50 = vadd.bf16 1065369472, %v4634_v25 }
 0x430   : > { %6955 = vst [vmem:[#allocation51_spill] sm:$0xff] %v5859_v19  ;;  %v4642_v53 = vpop.eup %4641  ;;  %v1982_v27 = vadd.f32 %v1981_v52, %v1980_v42  ;;  %v1842_v61 = vunpack.c.l.bf16 %v1819_v23  ;;  %v1843_v31 = vunpack.c.h.bf16 %v1819_v23  ;;  %v1827_v9 = vmul.bf16 %v1811_v2, %v5859_v19 }
 0x431   : > { %v2008_v62 = vpack.c.bf16 %v5853_v48, %v5853_v48  ;;  %v5868_v20 = vadd.f32 %v1904_v37, %v1903_v29  ;;  %v1917_v14 = vadd.f32 %v1916_v59, %v1915_v58  ;;  %v1758_v39 = vadd.bf16 1065369472, %v4636_v55 }
 0x432   : > { %v4644_v30 = vpop.eup %4643  ;;  %v1987_v43 = vsel %vm1860_vm5, %v1856_v7, 0.0  ;;  %v1988_v11 = vsel %vm1860_vm5, %v1857_v60, 0.0  ;;  %v1858_v26 = vunpack.c.l.bf16 %v1827_v9  ;;  %v1765_v38 = vmul.bf16 1065369472, %v4638_v41 }
 0x433   : > { %v1859_v25 = vunpack.c.h.bf16 %v1827_v9  ;;  %v1767_v42 = vmul.bf16 1065369472, %v4640_v13  ;;  %v1769_v15 = vmul.bf16 1065369472, %v4642_v53  ;;  %4645 = vrcp.bf16 %v1757_v50 }
 0x434   : > { %v1911_v49 = vrot.slane %v1910_v17, 2  ;;  %v1983_v12 = vrot.slane %v1982_v27, 2  ;;  %v1924_v33 = vsel %vm1860_vm5, %v1842_v61, 0.0  ;;  %v1925_v29 = vsel %vm1860_vm5, %v1843_v31, 0.0 }
 0x435   : > { %v1918_v44 = vrot.slane %v1917_v14, 4  ;;  %v1989_v18 = vadd.f32 %v1988_v11, %v1987_v43  ;;  %v1781_v55 = vmul.bf16 1065369472, %v4644_v30  ;;  %4647 = vrcp.bf16 %v1758_v39 }
 0x436   : > { %v1976_v0 = vrot.slane %v5863_v56, 1  ;;  %v1796_v52 = vmul.bf16 %v1765_v38, %v5744_v10  ;;  %v1797_v41 = vmul.bf16 %v1767_v42, %v5751_v24  ;;  %v1798_v6 = vmul.bf16 %v1769_v15, %v5754_v34 }
 0x437   : > { %v1926_v37 = vadd.f32 %v1925_v29, %v1924_v33  ;;  %v1996_v58 = vsel %vm1860_vm5, %v1858_v26, 0.0  ;;  %v1997_v59 = vsel %vm1860_vm5, %v1859_v25, 0.0  ;;  %v1804_v23 = vmul.bf16 %v1781_v55, %v5757_v22 }
 0x438   : > { %v5881_v13 = vadd.f32 %v1911_v49, %v1910_v17  ;;  %v1812_v7 = vmul.bf16 %v1796_v52, %v5824_v21  ;;  %v1813_v60 = vmul.bf16 %v1797_v41, %v5829_v4  ;;  %v1814_v2 = vmul.bf16 %v1798_v6, %v5847_v51 }
 0x439   : > { %v5886_v10 = vadd.f32 %v1983_v12, %v1982_v27  ;;  %v1919_v24 = vadd.f32 %v1918_v44, %v1917_v14  ;;  %v1990_v53 = vrot.slane %v1989_v18, 4  ;;  %v1820_v34 = vmul.bf16 %v1804_v23, %v5837_v36 }
 0x43a   : > { %v1998_v50 = vadd.f32 %v1997_v59, %v1996_v58  ;;  %v1828_v61 = vunpack.c.l.bf16 %v1812_v7  ;;  %v1829_v31 = vunpack.c.h.bf16 %v1812_v7  ;;  %v1830_v9 = vunpack.c.l.bf16 %v1813_v60 }
 0x43b   : > { %v1927_v39 = vrot.slane %v1926_v37, 4  ;;  %v1831_v22 = vunpack.c.h.bf16 %v1813_v60  ;;  %v1832_v17 = vunpack.c.l.bf16 %v1814_v2  ;;  %v1833_v30 = vunpack.c.h.bf16 %v1814_v2 }
 0x43c   : > { %v1844_v43 = vunpack.c.l.bf16 %v1820_v34  ;;  %v1845_v11 = vunpack.c.h.bf16 %v1820_v34  ;;  %v1861_v26 = vsel %vm1860_vm5, %v1828_v61, 0.0  ;;  %v1862_v38 = vsel %vm1860_vm5, %v1829_v31, 0.0 }
 0x43d   : > { %v1920_v27 = vrot.slane %v1919_v24, 2  ;;  %v1863_v25 = vadd.f32 %v1862_v38, %v1861_v26  ;;  %v1870_v14 = vsel %vm1860_vm5, %v1830_v9, 0.0  ;;  %v1871_v42 = vsel %vm1860_vm5, %v1831_v22, 0.0 }
 0x43e   : > { %v4646_v15 = vpop.eup %4645  ;;  %v1999_v49 = vrot.slane %v1998_v50, 4  ;;  %v1872_v12 = vadd.f32 %v1871_v42, %v1870_v14  ;;  %v1879_v33 = vsel %vm1860_vm5, %v1832_v17, 0.0  ;;  %v1880_v29 = vsel %vm1860_vm5, %v1833_v30, 0.0 }
 0x43f   : > { %v1783_v44 = vmul.bf16 1065369472, %v4646_v15  ;;  %v1864_v55 = vrot.slane %v1863_v25, 4  ;;  %v1881_v52 = vadd.f32 %v1880_v29, %v1879_v33  ;;  %v1933_v41 = vsel %vm1860_vm5, %v1844_v43, 0.0 }
 0x440   : > { %v4648_v6 = vpop.eup %4647  ;;  %v1991_v58 = vadd.f32 %v1990_v53, %v1989_v18  ;;  %v1928_v59 = vadd.f32 %v1927_v39, %v1926_v37  ;;  %v1873_v23 = vrot.slane %v1872_v12, 4  ;;  %v1934_v7 = vsel %vm1860_vm5, %v1845_v11, 0.0 }
 0x441   : > { %v1785_v60 = vmul.bf16 1065369472, %v4648_v6  ;;  %v1805_v2 = vmul.bf16 %v1783_v44, %v5781_v40  ;;  %v1865_v34 = vadd.f32 %v1864_v55, %v1863_v25  ;;  %v1882_v61 = vrot.slane %v1881_v52, 4 }
 0x442   : > { %v5898_v31 = vadd.f32 %v1920_v27, %v1919_v24  ;;  %v2000_v9 = vadd.f32 %v1999_v49, %v1998_v50  ;;  %v1874_v22 = vadd.f32 %v1873_v23, %v1872_v12  ;;  %v1935_v17 = vadd.f32 %v1934_v7, %v1933_v41 }
 0x443   : > { %v1806_v30 = vmul.bf16 %v1785_v60, %v5784_v54  ;;  %v1821_v43 = vmul.bf16 %v1805_v2, %v5841_v47  ;;  %v1866_v26 = vrot.slane %v1865_v34, 2  ;;  %v1883_v18 = vadd.f32 %v1882_v61, %v1881_v52 }
 0x444   : > { %v1992_v37 = vrot.slane %v1991_v58, 2  ;;  %v1929_v53 = vrot.slane %v1928_v59, 2  ;;  %v1875_v39 = vrot.slane %v1874_v22, 2  ;;  %v1936_v11 = vrot.slane %v1935_v17, 4 }
 0x445   : > { %v1822_v38 = vmul.bf16 %v1806_v30, %v5851_v46  ;;  %v1846_v40 = vunpack.c.l.bf16 %v1821_v43  ;;  %v1847_v25 = vunpack.c.h.bf16 %v1821_v43  ;;  %v1867_v14 = vadd.f32 %v1866_v26, %v1865_v34 }
 0x446   : > { %v2001_v24 = vrot.slane %v2000_v9, 2  ;;  %v1876_v50 = vadd.f32 %v1875_v39, %v1874_v22  ;;  %v1884_v27 = vrot.slane %v1883_v18, 2  ;;  %v1937_v42 = vadd.f32 %v1936_v11, %v1935_v17 }
 0x447   : > { %v1848_v15 = vunpack.c.l.bf16 %v1822_v38  ;;  %v1849_v54 = vunpack.c.h.bf16 %v1822_v38  ;;  %v1868_v49 = vrot.slane %v1867_v14, 1  ;;  %v1942_v12 = vsel %vm1860_vm5, %v1846_v40, 0.0 }
 0x448   : > { %v1877_v33 = vrot.slane %v1876_v50, 1  ;;  %v1885_v29 = vadd.f32 %v1884_v27, %v1883_v18  ;;  %v1938_v44 = vrot.slane %v1937_v42, 2  ;;  %v1943_v55 = vsel %vm1860_vm5, %v1847_v25, 0.0 }
 0x449   : > { %v1869_v52 = vadd.f32 %v1868_v49, %v1867_v14  ;;  %v1944_v41 = vadd.f32 %v1943_v55, %v1942_v12  ;;  %v1951_v6 = vsel %vm1860_vm5, %v1848_v15, 0.0  ;;  %v1952_v23 = vsel %vm1860_vm5, %v1849_v54, 0.0 }
 0x44a   : > { %v1878_v7 = vadd.f32 %v1877_v33, %v1876_v50  ;;  %v1886_v60 = vrot.slane %v1885_v29, 1  ;;  %v1939_v2 = vadd.f32 %v1938_v44, %v1937_v42  ;;  %v1953_v34 = vadd.f32 %v1952_v23, %v1951_v6 }
 0x44b   : > { %v1913_v61 = vrot.slane %v5881_v13, 1  ;;  %v1922_v22 = vrot.slane %v5898_v31, 1  ;;  %v1945_v17 = vrot.slane %v1944_v41, 4  ;;  %v2005_v30 = vpack.c.bf16 %v1869_v52, %v1869_v52 }
 0x44c   : > { %v1887_v43 = vadd.f32 %v1886_v60, %v1885_v29  ;;  %v1940_v26 = vrot.slane %v1939_v2, 1  ;;  %v1954_v18 = vrot.slane %v1953_v34, 4  ;;  %v2006_v39 = vpack.c.bf16 %v1878_v7, %v1878_v7 }
 0x44d   : > { %v1930_v11 = vadd.f32 %v1929_v53, %v1928_v59  ;;  %v2002_v38 = vadd.f32 %v2001_v24, %v2000_v9  ;;  %v1946_v40 = vadd.f32 %v1945_v17, %v1944_v41  ;;  %v2045_v25 = vunpack.c.l.b16 %v2005_v30 }
 0x44e   : > { %v1993_v14 = vadd.f32 %v1992_v37, %v1991_v58  ;;  %v1955_v50 = vadd.f32 %v1954_v18, %v1953_v34  ;;  %v2007_v27 = vpack.c.bf16 %v1887_v43, %v1887_v43  ;;  %v2046_v42 = vunpack.c.l.b16 %v2006_v39 }
 0x44f   : > { %v2009_v15 = vpack.c.bf16 %v5868_v20, %v5868_v20  ;;  %v1914_v54 = vadd.f32 %v1913_v61, %v5881_v13  ;;  %v1941_v49 = vadd.f32 %v1940_v26, %v1939_v2  ;;  %v1947_v12 = vrot.slane %v1946_v40, 2 }
 0x450   : > { %v1985_v33 = vrot.slane %v5886_v10, 1  ;;  %v1956_v29 = vrot.slane %v1955_v50, 2  ;;  %v2047_v44 = vunpack.c.l.b16 %v2007_v27  ;;  %v2062_v59 = vsel %vm2061_vm6, %v2046_v42, %v2045_v25 }
 0x451   : > { %v2048_v58 = vunpack.c.l.b16 %v2008_v62  ;;  %v1931_v9 = vrot.slane %v1930_v11, 1  ;;  %v1948_v37 = vadd.f32 %v1947_v12, %v1946_v40  ;;  %v2003_v53 = vrot.slane %v2002_v38, 1 }
 0x452   : > { %v1923_v24 = vadd.f32 %v1922_v22, %v5898_v31  ;;  %v1994_v20 = vrot.slane %v1993_v14, 1  ;;  %v1957_v55 = vadd.f32 %v1956_v29, %v1955_v50  ;;  %v2064_v13 = vsel %vm2063_vm7, %v2047_v44, %v2062_v59 }
 0x453   : > { %v2010_v52 = vpack.c.bf16 %v1914_v54, %v1914_v54  ;;  %v1949_v41 = vrot.slane %v1948_v37, 1  ;;  %v2013_v6 = vpack.c.bf16 %v1941_v49, %v1941_v49  ;;  %v2066_v23 = vsel %vm2065_vm8, %v2048_v58, %v2064_v13  ;;  %v4541_v13 = vld [vmem:[%s6818_s10] sm:$0xff]  }
 0x454   : > { %v2049_v7 = vunpack.c.l.b16 %v2009_v15  ;;  %v1977_v48 = vadd.f32 %v1976_v0, %v5863_v56  ;;  %v1986_v62 = vadd.f32 %v1985_v33, %v5886_v10  ;;  %v1958_v60 = vrot.slane %v1957_v55, 1  ;;  %4404 = vmatpush3.bf16.msra.mxu0 %v4541_v13 }
 0x455   : > { %v1932_v2 = vadd.f32 %v1931_v9, %v1930_v11  ;;  %v1950_v34 = vadd.f32 %v1949_v41, %v1948_v37  ;;  %v2004_v31 = vadd.f32 %v2003_v53, %v2002_v38  ;;  %v1995_v61 = vadd.f32 %v1994_v20, %v1993_v14  ;;  %v4543_v41 = vld [vmem:[%s6818_s10 + $0x10] sm:$0xff]  }
 0x456   : > { %v1959_v22 = vadd.f32 %v1958_v60, %v1957_v55  ;;  %v2011_v17 = vpack.c.bf16 %v1923_v24, %v1923_v24  ;;  %v2068_v30 = vsel %vm2067_vm9, %v2049_v7, %v2066_v23  ;;  %v2016_v43 = vpack.c.bf16 %v5861_v35, %v5861_v35  ;;  %v5956_v23 = vpop.xlane.xlu1 %978  ;;  %v4273_v7 = vld [vmem:[#allocation11] ss:$0 sm:$0xff] }
 0x457   : > { %v2050_v26 = vunpack.c.l.b16 %v2010_v52  ;;  %v2014_v18 = vpack.c.bf16 %v1950_v34, %v1950_v34  ;;  %v2053_v39 = vunpack.c.l.b16 %v2013_v6  ;;  %v2017_v40 = vpack.c.bf16 %v1977_v48, %v1977_v48  ;;  %v4542_v52 = vld [vmem:[%s6818_s10 + $0x8] sm:$0xff]   ;;  %v4544_v6 = vld [vmem:[%s6818_s10 + $0x18] sm:$0xff]   ;;  %6957 = vst [vmem:[#allocation52_spill] sm:$0xff] %v5956_v23  ;;  %v5958_v48 = vpop.xlane.xlu0 %981 }
 0x458   : > { %v2018_v56 = vpack.c.bf16 %v1986_v62, %v1986_v62  ;;  %v2015_v0 = vpack.c.bf16 %v1959_v22, %v1959_v22  ;;  %v2012_v10 = vpack.c.bf16 %v1932_v2, %v1932_v2  ;;  %v2020_v11 = vpack.c.bf16 %v2004_v31, %v2004_v31  ;;  %6958 = vst [vmem:[#allocation53_spill] sm:$0xff] %v5958_v48 }
 0x459   : > { %v2054_v25 = vunpack.c.l.b16 %v2014_v18  ;;  %v2070_v38 = vsel %vm2069_vm10, %v2050_v26, %v2068_v30  ;;  %v2019_v14 = vpack.c.bf16 %v1995_v61, %v1995_v61  ;;  %v2051_v50 = vunpack.c.l.b16 %v2011_v17 }
 0x45a   : > { %v2055_v27 = vunpack.c.l.b16 %v2015_v0  ;;  %v2056_v42 = vunpack.c.l.b16 %v2016_v43  ;;  %v2057_v54 = vunpack.c.l.b16 %v2017_v40  ;;  %v2058_v12 = vunpack.c.l.b16 %v2018_v56 }
 0x45b   : > { %v2075_v15 = vsel %vm2061_vm6, %v2054_v25, %v2053_v39  ;;  %v2072_v35 = vsel %vm2071_vm11, %v2051_v50, %v2070_v38  ;;  %v2052_v33 = vunpack.c.l.b16 %v2012_v10  ;;  %v2060_v29 = vunpack.c.l.b16 %v2020_v11  ;;  %v4545_v38 = vld [vmem:[%s6821_s13] sm:$0xff]   ;;  %v4547_v50 = vld [vmem:[%s6821_s13 + $0x10] sm:$0xff]  }
 0x45c   : > { %v2076_v49 = vsel %vm2063_vm7, %v2055_v27, %v2075_v15  ;;  %v2059_v59 = vunpack.c.l.b16 %v2019_v14  ;;  %v6956_v55 = vmov 0.0   ;;  %v2158_v62 = vmul.f32 %v4273_v7, %v5956_v23  ;;  %v4546_v14 = vld [vmem:[%s6821_s13 + $0x8] sm:$0xff]  }
 0x45d   : > { %v2077_v44 = vsel %vm2065_vm8, %v2056_v42, %v2076_v49  ;;  %v2074_v9 = vsel %vm2073_vm12, %v2052_v33, %v2072_v35  ;;  %4405 = vmatprep.subr.bf16.mxu0 %v6956_v55  ;;  %v2159_v31 = vmul.f32 %v4273_v7, %v5958_v48  ;;  %v4281_v42 = vld [vmem:[%s6819_s11] ss:$0 sm:$0xff] }
 0x45e   : > { %v2078_v58 = vsel %vm2067_vm9, %v2057_v54, %v2077_v44  ;;  %4406 = vmatpush3.bf16.msra.mxu0 %v4542_v52  ;;  %v4548_v54 = vld [vmem:[%s6821_s13 + $0x18] sm:$0xff]  }
 0x45f   : > { %v2079_v37 = vsel %vm2069_vm10, %v2058_v12, %v2078_v58  ;;  %4407 = vmatprep.subr.bf16.mxu0 %v6956_v55 }
 0x460   : > { %v2080_v53 = vsel %vm2071_vm11, %v2059_v59, %v2079_v37  ;;  %v2264_v59 = vld [vmem:[%s6820_s12] sm:$0x1] }
 0x461   : > { %v2081_v24 = vsel %vm2073_vm12, %v2060_v29, %v2080_v53 }
 0x462   : > { %v2082_v20 = vpack.c.b16 %v2081_v24, %v2074_v9  ;;  %4408 = vmatpush3.bf16.msra.mxu0 %v4543_v41  ;;  %v2265_v9 = vpack.c.bf16 %v2264_v59, %v2264_v59 }
 0x463   : > { %4409 = vmatprep.subr.bf16.mxu0 %v6956_v55 }
 0x464   : > { %4400 = vmatmul.mubr.msk.bf16.vlgmr.msra.gmra.mrb[0].mxu1 %vm1860_vm5, %v2082_v20  ;;  %v2545_v24 = vpack.i.b16 %v2265_v9, %v2265_v9 }
 0x465   : > { %4423 = vmatprep.mubr.msk.bf16.mxu1 %vm5015_vm0, %v6956_v55  ;;  %4416 = vmatpush3.bf16.msra.mxu1 %v4545_v38  ;;  %v6964_v38 = vld [vmem:[#allocation28_spill] sm:$0xff] }
 0x466   : > { %4410 = vmatpush3.bf16.msra.mxu0 %v4544_v6  ;;  %4417 = vmatprep.subr.bf16.mxu1 %v6956_v55  ;;  %v5991_v52 = vrot.slane %v2545_v24, %v5326_v16  ;;  %v6970_v24 = vld [vmem:[#allocation34_spill] sm:$0xff] }
 0x467   : > { %4427 = vmatprep.subr.bf16.mxu0 %v6956_v55 }
 0x469   : > { %4418 = vmatpush3.bf16.msra.mxu1 %v4546_v14 }
 0x46a   : > { %4419 = vmatprep.subr.bf16.mxu1 %v6956_v55 }
 0x46d   : > { %4420 = vmatpush3.bf16.msra.mxu1 %v4547_v50 }
 0x46e   : > { %4421 = vmatprep.subr.bf16.mxu1 %v6956_v55 }
 0x471   : > { %4422 = vmatpush3.bf16.msra.mxu1 %v4548_v54  ;;  %v6966_v54 = vld [vmem:[#allocation30_spill] sm:$0xff] }
 0x472   : > { %4439 = vmatprep.subr.bf16.mxu1 %v6956_v55 }
 0x537   : > { %v2144_v60 = vpop.f32.mrb[0].mxu1 }
 0x538   : > { %v2160_v2 = vadd.f32 %v2158_v62, %v2144_v60  ;;  %v4401_v34 = vpop.f32.mrb[1].mxu1 }
 0x539   : > { %v2147_v61 = vpop.f32.mrb[2].mxu1 }
 0x53a   : > { %v4274_v22 = vmul.f32 -1.442695, %v2160_v2  ;;  %v2161_v17 = vadd.f32 %v2159_v31, %v2147_v61  ;;  %v4402_v30 = vpop.f32.mrb[3].mxu1 }
 0x53c   : > { %4649 = vpow2.f32 %v4274_v22  ;;  %v4275_v43 = vmul.f32 -1.442695, %v2161_v17 }
 0x53e   : > { %4651 = vpow2.f32 %v4275_v43  ;;  %v6960_v43 = vld [vmem:[#allocation25_spill] sm:$0xff] }
 0x546   : > { %v4650_v26 = vpop.eup %4649 }
 0x547   : > { %v2168_v18 = vadd.f32 1.0, %v4650_v26 }
 0x548   : > { %v4652_v39 = vpop.eup %4651 }
 0x549   : > { %4653 = vrcp.f32 %v2168_v18  ;;  %v2169_v40 = vadd.f32 1.0, %v4652_v39  ;;  %v6961_v18 = vld [vmem:[#allocation29_spill] sm:$0xff] }
 0x54b   : > { %4655 = vrcp.f32 %v2169_v40  ;;  %v6962_v40 = vld [vmem:[#allocation26_spill] sm:$0xff] }
 0x553   : > { %v4654_v56 = vpop.eup %4653 }
 0x554   : > { %v2174_v10 = vmul.f32 %v4654_v56, %v2160_v2 }
 0x555   : > { %v4656_v0 = vpop.eup %4655 }
 0x556   : > { %v2175_v11 = vmul.f32 %v4656_v0, %v2161_v17  ;;  %v6959_v17 = vld [vmem:[#allocation27_spill] sm:$0xff] }
 0x558   : > { %v2176_v25 = vpack.c.bf16 %v2175_v11, %v2174_v10  ;;  %v6963_v11 = vld [vmem:[#allocation31_spill] sm:$0xff] }
 0x55a   : > { %4412 = vmatmul.mubr.msk.bf16.vlgmr.msra.gmra.mrb[4].mxu0 %vm1860_vm5, %v2176_v25 }
 0x55b   : > { %4435 = vmatprep.mubr.msk.bf16.mxu0 %vm5015_vm0, %v6956_v55 }
 0x62d   : > { %v2246_v27 = vpop.f32.mrb[4].mxu0 }
 0x62e   : > { %v4413_v15 = vpop.f32.mrb[5].mxu0  ;;  %v2260_v49 = vadd.f32 %v4281_v42, %v2246_v27 }
 0x62f   : > { %v2249_v35 = vpop.f32.mrb[6].mxu0 }
 0x630   : > { %v2261_v12 = vadd.f32 %v4281_v42, %v2249_v35  ;;  %v2263_v33 = vpack.c.bf16 %v2249_v35, %v2246_v27  ;;  %v4414_v29 = vpop.f32.mrb[7].mxu0  ;;  %v6965_v42 = vld [vmem:[#allocation33_spill] sm:$0xff] }
 0x632   : > { %v2262_v44 = vpack.c.bf16 %v2261_v12, %v2260_v49  ;;  %2525 = vrot.lane.b32.xlu0 %v2263_v33, %s5016_s2  ;;  %v4282_v58 = vpack.c.bf16 %v2261_v12, %v2261_v12  ;;  %v6967_v33 = vld [vmem:[#allocation35_spill] sm:$0xff] }
 0x634   : > { %v2274_v37 = vrot.slane %v2262_v44, %v5573_v32  ;;  %v2281_v53 = vrot.slane %v4282_v58, %v5573_v32  ;;  %v6968_v44 = vld [vmem:[#allocation32_spill] sm:$0xff] }
 0x636   : > { %v2282_v20 = vcombine.high %v2274_v37, %v2274_v37  ;;  %v2283_v13 = vcombine.high %v2281_v53, %v2281_v53  ;;  %v2290_v41 = vrot.slane %v2274_v37, %v5573_v32  ;;  %v2297_v7 = vrot.slane %v2281_v53, %v5573_v32  ;;  %v6969_v37 = vld [vmem:[#allocation37_spill] sm:$0xff] }
 0x638   : > { %v2304_v6 = vrot.slane %v2282_v20, %v5573_v32  ;;  %v2311_v62 = vrot.slane %v2283_v13, %v5573_v32  ;;  %v2312_v34 = vcombine.high %v2290_v41, %v2290_v41  ;;  %v2313_v0 = vcombine.high %v2297_v7, %v2297_v7 }
 0x639   : > { %v2317_v50 = vunpack.i.h.s16 %v2290_v41  ;;  %v2325_v58 = vunpack.i.h.s16 %v2297_v7  ;;  %v4283_v56 = vpack.i.b16 %v2290_v41, %v2290_v41  ;;  %v4287_v39 = vpack.i.b16 %v2297_v7, %v2297_v7 }
 0x63a   : > { %v2314_v31 = vcombine.high %v2304_v6, %v2304_v6  ;;  %v2315_v10 = vcombine.high %v2311_v62, %v2311_v62  ;;  %v2319_v27 = vunpack.i.h.s16 %v2304_v6  ;;  %v2321_v49 = vunpack.i.h.s16 %v2312_v34 }
 0x63b   : > { %v2327_v9 = vunpack.i.h.s16 %v2311_v62  ;;  %v2329_v13 = vunpack.i.h.s16 %v2313_v0  ;;  %v2333_v35 = vpack.i.b16 %v2317_v50, %v2317_v50  ;;  %v4284_v26 = vpack.i.b16 %v2304_v6, %v2304_v6 }
 0x63c   : > { %v2323_v12 = vunpack.i.h.s16 %v2314_v31  ;;  %v2331_v14 = vunpack.i.h.s16 %v2315_v10  ;;  %v2335_v22 = vpack.i.b16 %v2319_v27, %v2319_v27  ;;  %v4285_v61 = vpack.i.b16 %v2312_v34, %v2312_v34 }
 0x63d   : > { %v2337_v15 = vpack.i.b16 %v2321_v49, %v2321_v49  ;;  %v4286_v29 = vpack.i.b16 %v2314_v31, %v2314_v31  ;;  %v2341_v59 = vpack.i.b16 %v2325_v58, %v2325_v58  ;;  %v4288_v30 = vpack.i.b16 %v2311_v62, %v2311_v62 }
 0x63e   : > { %v2339_v25 = vpack.i.b16 %v2323_v12, %v2323_v12  ;;  %v2343_v2 = vpack.i.b16 %v2327_v9, %v2327_v9  ;;  %v4289_v60 = vpack.i.b16 %v2313_v0, %v2313_v0  ;;  %v2345_v32 = vpack.i.b16 %v2329_v13, %v2329_v13 }
 0x63f   : > { %v4290_v53 = vpack.i.b16 %v2315_v10, %v2315_v10  ;;  %v2347_v48 = vpack.i.b16 %v2331_v14, %v2331_v14  ;;  %v2351_v20 = vrot.slane %v4283_v56, %v5326_v16  ;;  %v2355_v23 = vrot.slane %v2333_v35, %v5326_v16 }
 0x640   : > { %v2359_v41 = vrot.slane %v4284_v26, %v5326_v16  ;;  %v2363_v6 = vrot.slane %v2335_v22, %v5326_v16  ;;  %v2367_v34 = vrot.slane %v4285_v61, %v5326_v16  ;;  %v2371_v31 = vrot.slane %v2337_v15, %v5326_v16 }
 0x641   : > { %v2375_v7 = vrot.slane %v4286_v29, %v5326_v16  ;;  %v2379_v62 = vrot.slane %v2339_v25, %v5326_v16  ;;  %v2383_v0 = vrot.slane %v4287_v39, %v5326_v16  ;;  %v2387_v10 = vrot.slane %v2341_v59, %v5326_v16 }
 0x642   : > { %v2391_v56 = vrot.slane %v4288_v30, %v5326_v16  ;;  %v2395_v14 = vrot.slane %v2343_v2, %v5326_v16  ;;  %v2399_v26 = vrot.slane %v4289_v60, %v5326_v16  ;;  %v2403_v22 = vrot.slane %v2345_v32, %v5326_v16 }
 0x643   : > { %v2407_v61 = vrot.slane %v4290_v53, %v5326_v16  ;;  %v2411_v50 = vrot.slane %v2347_v48, %v5326_v16  ;;  %v2413_v27 = vpack.i.b16 %v2351_v20, %v2351_v20  ;;  %v2420_v15 = vpack.i.b16 %v2355_v23, %v2355_v23 }
 0x644   : > { %v2427_v35 = vpack.i.b16 %v2359_v41, %v2359_v41  ;;  %v2434_v25 = vpack.i.b16 %v2363_v6, %v2363_v6  ;;  %v2441_v49 = vpack.i.b16 %v2367_v34, %v2367_v34  ;;  %v2448_v39 = vpack.i.b16 %v2371_v31, %v2371_v31 }
 0x645   : > { %v2455_v12 = vpack.i.b16 %v2375_v7, %v2375_v7  ;;  %v2462_v29 = vpack.i.b16 %v2379_v62, %v2379_v62  ;;  %v2469_v59 = vpack.i.b16 %v2383_v0, %v2383_v0  ;;  %v2476_v30 = vpack.i.b16 %v2387_v10, %v2387_v10 }
 0x646   : > { %v2483_v58 = vpack.i.b16 %v2391_v56, %v2391_v56  ;;  %v2490_v2 = vpack.i.b16 %v2395_v14, %v2395_v14  ;;  %v2497_v9 = vpack.i.b16 %v2399_v26, %v2399_v26  ;;  %v2504_v60 = vpack.i.b16 %v2403_v22, %v2403_v22 }
 0x647   : > { %v2511_v13 = vpack.i.b16 %v2407_v61, %v2407_v61  ;;  %v2518_v32 = vpack.i.b16 %v2411_v50, %v2411_v50  ;;  %v2418_v53 = vrot.slane %v2413_v27, %v5326_v16  ;;  %v2425_v48 = vrot.slane %v2420_v15, %v5326_v16 }
 0x648   : > { %v2432_v23 = vrot.slane %v2427_v35, %v5326_v16  ;;  %v2439_v20 = vrot.slane %v2434_v25, %v5326_v16  ;;  %v2446_v41 = vrot.slane %v2441_v49, %v5326_v16  ;;  %v2453_v6 = vrot.slane %v2448_v39, %v5326_v16 }
 0x649   : > { %v2460_v34 = vrot.slane %v2455_v12, %v5326_v16  ;;  %v2467_v31 = vrot.slane %v2462_v29, %v5326_v16  ;;  %v2474_v7 = vrot.slane %v2469_v59, %v5326_v16  ;;  %v2481_v62 = vrot.slane %v2476_v30, %v5326_v16 }
 0x64a   : > { %v2488_v0 = vrot.slane %v2483_v58, %v5326_v16  ;;  %v2495_v10 = vrot.slane %v2490_v2, %v5326_v16  ;;  %v2502_v56 = vrot.slane %v2497_v9, %v5326_v16  ;;  %v2509_v14 = vrot.slane %v2504_v60, %v5326_v16 }
 0x64b   : > { %v2516_v26 = vrot.slane %v2511_v13, %v5326_v16  ;;  %v2523_v22 = vrot.slane %v2518_v32, %v5326_v16  ;;  %v6971_v13 = vmul.bf16 %v5991_v52, %v5526_v28 }
 0x6a4   : > { %v2526_v61 = vpop.permute.xlu0 %2525 }
 0x6a5   : > { %v2528_v50 = vadd.bf16 %v2526_v61, %v2418_v53  ;;  %v2529_v27 = vadd.bf16 %v2526_v61, %v2425_v48  ;;  %v2530_v15 = vadd.bf16 %v2526_v61, %v2432_v23  ;;  %v2531_v35 = vadd.bf16 %v2526_v61, %v2439_v20 }
 0x6a6   : > { %v2532_v25 = vadd.bf16 %v2526_v61, %v2446_v41  ;;  %v2533_v49 = vadd.bf16 %v2526_v61, %v2453_v6  ;;  %v2534_v39 = vadd.bf16 %v2526_v61, %v2460_v34  ;;  %v2535_v12 = vadd.bf16 %v2526_v61, %v2467_v31 }
 0x6a7   : > { %v2536_v29 = vadd.bf16 %v2526_v61, %v2474_v7  ;;  %v2537_v59 = vadd.bf16 %v2526_v61, %v2481_v62  ;;  %v2538_v30 = vadd.bf16 %v2526_v61, %v2488_v0  ;;  %v2539_v58 = vadd.bf16 %v2526_v61, %v2495_v10 }
 0x6a8   : > { %v2540_v2 = vadd.bf16 %v2526_v61, %v2502_v56  ;;  %v2541_v9 = vadd.bf16 %v2526_v61, %v2509_v14  ;;  %v2542_v60 = vadd.bf16 %v2526_v61, %v2516_v26  ;;  %v2543_v55 = vadd.bf16 %v2526_v61, %v2523_v22 }
 0x6a9   : > { %v6064_v32 = vadd.bf16 %v6971_v13, %v2528_v50  ;;  %v6972_v53 = vmul.bf16 %v5991_v52, %v5521_v8  ;;  %v6973_v23 = vmul.bf16 %v5991_v52, %v6959_v17  ;;  %v6974_v41 = vmul.bf16 %v5991_v52, %v6961_v18 }
 0x6aa   : > { %v6975_v34 = vmul.bf16 %v5991_v52, %v6963_v11  ;;  %v6976_v7 = vmul.bf16 %v5991_v52, %v6965_v42  ;;  %v6977_v0 = vmul.bf16 %v5991_v52, %v6967_v33  ;;  %v6978_v56 = vmul.bf16 %v5991_v52, %v6969_v37 }
 0x6ab   : > { %v6069_v48 = vadd.bf16 %v6972_v53, %v2529_v27  ;;  %v6074_v20 = vadd.bf16 %v6973_v23, %v2530_v15  ;;  %v6079_v6 = vadd.bf16 %v6974_v41, %v2531_v35  ;;  %v6979_v26 = vmul.bf16 %v5991_v52, %v5531_v5 }
 0x6ac   : > { %v6084_v31 = vadd.bf16 %v6975_v34, %v2532_v25  ;;  %v6089_v62 = vadd.bf16 %v6976_v7, %v2533_v49  ;;  %v6094_v10 = vadd.bf16 %v6977_v0, %v2534_v39  ;;  %v6099_v14 = vadd.bf16 %v6978_v56, %v2535_v12 }
 0x6ad   : > { %v6104_v22 = vadd.bf16 %v6979_v26, %v2536_v29  ;;  %v6980_v61 = vmul.bf16 %v5991_v52, %v5524_v45  ;;  %v6981_v27 = vmul.bf16 %v5991_v52, %v6960_v43  ;;  %v6982_v35 = vmul.bf16 %v5991_v52, %v6962_v40 }
 0x6ae   : > { %v6983_v49 = vmul.bf16 %v5991_v52, %v6964_v38  ;;  %v6984_v12 = vmul.bf16 %v5991_v52, %v6966_v54  ;;  %v6986_v13 = vmul.bf16 %v5991_v52, %v6970_v24  ;;  %v4291_v53 = vmul.bf16 3216621497, %v6064_v32 }
 0x6af   : > { %v6109_v50 = vadd.bf16 %v6980_v61, %v2537_v59  ;;  %v6114_v15 = vadd.bf16 %v6981_v27, %v2538_v30  ;;  %v6119_v25 = vadd.bf16 %v6982_v35, %v2539_v58  ;;  %v6985_v59 = vmul.bf16 %v5991_v52, %v6968_v44 }
 0x6b0   : > { %v6124_v39 = vadd.bf16 %v6983_v49, %v2540_v2  ;;  %v6129_v29 = vadd.bf16 %v6984_v12, %v2541_v9  ;;  %v6139_v58 = vadd.bf16 %v6986_v13, %v2543_v55  ;;  %v4292_v2 = vmul.bf16 3216621497, %v6069_v48 }
 0x6b1   : > { %v6134_v30 = vadd.bf16 %v6985_v59, %v2542_v60  ;;  %v4293_v23 = vmul.bf16 3216621497, %v6074_v20  ;;  %v4294_v41 = vmul.bf16 3216621497, %v6079_v6  ;;  %4657 = vpow.bf16 %v4291_v53 }
 0x6b2   : > { %v4295_v9 = vmul.bf16 3216621497, %v6084_v31  ;;  %4659 = vpow.bf16 %v4292_v2  ;;  %v4296_v60 = vmul.bf16 3216621497, %v6089_v62  ;;  %v4297_v34 = vmul.bf16 3216621497, %v6094_v10 }
 0x6b3   : > { %4661 = vpow.bf16 %v4293_v23  ;;  %v4298_v55 = vmul.bf16 3216621497, %v6099_v14  ;;  %v4299_v52 = vmul.bf16 3216621497, %v6104_v22  ;;  %v4300_v7 = vmul.bf16 3216621497, %v6109_v50 }
 0x6b4   : > { %4663 = vpow.bf16 %v4294_v41  ;;  %v4301_v0 = vmul.bf16 3216621497, %v6114_v15  ;;  %v4302_v56 = vmul.bf16 3216621497, %v6119_v25  ;;  %v4303_v26 = vmul.bf16 3216621497, %v6124_v39 }
 0x6b5   : > { %4665 = vpow.bf16 %v4295_v9  ;;  %v4304_v61 = vmul.bf16 3216621497, %v6129_v29  ;;  %v4305_v27 = vmul.bf16 3216621497, %v6134_v30  ;;  %v4306_v49 = vmul.bf16 3216621497, %v6139_v58 }
 0x6b6   : > { %4667 = vpow.bf16 %v4296_v60 }
 0x6b7   : > { %4669 = vpow.bf16 %v4297_v34 }
 0x6b8   : > { %4671 = vpow.bf16 %v4298_v55 }
 0x6b9   : > { %4673 = vpow.bf16 %v4299_v52 }
 0x6ba   : > { %4675 = vpow.bf16 %v4300_v7 }
 0x6bb   : > { %4677 = vpow.bf16 %v4301_v0 }
 0x6bc   : > { %v4658_v35 = vpop.eup %4657  ;;  %4679 = vpow.bf16 %v4302_v56 }
 0x6bd   : > { %v4660_v12 = vpop.eup %4659  ;;  %4681 = vpow.bf16 %v4303_v26  ;;  %v2647_v59 = vadd.bf16 1065369472, %v4658_v35 }
 0x6be   : > { %v4662_v13 = vpop.eup %4661  ;;  %4683 = vpow.bf16 %v4304_v61  ;;  %v2648_v53 = vadd.bf16 1065369472, %v4660_v12 }
 0x6bf   : > { %v4664_v2 = vpop.eup %4663  ;;  %4685 = vpow.bf16 %v4305_v27  ;;  %v2649_v23 = vadd.bf16 1065369472, %v4662_v13 }
 0x6c0   : > { %v4666_v41 = vpop.eup %4665  ;;  %4687 = vpow.bf16 %v4306_v49  ;;  %v2650_v9 = vadd.bf16 1065369472, %v4664_v2 }
 0x6c1   : > { %v4668_v60 = vpop.eup %4667  ;;  %v2651_v34 = vadd.bf16 1065369472, %v4666_v41  ;;  %4689 = vrcp.bf16 %v2647_v59 }
 0x6c2   : > { %v4670_v55 = vpop.eup %4669  ;;  %v2652_v52 = vadd.bf16 1065369472, %v4668_v60  ;;  %4691 = vrcp.bf16 %v2648_v53 }
 0x6c3   : > { %v4672_v7 = vpop.eup %4671  ;;  %v2653_v0 = vadd.bf16 1065369472, %v4670_v55  ;;  %4693 = vrcp.bf16 %v2649_v23 }
 0x6c4   : > { %v4674_v56 = vpop.eup %4673  ;;  %v2654_v26 = vadd.bf16 1065369472, %v4672_v7  ;;  %4695 = vrcp.bf16 %v2650_v9 }
 0x6c5   : > { %v4676_v61 = vpop.eup %4675  ;;  %v2655_v35 = vadd.bf16 1065369472, %v4674_v56  ;;  %4697 = vrcp.bf16 %v2651_v34 }
 0x6c6   : > { %v4678_v27 = vpop.eup %4677  ;;  %v2656_v12 = vadd.bf16 1065369472, %v4676_v61  ;;  %4699 = vrcp.bf16 %v2652_v52 }
 0x6c7   : > { %v4680_v49 = vpop.eup %4679  ;;  %v2657_v13 = vadd.bf16 1065369472, %v4678_v27  ;;  %4701 = vrcp.bf16 %v2653_v0 }
 0x6c8   : > { %v4682_v2 = vpop.eup %4681  ;;  %v2658_v59 = vadd.bf16 1065369472, %v4680_v49  ;;  %4703 = vrcp.bf16 %v2654_v26 }
 0x6c9   : > { %v4684_v41 = vpop.eup %4683  ;;  %v2659_v53 = vadd.bf16 1065369472, %v4682_v2  ;;  %4705 = vrcp.bf16 %v2655_v35 }
 0x6ca   : > { %v4686_v60 = vpop.eup %4685  ;;  %v2660_v23 = vadd.bf16 1065369472, %v4684_v41  ;;  %4707 = vrcp.bf16 %v2656_v12 }
 0x6cb   : > { %v4688_v55 = vpop.eup %4687  ;;  %v2661_v9 = vadd.bf16 1065369472, %v4686_v60  ;;  %4709 = vrcp.bf16 %v2657_v13 }
 0x6cc   : > { %v4690_v7 = vpop.eup %4689  ;;  %v2662_v34 = vadd.bf16 1065369472, %v4688_v55  ;;  %4711 = vrcp.bf16 %v2658_v59 }
 0x6cd   : > { %v4692_v56 = vpop.eup %4691  ;;  %v2664_v52 = vmul.bf16 1065369472, %v4690_v7  ;;  %4713 = vrcp.bf16 %v2659_v53 }
 0x6ce   : > { %v4694_v61 = vpop.eup %4693  ;;  %v2666_v0 = vmul.bf16 1065369472, %v4692_v56  ;;  %4715 = vrcp.bf16 %v2660_v23 }
 0x6cf   : > { %v4696_v27 = vpop.eup %4695  ;;  %v2668_v26 = vmul.bf16 1065369472, %v4694_v61  ;;  %4717 = vrcp.bf16 %v2661_v9  ;;  %v2695_v35 = vmul.bf16 %v2664_v52, %v6064_v32 }
 0x6d0   : > { %v4698_v49 = vpop.eup %4697  ;;  %v2670_v2 = vmul.bf16 1065369472, %v4696_v27  ;;  %4719 = vrcp.bf16 %v2662_v34  ;;  %v2696_v12 = vmul.bf16 %v2666_v0, %v6069_v48 }
 0x6d1   : > { %v4700_v13 = vpop.eup %4699  ;;  %v2672_v41 = vmul.bf16 1065369472, %v4698_v49  ;;  %v2697_v59 = vmul.bf16 %v2668_v26, %v6074_v20  ;;  %v6162_v23 = vmul.bf16 %v2695_v35, %v5824_v21  ;;  %v6987_v35 = vld [vmem:[#allocation38_spill] sm:$0xff] }
 0x6d2   : > { %v4702_v60 = vpop.eup %4701  ;;  %v2674_v55 = vmul.bf16 1065369472, %v4700_v13  ;;  %v2698_v53 = vmul.bf16 %v2670_v2, %v6079_v6  ;;  %v6167_v48 = vmul.bf16 %v2696_v12, %v5829_v4  ;;  %v6988_v12 = vld [vmem:[#allocation40_spill] sm:$0xff] }
 0x6d3   : > { %v4704_v7 = vpop.eup %4703  ;;  %v2676_v9 = vmul.bf16 1065369472, %v4702_v60  ;;  %v2699_v32 = vmul.bf16 %v2672_v41, %v6084_v31  ;;  %v6170_v0 = vmul.bf16 %v2697_v59, %v5847_v51  ;;  %v2727_v31 = vunpack.c.l.bf16 %v6162_v23 }
 0x6d4   : > { %v4706_v56 = vpop.eup %4705  ;;  %v2678_v52 = vmul.bf16 1065369472, %v4704_v7  ;;  %v2700_v34 = vmul.bf16 %v2674_v55, %v6089_v62  ;;  %v6174_v49 = vmul.bf16 %v2698_v53, %v6987_v35  ;;  %v2728_v60 = vunpack.c.h.bf16 %v6162_v23 }
 0x6d5   : > { %v4708_v61 = vpop.eup %4707  ;;  %v2680_v20 = vmul.bf16 1065369472, %v4706_v56  ;;  %v2701_v26 = vmul.bf16 %v2676_v9, %v6094_v10  ;;  %v6179_v41 = vmul.bf16 %v2699_v32, %v6988_v12  ;;  %v6989_v56 = vld [vmem:[#allocation42_spill] sm:$0xff]  ;;  %v2729_v53 = vunpack.c.l.bf16 %v6167_v48 }
 0x6d6   : > { %v4710_v6 = vpop.eup %4709  ;;  %v2682_v27 = vmul.bf16 1065369472, %v4708_v61  ;;  %v2702_v62 = vmul.bf16 %v2678_v52, %v6099_v14  ;;  %v6184_v10 = vmul.bf16 %v2700_v34, %v6989_v56  ;;  %v2730_v32 = vunpack.c.h.bf16 %v6167_v48 }
 0x6d7   : > { %v4712_v2 = vpop.eup %4711  ;;  %v2684_v13 = vmul.bf16 1065369472, %v4710_v6  ;;  %v2703_v7 = vmul.bf16 %v2680_v20, %v6104_v22  ;;  %v2731_v22 = vunpack.c.l.bf16 %v6170_v0 }
 0x6d8   : > { %v4714_v59 = vpop.eup %4713  ;;  %v2686_v55 = vmul.bf16 1065369472, %v4712_v2  ;;  %v2704_v6 = vmul.bf16 %v2682_v27, %v6109_v50  ;;  %v6192_v2 = vmul.bf16 %v2701_v26, %v5815_v3  ;;  %v2732_v50 = vunpack.c.h.bf16 %v6170_v0 }
 0x6d9   : > { %v4716_v9 = vpop.eup %4715  ;;  %v2688_v61 = vmul.bf16 1065369472, %v4714_v59  ;;  %v2705_v14 = vmul.bf16 %v2684_v13, %v6114_v15  ;;  %v6197_v59 = vmul.bf16 %v2702_v62, %v5833_v1  ;;  %v6202_v27 = vmul.bf16 %v2703_v7, %v5837_v36  ;;  %v6991_v7 = vld [vmem:[#allocation41_spill] sm:$0xff] }
 0x6da   : > { %v4718_v52 = vpop.eup %4717  ;;  %v2690_v12 = vmul.bf16 1065369472, %v4716_v9  ;;  %v2706_v23 = vmul.bf16 %v2686_v55, %v6119_v25  ;;  %v2733_v25 = vunpack.c.l.bf16 %v6174_v49  ;;  %v6207_v13 = vmul.bf16 %v2704_v6, %v5841_v47  ;;  %v6990_v55 = vld [vmem:[#allocation39_spill] sm:$0xff] }
 0x6db   : > { %v4720_v34 = vpop.eup %4719  ;;  %v2692_v20 = vmul.bf16 1065369472, %v4718_v52  ;;  %v2707_v56 = vmul.bf16 %v2688_v61, %v6124_v39  ;;  %v6210_v39 = vmul.bf16 %v2705_v14, %v5851_v46  ;;  %v2734_v62 = vunpack.c.h.bf16 %v6174_v49 }
 0x6dc   : > { %v2694_v15 = vmul.bf16 1065369472, %v4720_v34  ;;  %v2708_v48 = vmul.bf16 %v2690_v12, %v6129_v29  ;;  %v6215_v9 = vmul.bf16 %v2706_v23, %v6990_v55  ;;  %v2735_v29 = vunpack.c.l.bf16 %v6179_v41 }
 0x6dd   : > { %v2709_v26 = vmul.bf16 %v2692_v20, %v6134_v30  ;;  %v2736_v12 = vunpack.c.h.bf16 %v6179_v41  ;;  %v6220_v61 = vmul.bf16 %v2707_v56, %v6991_v7  ;;  %v2737_v6 = vunpack.c.l.bf16 %v6184_v10 }
 0x6de   : > { %v2710_v0 = vmul.bf16 %v2694_v15, %v6139_v58  ;;  %v6223_v30 = vmul.bf16 %v2708_v48, %v5806_v57  ;;  %v2738_v14 = vunpack.c.h.bf16 %v6184_v10  ;;  %v2739_v58 = vunpack.c.l.bf16 %v6192_v2 }
 0x6df   : > { %v6228_v49 = vmul.bf16 %v2709_v26, %v5831_v63  ;;  %v2740_v52 = vunpack.c.h.bf16 %v6192_v2  ;;  %v2741_v23 = vunpack.c.l.bf16 %v6197_v59  ;;  %v2742_v56 = vunpack.c.h.bf16 %v6197_v59 }
 0x6e0   : > { %v6234_v41 = vmul.bf16 %v2710_v0, %v5859_v19  ;;  %v2759_v34 = vsel %vm1860_vm5, %v2727_v31, 0.0  ;;  %v2760_v20 = vsel %vm1860_vm5, %v2728_v60, 0.0  ;;  %v2768_v10 = vsel %vm1860_vm5, %v2729_v53, 0.0 }
 0x6e1   : > { %v2769_v15 = vsel %vm1860_vm5, %v2730_v32, 0.0  ;;  %v2761_v19 = vadd.f32 %v2760_v20, %v2759_v34  ;;  %v2777_v26 = vsel %vm1860_vm5, %v2731_v22, 0.0  ;;  %v2778_v2 = vsel %vm1860_vm5, %v2732_v50, 0.0 }
 0x6e2   : > { %v2770_v48 = vadd.f32 %v2769_v15, %v2768_v10  ;;  %v2779_v57 = vadd.f32 %v2778_v2, %v2777_v26  ;;  %v2786_v63 = vsel %vm1860_vm5, %v2733_v25, 0.0  ;;  %v2787_v0 = vsel %vm1860_vm5, %v2734_v62, 0.0 }
 0x6e3   : > { %v2795_v59 = vsel %vm1860_vm5, %v2735_v29, 0.0  ;;  %v2762_v31 = vrot.slane %v2761_v19, 4  ;;  %v2788_v60 = vadd.f32 %v2787_v0, %v2786_v63  ;;  %v2796_v53 = vsel %vm1860_vm5, %v2736_v12, 0.0 }
 0x6e4   : > { %v2771_v7 = vrot.slane %v2770_v48, 4  ;;  %v2780_v55 = vrot.slane %v2779_v57, 4  ;;  %v2797_v32 = vadd.f32 %v2796_v53, %v2795_v59  ;;  %v2804_v34 = vsel %vm1860_vm5, %v2737_v6, 0.0 }
 0x6e5   : > { %v2805_v22 = vsel %vm1860_vm5, %v2738_v14, 0.0  ;;  %v2763_v20 = vadd.f32 %v2762_v31, %v2761_v19  ;;  %v2789_v10 = vrot.slane %v2788_v60, 4  ;;  %v2813_v62 = vsel %vm1860_vm5, %v2739_v58, 0.0 }
 0x6e6   : > { %v2772_v50 = vadd.f32 %v2771_v7, %v2770_v48  ;;  %v2806_v15 = vadd.f32 %v2805_v22, %v2804_v34  ;;  %v2781_v25 = vadd.f32 %v2780_v55, %v2779_v57  ;;  %v2798_v26 = vrot.slane %v2797_v32, 4 }
 0x6e7   : > { %v2814_v29 = vsel %vm1860_vm5, %v2740_v52, 0.0  ;;  %v2764_v2 = vrot.slane %v2763_v20, 2  ;;  %v2790_v0 = vadd.f32 %v2789_v10, %v2788_v60  ;;  %v2822_v6 = vsel %vm1860_vm5, %v2741_v23, 0.0 }
 0x6e8   : > { %v2773_v63 = vrot.slane %v2772_v50, 2  ;;  %v2807_v12 = vrot.slane %v2806_v15, 4  ;;  %v2782_v46 = vrot.slane %v2781_v25, 2  ;;  %v2799_v59 = vadd.f32 %v2798_v26, %v2797_v32 }
 0x6e9   : > { %v2815_v53 = vadd.f32 %v2814_v29, %v2813_v62  ;;  %v2765_v14 = vadd.f32 %v2764_v2, %v2763_v20  ;;  %v2791_v7 = vrot.slane %v2790_v0, 2  ;;  %v2823_v58 = vsel %vm1860_vm5, %v2742_v56, 0.0 }
 0x6ea   : > { %v2774_v19 = vadd.f32 %v2773_v63, %v2772_v50  ;;  %v2808_v48 = vadd.f32 %v2807_v12, %v2806_v15  ;;  %v2783_v31 = vadd.f32 %v2782_v46, %v2781_v25  ;;  %v2800_v57 = vrot.slane %v2799_v59, 2 }
 0x6eb   : > { %v2816_v55 = vrot.slane %v2815_v53, 4  ;;  %v2753_v52 = vunpack.c.l.bf16 %v6223_v30  ;;  %v2766_v34 = vrot.slane %v2765_v14, 1  ;;  %v2792_v60 = vadd.f32 %v2791_v7, %v2790_v0 }
 0x6ec   : > { %v2775_v22 = vrot.slane %v2774_v19, 1  ;;  %v2784_v10 = vrot.slane %v2783_v31, 1  ;;  %v2809_v47 = vrot.slane %v2808_v48, 2  ;;  %v2824_v26 = vadd.f32 %v2823_v58, %v2822_v6 }
 0x6ed   : > { %v2817_v32 = vadd.f32 %v2816_v55, %v2815_v53  ;;  %v2754_v23 = vunpack.c.h.bf16 %v6223_v30  ;;  %v2755_v20 = vunpack.c.l.bf16 %v6228_v49  ;;  %v2756_v50 = vunpack.c.h.bf16 %v6228_v49 }
 0x6ee   : > { %v6267_v46 = vadd.f32 %v2800_v57, %v2799_v59  ;;  %v2757_v15 = vunpack.c.l.bf16 %v6234_v41  ;;  %v2758_v56 = vunpack.c.h.bf16 %v6234_v41  ;;  %v2793_v25 = vrot.slane %v2792_v60, 1 }
 0x6ef   : > { %v2825_v62 = vrot.slane %v2824_v26, 4  ;;  %v6271_v29 = vadd.f32 %v2766_v34, %v2765_v14  ;;  %v6273_v2 = vadd.f32 %v2775_v22, %v2774_v19  ;;  %v6992_v63 = vunpack.c.l.bf16 %v6202_v27 }
 0x6f0   : > { %v6993_v0 = vunpack.c.h.bf16 %v6202_v27  ;;  %v6281_v12 = vadd.f32 %v2784_v10, %v2783_v31  ;;  %v6283_v59 = vadd.f32 %v2809_v47, %v2808_v48  ;;  %v2818_v53 = vrot.slane %v2817_v32, 2 }
 0x6f1   : > { %v2831_v30 = vsel %vm1860_vm5, %v6992_v63, 0.0  ;;  %v2802_v6 = vrot.slane %v6267_v46, 1  ;;  %v2826_v14 = vadd.f32 %v2825_v62, %v2824_v26  ;;  %v6994_v19 = vunpack.c.l.bf16 %v6207_v13 }
 0x6f2   : > { %v2832_v49 = vsel %vm1860_vm5, %v6993_v0, 0.0  ;;  %v6995_v57 = vunpack.c.h.bf16 %v6207_v13  ;;  %v6292_v27 = vadd.f32 %v2793_v25, %v2792_v60  ;;  %v6996_v47 = vunpack.c.l.bf16 %v6210_v39 }
 0x6f3   : > { %v2833_v41 = vadd.f32 %v2832_v49, %v2831_v30  ;;  %v2840_v7 = vsel %vm1860_vm5, %v6994_v19, 0.0  ;;  %v6997_v34 = vunpack.c.h.bf16 %v6210_v39  ;;  %v6998_v10 = vunpack.c.l.bf16 %v6215_v9 }
 0x6f4   : > { %v2841_v55 = vsel %vm1860_vm5, %v6995_v57, 0.0  ;;  %v2849_v48 = vsel %vm1860_vm5, %v6996_v47, 0.0  ;;  %v6999_v13 = vunpack.c.h.bf16 %v6215_v9  ;;  %v7000_v60 = vunpack.c.l.bf16 %v6220_v61 }
 0x6f5   : > { %v2834_v58 = vrot.slane %v2833_v41, 4  ;;  %v2842_v31 = vadd.f32 %v2841_v55, %v2840_v7  ;;  %v2850_v22 = vsel %vm1860_vm5, %v6997_v34, 0.0  ;;  %v2858_v26 = vsel %vm1860_vm5, %v6998_v10, 0.0 }
 0x6f6   : > { %v2859_v62 = vsel %vm1860_vm5, %v6999_v13, 0.0  ;;  %v2867_v25 = vsel %vm1860_vm5, %v7000_v60, 0.0  ;;  %v2811_v63 = vrot.slane %v6283_v59, 1  ;;  %v2819_v30 = vadd.f32 %v2818_v53, %v2817_v32 }
 0x6f7   : > { %v2835_v0 = vadd.f32 %v2834_v58, %v2833_v41  ;;  %v2843_v49 = vrot.slane %v2842_v31, 4  ;;  %v2827_v39 = vrot.slane %v2826_v14, 2  ;;  %v2851_v19 = vadd.f32 %v2850_v22, %v2849_v48 }
 0x6f8   : > { %v2860_v7 = vadd.f32 %v2859_v62, %v2858_v26  ;;  %v7001_v57 = vunpack.c.h.bf16 %v6220_v61  ;;  %v2876_v10 = vsel %vm1860_vm5, %v2753_v52, 0.0  ;;  %v2877_v60 = vsel %vm1860_vm5, %v2754_v23, 0.0 }
 0x6f9   : > { %v2836_v47 = vrot.slane %v2835_v0, 2  ;;  %v2844_v9 = vadd.f32 %v2843_v49, %v2842_v31  ;;  %v2852_v13 = vrot.slane %v2851_v19, 4  ;;  %v2885_v32 = vsel %vm1860_vm5, %v2755_v20, 0.0 }
 0x6fa   : > { %v2868_v55 = vsel %vm1860_vm5, %v7001_v57, 0.0  ;;  %v2861_v36 = vrot.slane %v2860_v7, 4  ;;  %v2820_v53 = vrot.slane %v2819_v30, 1  ;;  %v2878_v61 = vadd.f32 %v2877_v60, %v2876_v10 }
 0x6fb   : > { %v2869_v34 = vadd.f32 %v2868_v55, %v2867_v25  ;;  %v2837_v41 = vadd.f32 %v2836_v47, %v2835_v0  ;;  %v2845_v58 = vrot.slane %v2844_v9, 2  ;;  %v2853_v22 = vadd.f32 %v2852_v13, %v2851_v19 }
 0x6fc   : > { %v2862_v26 = vadd.f32 %v2861_v36, %v2860_v7  ;;  %v2886_v62 = vsel %vm1860_vm5, %v2756_v50, 0.0  ;;  %v2828_v57 = vadd.f32 %v2827_v39, %v2826_v14  ;;  %v2879_v1 = vrot.slane %v2878_v61, 4 }
 0x6fd   : > { %v2870_v48 = vrot.slane %v2869_v34, 4  ;;  %v2846_v31 = vadd.f32 %v2845_v58, %v2844_v9  ;;  %v2887_v49 = vadd.f32 %v2886_v62, %v2885_v32  ;;  %v2854_v52 = vrot.slane %v2853_v22, 2 }
 0x6fe   : > { %v2863_v55 = vrot.slane %v2862_v26, 2  ;;  %v2894_v23 = vsel %vm1860_vm5, %v2757_v15, 0.0  ;;  %v2838_v3 = vrot.slane %v2837_v41, 1  ;;  %v2880_v19 = vadd.f32 %v2879_v1, %v2878_v61 }
 0x6ff   : > { %v2871_v25 = vadd.f32 %v2870_v48, %v2869_v34  ;;  %v2847_v20 = vrot.slane %v2846_v31, 1  ;;  %v2888_v0 = vrot.slane %v2887_v49, 4  ;;  %v2855_v47 = vadd.f32 %v2854_v52, %v2853_v22 }
 0x700   : > { %v2864_v51 = vadd.f32 %v2863_v55, %v2862_v26  ;;  %v2895_v36 = vsel %vm1860_vm5, %v2758_v56, 0.0  ;;  %v2829_v7 = vrot.slane %v2828_v57, 1  ;;  %v2803_v9 = vadd.f32 %v2802_v6, %v6267_v46 }
 0x701   : > { %v2872_v35 = vrot.slane %v2871_v25, 2  ;;  %v2889_v14 = vadd.f32 %v2888_v0, %v2887_v49  ;;  %v2896_v39 = vadd.f32 %v2895_v36, %v2894_v23  ;;  %v2856_v34 = vrot.slane %v2855_v47, 1 }
 0x702   : > { %v2865_v10 = vrot.slane %v2864_v51, 1  ;;  %v2881_v13 = vrot.slane %v2880_v19, 2  ;;  %v2812_v15 = vadd.f32 %v2811_v63, %v6283_v59  ;;  %v2821_v48 = vadd.f32 %v2820_v53, %v2819_v30 }
 0x703   : > { %v2873_v50 = vadd.f32 %v2872_v35, %v2871_v25  ;;  %v2890_v32 = vrot.slane %v2889_v14, 2  ;;  %v2897_v58 = vrot.slane %v2896_v39, 4  ;;  %v2839_v22 = vadd.f32 %v2838_v3, %v2837_v41 }
 0x704   : > { %v2848_v26 = vadd.f32 %v2847_v20, %v2846_v31  ;;  %v2882_v1 = vadd.f32 %v2881_v13, %v2880_v19  ;;  %v2830_v61 = vadd.f32 %v2829_v7, %v2828_v57  ;;  %v2857_v56 = vadd.f32 %v2856_v34, %v2855_v47 }
 0x705   : > { %v2874_v60 = vrot.slane %v2873_v50, 1  ;;  %v2891_v62 = vadd.f32 %v2890_v32, %v2889_v14  ;;  %v2898_v35 = vadd.f32 %v2897_v58, %v2896_v39  ;;  %v2866_v25 = vadd.f32 %v2865_v10, %v2864_v51 }
 0x706   : > { %v2883_v49 = vrot.slane %v2882_v1, 1  ;;  %v2903_v46 = vpack.c.bf16 %v6271_v29, %v6271_v29  ;;  %v2904_v6 = vpack.c.bf16 %v6273_v2, %v6273_v2  ;;  %v2905_v3 = vpack.c.bf16 %v6281_v12, %v6281_v12 }
 0x707   : > { %v2875_v59 = vadd.f32 %v2874_v60, %v2873_v50  ;;  %v2892_v63 = vrot.slane %v2891_v62, 1  ;;  %v2899_v52 = vrot.slane %v2898_v35, 2  ;;  %v2906_v53 = vpack.c.bf16 %v6292_v27, %v6292_v27 }
 0x708   : > { %v2884_v30 = vadd.f32 %v2883_v49, %v2882_v1  ;;  %v2911_v41 = vpack.c.bf16 %v2839_v22, %v2839_v22  ;;  %v2912_v57 = vpack.c.bf16 %v2848_v26, %v2848_v26  ;;  %v2907_v55 = vpack.c.bf16 %v2803_v9, %v2803_v9 }
 0x709   : > { %v2893_v51 = vadd.f32 %v2892_v63, %v2891_v62  ;;  %v2900_v31 = vadd.f32 %v2899_v52, %v2898_v35  ;;  %v2913_v23 = vpack.c.bf16 %v2857_v56, %v2857_v56  ;;  %v2908_v29 = vpack.c.bf16 %v2812_v15, %v2812_v15 }
 0x70a   : > { %v2914_v20 = vpack.c.bf16 %v2866_v25, %v2866_v25  ;;  %v2943_v0 = vunpack.c.l.b16 %v2903_v46  ;;  %v2944_v2 = vunpack.c.l.b16 %v2904_v6  ;;  %v2909_v19 = vpack.c.bf16 %v2821_v48, %v2821_v48 }
 0x70b   : > { %v2901_v47 = vrot.slane %v2900_v31, 1  ;;  %v2915_v36 = vpack.c.bf16 %v2875_v59, %v2875_v59  ;;  %v2945_v7 = vunpack.c.l.b16 %v2905_v3  ;;  %v2910_v50 = vpack.c.bf16 %v2830_v61, %v2830_v61 }
 0x70c   : > { %v2916_v12 = vpack.c.bf16 %v2884_v30, %v2884_v30  ;;  %v2951_v14 = vunpack.c.l.b16 %v2911_v41  ;;  %v2952_v39 = vunpack.c.l.b16 %v2912_v57  ;;  %v2917_v27 = vpack.c.bf16 %v2893_v51, %v2893_v51 }
 0x70d   : > { %v2902_v34 = vadd.f32 %v2901_v47, %v2900_v31  ;;  %v2946_v10 = vunpack.c.l.b16 %v2906_v53  ;;  %v2953_v13 = vunpack.c.l.b16 %v2913_v23  ;;  %v2947_v60 = vunpack.c.l.b16 %v2907_v55  ;;  %v4549_v31 = vld [vmem:[%s6823_s15] sm:$0xff]   ;;  %v4550_v55 = vld [vmem:[%s6823_s15 + $0x8] sm:$0xff]   ;;  %v4551_v23 = vld [vmem:[%s6823_s15 + $0x10] sm:$0xff]  }
 0x70e   : > { %v2954_v32 = vunpack.c.l.b16 %v2914_v20  ;;  %v2959_v9 = vsel %vm2061_vm6, %v2944_v2, %v2943_v0  ;;  %v2966_v15 = vsel %vm2061_vm6, %v2952_v39, %v2951_v14  ;;  %v2955_v22 = vunpack.c.l.b16 %v2915_v36  ;;  %4428 = vmatpush3.bf16.msra.mxu0 %v4549_v31  ;;  %v4312_v20 = vld [vmem:[%s6822_s14] ss:$0 sm:$0xff]  ;;  %v7003_v0 = vld [vmem:[#allocation52_spill] sm:$0xff] }
 0x70f   : > { %v2918_v58 = vpack.c.bf16 %v2902_v34, %v2902_v34  ;;  %v2960_v48 = vsel %vm2063_vm7, %v2945_v7, %v2959_v9  ;;  %v2967_v26 = vsel %vm2063_vm7, %v2953_v13, %v2966_v15  ;;  %v2948_v1 = vunpack.c.l.b16 %v2908_v29  ;;  %v4552_v29 = vld [vmem:[%s6823_s15 + $0x18] sm:$0xff]   ;;  %v7004_v7 = vld [vmem:[#allocation53_spill] sm:$0xff] }
 0x710   : > { %v2956_v61 = vunpack.c.l.b16 %v2916_v12  ;;  %v2961_v56 = vsel %vm2065_vm8, %v2946_v10, %v2960_v48  ;;  %v2968_v62 = vsel %vm2065_vm8, %v2954_v32, %v2967_v26  ;;  %v2949_v35 = vunpack.c.l.b16 %v2909_v19  ;;  %v4553_v26 = vld [vmem:[%s6826_s18] sm:$0xff]  }
 0x711   : > { %v2957_v25 = vunpack.c.l.b16 %v2917_v27  ;;  %v2962_v49 = vsel %vm2067_vm9, %v2947_v60, %v2961_v56  ;;  %v2969_v46 = vsel %vm2067_vm9, %v2955_v22, %v2968_v62  ;;  %v2950_v6 = vunpack.c.l.b16 %v2910_v50  ;;  %v4320_v62 = vld [vmem:[%s6824_s16] ss:$0 sm:$0xff] }
 0x712   : > { %v2958_v59 = vunpack.c.l.b16 %v2918_v58  ;;  %v2963_v63 = vsel %vm2069_vm10, %v2948_v1, %v2962_v49  ;;  %v2970_v52 = vsel %vm2069_vm10, %v2956_v61, %v2969_v46  ;;  %v7002_v51 = vmov 0.0   ;;  %v4554_v1 = vld [vmem:[%s6826_s18 + $0x8] sm:$0xff]   ;;  %v4555_v61 = vld [vmem:[%s6826_s18 + $0x10] sm:$0xff]  }
 0x713   : > { %v2964_v3 = vsel %vm2071_vm11, %v2949_v35, %v2963_v63  ;;  %v2971_v30 = vsel %vm2071_vm11, %v2957_v25, %v2970_v52  ;;  %4429 = vmatprep.subr.bf16.mxu0 %v7002_v51  ;;  %v3049_v2 = vmul.f32 %v4312_v20, %v7003_v0  ;;  %v3050_v50 = vmul.f32 %v4312_v20, %v7004_v7  ;;  %v4556_v25 = vld [vmem:[%s6826_s18 + $0x18] sm:$0xff]  }
 0x714   : > { %v2965_v53 = vsel %vm2073_vm12, %v2950_v6, %v2964_v3  ;;  %v2972_v41 = vsel %vm2073_vm12, %v2958_v59, %v2971_v30  ;;  %4430 = vmatpush3.bf16.msra.mxu0 %v4550_v55  ;;  %v3155_v3 = vld [vmem:[%s6825_s17] sm:$0x1] }
 0x715   : > { %v2973_v57 = vpack.c.b16 %v2972_v41, %v2965_v53  ;;  %4431 = vmatprep.subr.bf16.mxu0 %v7002_v51  ;;  %v3156_v53 = vpack.c.bf16 %v3155_v3, %v3155_v3  ;;  %v7005_v41 = vld [vmem:[#allocation36_spill] sm:$0xff] }
 0x717   : > { %4424 = vmatmul.mubr.msk.bf16.vlgmr.msra.gmra.mrb[4].mxu1 %vm1860_vm5, %v2973_v57  ;;  %v3436_v55 = vpack.i.b16 %v3156_v53, %v3156_v53 }
 0x718   : > { %4447 = vmatprep.mubr.msk.bf16.mxu1 %vm5015_vm0, %v7002_v51  ;;  %4432 = vmatpush3.bf16.msra.mxu0 %v4551_v23 }
 0x719   : > { %4433 = vmatprep.subr.bf16.mxu0 %v7002_v51  ;;  %4440 = vmatpush3.bf16.msra.mxu1 %v4553_v26 }
 0x71a   : > { %4441 = vmatprep.subr.bf16.mxu1 %v7002_v51 }
 0x71c   : > { %4434 = vmatpush3.bf16.msra.mxu0 %v4552_v29  ;;  %v6392_v29 = vrot.slane %v3436_v55, %v5326_v16 }
 0x71d   : > { %4442 = vmatpush3.bf16.msra.mxu1 %v4554_v1 }
 0x71e   : > { %4443 = vmatprep.subr.bf16.mxu1 %v7002_v51  ;;  %v3447_v26 = vmul.bf16 %v6392_v29, %v6965_v42  ;;  %v7008_v42 = vmul.bf16 %v6392_v29, %v5524_v45  ;;  %v7012_v45 = vmul.bf16 %v6392_v29, %v6966_v54 }
 0x721   : > { %4444 = vmatpush3.bf16.msra.mxu1 %v4555_v61 }
 0x722   : > { %4445 = vmatprep.subr.bf16.mxu1 %v7002_v51 }
 0x725   : > { %4446 = vmatpush3.bf16.msra.mxu1 %v4556_v25 }
 0x7ea   : > { %v3035_v47 = vpop.f32.mrb[4].mxu1 }
 0x7eb   : > { %v3051_v19 = vadd.f32 %v3049_v2, %v3035_v47  ;;  %v4425_v36 = vpop.f32.mrb[5].mxu1 }
 0x7ec   : > { %v3038_v12 = vpop.f32.mrb[6].mxu1  ;;  %v3442_v36 = vmul.bf16 %v6392_v29, %v5526_v28 }
 0x7ed   : > { %v4313_v14 = vmul.f32 -1.442695, %v3051_v19  ;;  %v3052_v39 = vadd.f32 %v3050_v50, %v3038_v12  ;;  %v4426_v34 = vpop.f32.mrb[7].mxu1  ;;  %v3443_v50 = vmul.bf16 %v6392_v29, %v5521_v8 }
 0x7ef   : > { %4721 = vpow2.f32 %v4313_v14  ;;  %v4314_v27 = vmul.f32 -1.442695, %v3052_v39 }
 0x7f1   : > { %4723 = vpow2.f32 %v4314_v27  ;;  %v3444_v27 = vmul.bf16 %v6392_v29, %v6959_v17 }
 0x7f9   : > { %v4722_v10 = vpop.eup %4721 }
 0x7fa   : > { %v3059_v13 = vadd.f32 1.0, %v4722_v10 }
 0x7fb   : > { %v4724_v60 = vpop.eup %4723 }
 0x7fc   : > { %4725 = vrcp.f32 %v3059_v13  ;;  %v3060_v32 = vadd.f32 1.0, %v4724_v60  ;;  %v3445_v13 = vmul.bf16 %v6392_v29, %v6961_v18  ;;  %v7006_v18 = vmul.bf16 %v6392_v29, %v6969_v37 }
 0x7fd   : > { %v7010_v37 = vmul.bf16 %v6392_v29, %v6962_v40  ;;  %v7014_v40 = vmul.bf16 %v6392_v29, %v6970_v24 }
 0x7fe   : > { %4727 = vrcp.f32 %v3060_v32 }
 0x806   : > { %v4726_v9 = vpop.eup %4725 }
 0x807   : > { %v3065_v58 = vmul.f32 %v4726_v9, %v3051_v19 }
 0x808   : > { %v4728_v15 = vpop.eup %4727 }
 0x809   : > { %v3066_v22 = vmul.f32 %v4728_v15, %v3052_v39  ;;  %v3446_v15 = vmul.bf16 %v6392_v29, %v6963_v11  ;;  %v7007_v11 = vmul.bf16 %v6392_v29, %v5531_v5  ;;  %v7011_v5 = vmul.bf16 %v6392_v29, %v6964_v38 }
 0x80b   : > { %v3067_v48 = vpack.c.bf16 %v3066_v22, %v3065_v58 }
 0x80d   : > { %4436 = vmatmul.mubr.msk.bf16.vlgmr.msra.gmra.mrb[8].mxu0 %vm1860_vm5, %v3067_v48 }
 0x8e0   : > { %v3137_v56 = vpop.f32.mrb[8].mxu0 }
 0x8e1   : > { %v4437_v35 = vpop.f32.mrb[9].mxu0  ;;  %v3151_v46 = vadd.f32 %v4320_v62, %v3137_v56 }
 0x8e2   : > { %v3140_v49 = vpop.f32.mrb[10].mxu0 }
 0x8e3   : > { %v3152_v6 = vadd.f32 %v4320_v62, %v3140_v49  ;;  %v3154_v59 = vpack.c.bf16 %v3140_v49, %v3137_v56  ;;  %v4438_v63 = vpop.f32.mrb[11].mxu0  ;;  %v3448_v62 = vmul.bf16 %v6392_v29, %v6967_v33  ;;  %v7009_v33 = vmul.bf16 %v6392_v29, %v6960_v43 }
 0x8e4   : > { %v7013_v43 = vmul.bf16 %v6392_v29, %v6968_v44 }
 0x8e5   : > { %v3153_v52 = vpack.c.bf16 %v3152_v6, %v3151_v46  ;;  %3416 = vrot.lane.b32.xlu1 %v3154_v59, %s5016_s2  ;;  %v4321_v30 = vpack.c.bf16 %v3152_v6, %v3152_v6 }
 0x8e7   : > { %v3165_v57 = vrot.slane %v3153_v52, %v7005_v41  ;;  %v3172_v31 = vrot.slane %v4321_v30, %v7005_v41 }
 0x8e9   : > { %v3173_v51 = vcombine.high %v3165_v57, %v3165_v57  ;;  %v3174_v23 = vcombine.high %v3172_v31, %v3172_v31  ;;  %v3181_v20 = vrot.slane %v3165_v57, %v7005_v41  ;;  %v3188_v47 = vrot.slane %v3172_v31, %v7005_v41 }
 0x8eb   : > { %v3195_v2 = vrot.slane %v3173_v51, %v7005_v41  ;;  %v3202_v19 = vrot.slane %v3174_v23, %v7005_v41  ;;  %v3203_v12 = vcombine.high %v3181_v20, %v3181_v20  ;;  %v3204_v32 = vcombine.high %v3188_v47, %v3188_v47 }
 0x8ec   : > { %v3208_v22 = vunpack.i.h.s16 %v3181_v20  ;;  %v3216_v25 = vunpack.i.h.s16 %v3188_v47  ;;  %v4322_v52 = vpack.i.b16 %v3181_v20, %v3181_v20  ;;  %v4326_v51 = vpack.i.b16 %v3188_v47, %v3188_v47 }
 0x8ed   : > { %v3205_v14 = vcombine.high %v3195_v2, %v3195_v2  ;;  %v3206_v9 = vcombine.high %v3202_v19, %v3202_v19  ;;  %v3210_v48 = vunpack.i.h.s16 %v3195_v2  ;;  %v3212_v61 = vunpack.i.h.s16 %v3203_v12 }
 0x8ee   : > { %v3218_v49 = vunpack.i.h.s16 %v3202_v19  ;;  %v3220_v59 = vunpack.i.h.s16 %v3204_v32  ;;  %v3224_v3 = vpack.i.b16 %v3208_v22, %v3208_v22  ;;  %v4323_v30 = vpack.i.b16 %v3195_v2, %v3195_v2 }
 0x8ef   : > { %v3214_v56 = vunpack.i.h.s16 %v3205_v14  ;;  %v3222_v63 = vunpack.i.h.s16 %v3206_v9  ;;  %v3226_v53 = vpack.i.b16 %v3210_v48, %v3210_v48  ;;  %v4324_v41 = vpack.i.b16 %v3203_v12, %v3203_v12 }
 0x8f0   : > { %v3228_v57 = vpack.i.b16 %v3212_v61, %v3212_v61  ;;  %v4325_v31 = vpack.i.b16 %v3205_v14, %v3205_v14  ;;  %v3232_v23 = vpack.i.b16 %v3216_v25, %v3216_v25  ;;  %v4327_v35 = vpack.i.b16 %v3202_v19, %v3202_v19 }
 0x8f1   : > { %v3230_v55 = vpack.i.b16 %v3214_v56, %v3214_v56  ;;  %v3234_v1 = vpack.i.b16 %v3218_v49, %v3218_v49  ;;  %v4328_v58 = vpack.i.b16 %v3204_v32, %v3204_v32  ;;  %v3236_v60 = vpack.i.b16 %v3220_v59, %v3220_v59 }
 0x8f2   : > { %v4329_v10 = vpack.i.b16 %v3206_v9, %v3206_v9  ;;  %v3238_v34 = vpack.i.b16 %v3222_v63, %v3222_v63  ;;  %v3242_v6 = vrot.slane %v4322_v52, %v5326_v16  ;;  %v3246_v39 = vrot.slane %v3224_v3, %v5326_v16 }
 0x8f3   : > { %v3250_v20 = vrot.slane %v4323_v30, %v5326_v16  ;;  %v3254_v2 = vrot.slane %v3226_v53, %v5326_v16  ;;  %v3258_v12 = vrot.slane %v4324_v41, %v5326_v16  ;;  %v3262_v14 = vrot.slane %v3228_v57, %v5326_v16 }
 0x8f4   : > { %v3266_v47 = vrot.slane %v4325_v31, %v5326_v16  ;;  %v3270_v19 = vrot.slane %v3230_v55, %v5326_v16  ;;  %v3274_v32 = vrot.slane %v4326_v51, %v5326_v16  ;;  %v3278_v9 = vrot.slane %v3232_v23, %v5326_v16 }
 0x8f5   : > { %v3282_v22 = vrot.slane %v4327_v35, %v5326_v16  ;;  %v3286_v48 = vrot.slane %v3234_v1, %v5326_v16  ;;  %v3290_v61 = vrot.slane %v4328_v58, %v5326_v16  ;;  %v3294_v56 = vrot.slane %v3236_v60, %v5326_v16 }
 0x8f6   : > { %v3298_v25 = vrot.slane %v4329_v10, %v5326_v16  ;;  %v3302_v49 = vrot.slane %v3238_v34, %v5326_v16  ;;  %v3304_v59 = vpack.i.b16 %v3242_v6, %v3242_v6  ;;  %v3311_v63 = vpack.i.b16 %v3246_v39, %v3246_v39 }
 0x8f7   : > { %v3318_v52 = vpack.i.b16 %v3250_v20, %v3250_v20  ;;  %v3325_v3 = vpack.i.b16 %v3254_v2, %v3254_v2  ;;  %v3332_v30 = vpack.i.b16 %v3258_v12, %v3258_v12  ;;  %v3339_v53 = vpack.i.b16 %v3262_v14, %v3262_v14 }
 0x8f8   : > { %v3346_v41 = vpack.i.b16 %v3266_v47, %v3266_v47  ;;  %v3353_v57 = vpack.i.b16 %v3270_v19, %v3270_v19  ;;  %v3360_v31 = vpack.i.b16 %v3274_v32, %v3274_v32  ;;  %v3367_v35 = vpack.i.b16 %v3278_v9, %v3278_v9 }
 0x8f9   : > { %v3374_v55 = vpack.i.b16 %v3282_v22, %v3282_v22  ;;  %v3381_v1 = vpack.i.b16 %v3286_v48, %v3286_v48  ;;  %v3388_v51 = vpack.i.b16 %v3290_v61, %v3290_v61  ;;  %v3395_v58 = vpack.i.b16 %v3294_v56, %v3294_v56 }
 0x8fa   : > { %v3402_v23 = vpack.i.b16 %v3298_v25, %v3298_v25  ;;  %v3409_v60 = vpack.i.b16 %v3302_v49, %v3302_v49  ;;  %v3309_v10 = vrot.slane %v3304_v59, %v5326_v16  ;;  %v3316_v34 = vrot.slane %v3311_v63, %v5326_v16 }
 0x8fb   : > { %v3323_v39 = vrot.slane %v3318_v52, %v5326_v16  ;;  %v3330_v6 = vrot.slane %v3325_v3, %v5326_v16  ;;  %v3337_v20 = vrot.slane %v3332_v30, %v5326_v16  ;;  %v3344_v2 = vrot.slane %v3339_v53, %v5326_v16 }
 0x8fc   : > { %v3351_v12 = vrot.slane %v3346_v41, %v5326_v16  ;;  %v3358_v14 = vrot.slane %v3353_v57, %v5326_v16  ;;  %v3365_v47 = vrot.slane %v3360_v31, %v5326_v16  ;;  %v3372_v19 = vrot.slane %v3367_v35, %v5326_v16 }
 0x8fd   : > { %v3379_v32 = vrot.slane %v3374_v55, %v5326_v16  ;;  %v3386_v9 = vrot.slane %v3381_v1, %v5326_v16  ;;  %v3393_v22 = vrot.slane %v3388_v51, %v5326_v16  ;;  %v3400_v48 = vrot.slane %v3395_v58, %v5326_v16 }
 0x8fe   : > { %v3407_v61 = vrot.slane %v3402_v23, %v5326_v16  ;;  %v3414_v56 = vrot.slane %v3409_v60, %v5326_v16 }
 0x957   : > { %v3417_v25 = vpop.permute.xlu1 %3416 }
 0x958   : > { %v3419_v49 = vadd.bf16 %v3417_v25, %v3309_v10  ;;  %v3420_v59 = vadd.bf16 %v3417_v25, %v3316_v34  ;;  %v3421_v63 = vadd.bf16 %v3417_v25, %v3323_v39  ;;  %v3422_v52 = vadd.bf16 %v3417_v25, %v3330_v6 }
 0x959   : > { %v3423_v3 = vadd.bf16 %v3417_v25, %v3337_v20  ;;  %v3424_v30 = vadd.bf16 %v3417_v25, %v3344_v2  ;;  %v3425_v53 = vadd.bf16 %v3417_v25, %v3351_v12  ;;  %v3426_v41 = vadd.bf16 %v3417_v25, %v3358_v14 }
 0x95a   : > { %v3427_v57 = vadd.bf16 %v3417_v25, %v3365_v47  ;;  %v3428_v31 = vadd.bf16 %v3417_v25, %v3372_v19  ;;  %v3429_v35 = vadd.bf16 %v3417_v25, %v3379_v32  ;;  %v3430_v55 = vadd.bf16 %v3417_v25, %v3386_v9 }
 0x95b   : > { %v3431_v1 = vadd.bf16 %v3417_v25, %v3393_v22  ;;  %v3432_v51 = vadd.bf16 %v3417_v25, %v3400_v48  ;;  %v3433_v58 = vadd.bf16 %v3417_v25, %v3407_v61  ;;  %v3434_v46 = vadd.bf16 %v3417_v25, %v3414_v56 }
 0x95c   : > { %v6465_v23 = vadd.bf16 %v3442_v36, %v3419_v49  ;;  %v6470_v60 = vadd.bf16 %v3443_v50, %v3420_v59  ;;  %v6475_v10 = vadd.bf16 %v3444_v27, %v3421_v63  ;;  %v6480_v34 = vadd.bf16 %v3445_v13, %v3422_v52 }
 0x95d   : > { %v6485_v28 = vadd.bf16 %v3446_v15, %v3423_v3  ;;  %v6490_v8 = vadd.bf16 %v3447_v26, %v3424_v30  ;;  %v6495_v17 = vadd.bf16 %v3448_v62, %v3425_v53  ;;  %v6500_v36 = vadd.bf16 %v7006_v18, %v3426_v41 }
 0x95e   : > { %v6505_v50 = vadd.bf16 %v7007_v11, %v3427_v57  ;;  %v6510_v27 = vadd.bf16 %v7008_v42, %v3428_v31  ;;  %v6515_v13 = vadd.bf16 %v7009_v33, %v3429_v35  ;;  %v6520_v15 = vadd.bf16 %v7010_v37, %v3430_v55 }
 0x95f   : > { %v6525_v26 = vadd.bf16 %v7011_v5, %v3431_v1  ;;  %v6530_v62 = vadd.bf16 %v7012_v45, %v3432_v51  ;;  %v6535_v39 = vadd.bf16 %v7013_v43, %v3433_v58  ;;  %v6540_v6 = vadd.bf16 %v7014_v40, %v3434_v46 }
 0x960   : > { %v4330_v20 = vmul.bf16 3216621497, %v6465_v23  ;;  %v4331_v38 = vmul.bf16 3216621497, %v6470_v60  ;;  %v4332_v2 = vmul.bf16 3216621497, %v6475_v10 }
 0x961   : > { %v4333_v54 = vmul.bf16 3216621497, %v6480_v34  ;;  %v4334_v12 = vmul.bf16 3216621497, %v6485_v28  ;;  %v4335_v44 = vmul.bf16 3216621497, %v6490_v8 }
 0x962   : > { %4729 = vpow.bf16 %v4330_v20  ;;  %v4336_v14 = vmul.bf16 3216621497, %v6495_v17  ;;  %v4337_v24 = vmul.bf16 3216621497, %v6500_v36  ;;  %v4338_v29 = vmul.bf16 3216621497, %v6505_v50 }
 0x963   : > { %4731 = vpow.bf16 %v4331_v38  ;;  %v4339_v46 = vmul.bf16 3216621497, %v6510_v27  ;;  %v4340_v47 = vmul.bf16 3216621497, %v6515_v13  ;;  %v4341_v19 = vmul.bf16 3216621497, %v6520_v15 }
 0x964   : > { %4733 = vpow.bf16 %v4332_v2  ;;  %v4342_v32 = vmul.bf16 3216621497, %v6525_v26  ;;  %v4343_v9 = vmul.bf16 3216621497, %v6530_v62  ;;  %v4344_v22 = vmul.bf16 3216621497, %v6535_v39 }
 0x965   : > { %4735 = vpow.bf16 %v4333_v54  ;;  %v4345_v61 = vmul.bf16 3216621497, %v6540_v6 }
 0x966   : > { %4737 = vpow.bf16 %v4334_v12 }
 0x967   : > { %4739 = vpow.bf16 %v4335_v44 }
 0x968   : > { %4741 = vpow.bf16 %v4336_v14 }
 0x969   : > { %4743 = vpow.bf16 %v4337_v24 }
 0x96a   : > { %4745 = vpow.bf16 %v4338_v29 }
 0x96b   : > { %4747 = vpow.bf16 %v4339_v46 }
 0x96c   : > { %4749 = vpow.bf16 %v4340_v47 }
 0x96d   : > { %v4730_v48 = vpop.eup %4729  ;;  %4751 = vpow.bf16 %v4341_v19 }
 0x96e   : > { %v4732_v56 = vpop.eup %4731  ;;  %4753 = vpow.bf16 %v4342_v32  ;;  %v3538_v25 = vadd.bf16 1065369472, %v4730_v48 }
 0x96f   : > { %v4734_v49 = vpop.eup %4733  ;;  %4755 = vpow.bf16 %v4343_v9  ;;  %v3539_v59 = vadd.bf16 1065369472, %v4732_v56 }
 0x970   : > { %v4736_v63 = vpop.eup %4735  ;;  %4757 = vpow.bf16 %v4344_v22  ;;  %v3540_v52 = vadd.bf16 1065369472, %v4734_v49 }
 0x971   : > { %v4738_v3 = vpop.eup %4737  ;;  %4759 = vpow.bf16 %v4345_v61  ;;  %v3541_v30 = vadd.bf16 1065369472, %v4736_v63 }
 0x972   : > { %v4740_v53 = vpop.eup %4739  ;;  %v3542_v41 = vadd.bf16 1065369472, %v4738_v3  ;;  %4761 = vrcp.bf16 %v3538_v25 }
 0x973   : > { %v4742_v57 = vpop.eup %4741  ;;  %v3543_v31 = vadd.bf16 1065369472, %v4740_v53  ;;  %4763 = vrcp.bf16 %v3539_v59 }
 0x974   : > { %v4744_v35 = vpop.eup %4743  ;;  %v3544_v55 = vadd.bf16 1065369472, %v4742_v57  ;;  %4765 = vrcp.bf16 %v3540_v52 }
 0x975   : > { %v4746_v1 = vpop.eup %4745  ;;  %v3545_v51 = vadd.bf16 1065369472, %v4744_v35  ;;  %4767 = vrcp.bf16 %v3541_v30  ;;  %v7015_v35 = vld [vmem:[#allocation49_spill] sm:$0xff] }
 0x976   : > { %v4748_v58 = vpop.eup %4747  ;;  %v3546_v18 = vadd.bf16 1065369472, %v4746_v1  ;;  %4769 = vrcp.bf16 %v3542_v41 }
 0x977   : > { %v4750_v11 = vpop.eup %4749  ;;  %v3547_v42 = vadd.bf16 1065369472, %v4748_v58  ;;  %4771 = vrcp.bf16 %v3543_v31 }
 0x978   : > { %v4752_v33 = vpop.eup %4751  ;;  %v3548_v37 = vadd.bf16 1065369472, %v4750_v11  ;;  %4773 = vrcp.bf16 %v3544_v55 }
 0x979   : > { %v4754_v5 = vpop.eup %4753  ;;  %v3549_v45 = vadd.bf16 1065369472, %v4752_v33  ;;  %4775 = vrcp.bf16 %v3545_v51  ;;  %v7016_v51 = vld [vmem:[#allocation38_spill] sm:$0xff] }
 0x97a   : > { %v4756_v43 = vpop.eup %4755  ;;  %v3550_v40 = vadd.bf16 1065369472, %v4754_v5  ;;  %4777 = vrcp.bf16 %v3546_v18 }
 0x97b   : > { %v4758_v20 = vpop.eup %4757  ;;  %v3551_v38 = vadd.bf16 1065369472, %v4756_v43  ;;  %4779 = vrcp.bf16 %v3547_v42  ;;  %v7018_v43 = vld [vmem:[#allocation42_spill] sm:$0xff] }
 0x97c   : > { %v4760_v2 = vpop.eup %4759  ;;  %v3552_v54 = vadd.bf16 1065369472, %v4758_v20  ;;  %4781 = vrcp.bf16 %v3548_v37 }
 0x97d   : > { %v4762_v12 = vpop.eup %4761  ;;  %v3553_v44 = vadd.bf16 1065369472, %v4760_v2  ;;  %4783 = vrcp.bf16 %v3549_v45 }
 0x97e   : > { %v4764_v14 = vpop.eup %4763  ;;  %v3555_v24 = vmul.bf16 1065369472, %v4762_v12  ;;  %4785 = vrcp.bf16 %v3550_v40 }
 0x97f   : > { %v4766_v29 = vpop.eup %4765  ;;  %v3557_v46 = vmul.bf16 1065369472, %v4764_v14  ;;  %4787 = vrcp.bf16 %v3551_v38 }
 0x980   : > { %v4768_v47 = vpop.eup %4767  ;;  %v3559_v19 = vmul.bf16 1065369472, %v4766_v29  ;;  %4789 = vrcp.bf16 %v3552_v54  ;;  %v3586_v32 = vmul.bf16 %v3555_v24, %v6465_v23  ;;  %v7019_v24 = vld [vmem:[#allocation44_spill] sm:$0xff] }
 0x981   : > { %v4770_v9 = vpop.eup %4769  ;;  %v3561_v22 = vmul.bf16 1065369472, %v4768_v47  ;;  %4791 = vrcp.bf16 %v3553_v44  ;;  %v3587_v48 = vmul.bf16 %v3557_v46, %v6470_v60 }
 0x982   : > { %v4772_v61 = vpop.eup %4771  ;;  %v3563_v56 = vmul.bf16 1065369472, %v4770_v9  ;;  %v3588_v25 = vmul.bf16 %v3559_v19, %v6475_v10  ;;  %v6563_v52 = vmul.bf16 %v3586_v32, %v5824_v21  ;;  %v7020_v32 = vld [vmem:[#allocation46_spill] sm:$0xff] }
 0x983   : > { %v4774_v49 = vpop.eup %4773  ;;  %v3565_v59 = vmul.bf16 1065369472, %v4772_v61  ;;  %v3589_v63 = vmul.bf16 %v3561_v22, %v6480_v34  ;;  %v6568_v60 = vmul.bf16 %v3587_v48, %v5829_v4  ;;  %v7017_v4 = vld [vmem:[#allocation40_spill] sm:$0xff]  ;;  %v7021_v48 = vld [vmem:[#allocation47_spill] sm:$0xff] }
 0x984   : > { %v4776_v3 = vpop.eup %4775  ;;  %v3567_v30 = vmul.bf16 1065369472, %v4774_v49  ;;  %v3590_v23 = vmul.bf16 %v3563_v56, %v6485_v28  ;;  %v6571_v55 = vmul.bf16 %v3588_v25, %v7015_v35  ;;  %v3618_v28 = vunpack.c.l.bf16 %v6563_v52  ;;  %v7022_v25 = vld [vmem:[#allocation48_spill] sm:$0xff] }
 0x985   : > { %v4778_v53 = vpop.eup %4777  ;;  %v3569_v41 = vmul.bf16 1065369472, %v4776_v3  ;;  %v3591_v57 = vmul.bf16 %v3565_v59, %v6490_v8  ;;  %v6575_v58 = vmul.bf16 %v3589_v63, %v7016_v51  ;;  %v3619_v33 = vunpack.c.h.bf16 %v6563_v52  ;;  %v7023_v59 = vld [vmem:[#allocation50_spill] sm:$0xff]  ;;  %v7024_v3 = vld [vmem:[#allocation39_spill] sm:$0xff] }
 0x986   : > { %v4780_v31 = vpop.eup %4779  ;;  %v3571_v10 = vmul.bf16 1065369472, %v4778_v53  ;;  %v3592_v21 = vmul.bf16 %v3567_v30, %v6495_v17  ;;  %v6580_v42 = vmul.bf16 %v3590_v23, %v7017_v4  ;;  %v3620_v40 = vunpack.c.l.bf16 %v6568_v60  ;;  %v7025_v53 = vld [vmem:[#allocation41_spill] sm:$0xff] }
 0x987   : > { %v4782_v34 = vpop.eup %4781  ;;  %v3573_v1 = vmul.bf16 1065369472, %v4780_v31  ;;  %v3593_v8 = vmul.bf16 %v3569_v41, %v6500_v36  ;;  %v6585_v17 = vmul.bf16 %v3591_v57, %v7018_v43  ;;  %v3621_v54 = vunpack.c.h.bf16 %v6568_v60 }
 0x988   : > { %v4784_v18 = vpop.eup %4783  ;;  %v3575_v11 = vmul.bf16 1065369472, %v4782_v34  ;;  %v3594_v45 = vmul.bf16 %v3571_v10, %v6505_v50  ;;  %v6593_v29 = vmul.bf16 %v3592_v21, %v7019_v24  ;;  %v3622_v50 = vunpack.c.l.bf16 %v6571_v55  ;;  %v7027_v10 = vld [vmem:[#allocation45_spill] sm:$0xff] }
 0x989   : > { %v4786_v37 = vpop.eup %4785  ;;  %v3577_v5 = vmul.bf16 1065369472, %v4784_v18  ;;  %v3595_v2 = vmul.bf16 %v3573_v1, %v6510_v27  ;;  %v6598_v9 = vmul.bf16 %v3593_v8, %v7020_v32  ;;  %v3623_v27 = vunpack.c.h.bf16 %v6571_v55  ;;  %v7028_v1 = vld [vmem:[#allocation51_spill] sm:$0xff] }
 0x98a   : > { %v4788_v20 = vpop.eup %4787  ;;  %v3579_v38 = vmul.bf16 1065369472, %v4786_v37  ;;  %v3596_v36 = vmul.bf16 %v3575_v11, %v6515_v13  ;;  %v6603_v61 = vmul.bf16 %v3594_v45, %v7021_v48  ;;  %v3625_v63 = vunpack.c.h.bf16 %v6575_v58 }
 0x98b   : > { %v4790_v12 = vpop.eup %4789  ;;  %v3581_v44 = vmul.bf16 1065369472, %v4788_v20  ;;  %v3597_v14 = vmul.bf16 %v3577_v5, %v6520_v15  ;;  %v3624_v15 = vunpack.c.l.bf16 %v6575_v58  ;;  %v6608_v49 = vmul.bf16 %v3595_v2, %v7022_v25 }
 0x98c   : > { %v4792_v46 = vpop.eup %4791  ;;  %v3583_v47 = vmul.bf16 1065369472, %v4790_v12  ;;  %v3598_v19 = vmul.bf16 %v3579_v38, %v6525_v26  ;;  %v6611_v26 = vmul.bf16 %v3596_v36, %v7023_v59  ;;  %v3627_v23 = vunpack.c.h.bf16 %v6580_v42 }
 0x98d   : > { %v3585_v13 = vmul.bf16 1065369472, %v4792_v46  ;;  %v3599_v22 = vmul.bf16 %v3581_v44, %v6530_v62  ;;  %v6616_v30 = vmul.bf16 %v3597_v14, %v7024_v3  ;;  %v3626_v62 = vunpack.c.l.bf16 %v6580_v42 }
 0x98e   : > { %v3600_v56 = vmul.bf16 %v3583_v47, %v6535_v39  ;;  %v6621_v41 = vmul.bf16 %v3598_v19, %v7025_v53  ;;  %v7026_v39 = vld [vmem:[#allocation43_spill] sm:$0xff]  ;;  %v3628_v60 = vunpack.c.l.bf16 %v6585_v17  ;;  %v3629_v31 = vunpack.c.h.bf16 %v6585_v17 }
 0x98f   : > { %v3601_v52 = vmul.bf16 %v3585_v13, %v6540_v6  ;;  %v6624_v57 = vmul.bf16 %v3599_v22, %v7026_v39  ;;  %v3630_v6 = vunpack.c.l.bf16 %v6593_v29  ;;  %v3631_v55 = vunpack.c.h.bf16 %v6593_v29 }
 0x990   : > { %v6629_v35 = vmul.bf16 %v3600_v56, %v7027_v10  ;;  %v3632_v34 = vunpack.c.l.bf16 %v6598_v9  ;;  %v3633_v51 = vunpack.c.h.bf16 %v6598_v9  ;;  %v3634_v58 = vunpack.c.l.bf16 %v6603_v61 }
 0x991   : > { %v6635_v21 = vmul.bf16 %v3601_v52, %v7028_v1  ;;  %v3635_v18 = vunpack.c.h.bf16 %v6603_v61  ;;  %v3636_v11 = vunpack.c.l.bf16 %v6608_v49  ;;  %v3637_v8 = vunpack.c.h.bf16 %v6608_v49 }
 0x992   : > { %v3638_v4 = vunpack.c.l.bf16 %v6611_v26  ;;  %v3639_v42 = vunpack.c.h.bf16 %v6611_v26  ;;  %v3640_v37 = vunpack.c.l.bf16 %v6616_v30  ;;  %v3641_v5 = vunpack.c.h.bf16 %v6616_v30 }
 0x993   : > { %v3642_v45 = vunpack.c.l.bf16 %v6621_v41  ;;  %v3643_v43 = vunpack.c.h.bf16 %v6621_v41  ;;  %v3650_v17 = vsel %vm1860_vm5, %v3618_v28, 0.0  ;;  %v3651_v20 = vsel %vm1860_vm5, %v3619_v33, 0.0 }
 0x994   : > { %v3659_v38 = vsel %vm1860_vm5, %v3620_v40, 0.0  ;;  %v3660_v2 = vsel %vm1860_vm5, %v3621_v54, 0.0  ;;  %v3652_v36 = vadd.f32 %v3651_v20, %v3650_v17  ;;  %v3668_v44 = vsel %vm1860_vm5, %v3622_v50, 0.0 }
 0x995   : > { %v3661_v12 = vadd.f32 %v3660_v2, %v3659_v38  ;;  %v3669_v14 = vsel %vm1860_vm5, %v3623_v27, 0.0  ;;  %v3677_v29 = vsel %vm1860_vm5, %v3624_v15, 0.0  ;;  %v3678_v46 = vsel %vm1860_vm5, %v3625_v63, 0.0 }
 0x996   : > { %v3670_v24 = vadd.f32 %v3669_v14, %v3668_v44  ;;  %v3686_v47 = vsel %vm1860_vm5, %v3626_v62, 0.0  ;;  %v3653_v28 = vrot.slane %v3652_v36, 4  ;;  %v3679_v33 = vadd.f32 %v3678_v46, %v3677_v29 }
 0x997   : > { %v3662_v19 = vrot.slane %v3661_v12, 4  ;;  %v3687_v40 = vsel %vm1860_vm5, %v3627_v23, 0.0  ;;  %v3695_v9 = vsel %vm1860_vm5, %v3628_v60, 0.0  ;;  %v3696_v50 = vsel %vm1860_vm5, %v3629_v31, 0.0 }
 0x998   : > { %v3671_v32 = vrot.slane %v3670_v24, 4  ;;  %v3688_v54 = vadd.f32 %v3687_v40, %v3686_v47  ;;  %v3654_v13 = vadd.f32 %v3653_v28, %v3652_v36  ;;  %v3680_v22 = vrot.slane %v3679_v33, 4 }
 0x999   : > { %v3663_v27 = vadd.f32 %v3662_v19, %v3661_v12  ;;  %v3697_v48 = vadd.f32 %v3696_v50, %v3695_v9  ;;  %v3704_v25 = vsel %vm1860_vm5, %v3630_v6, 0.0  ;;  %v3705_v59 = vsel %vm1860_vm5, %v3631_v55, 0.0 }
 0x99a   : > { %v3672_v15 = vadd.f32 %v3671_v32, %v3670_v24  ;;  %v3689_v56 = vrot.slane %v3688_v54, 4  ;;  %v3655_v63 = vrot.slane %v3654_v13, 2  ;;  %v3681_v3 = vadd.f32 %v3680_v22, %v3679_v33 }
 0x99b   : > { %v3664_v52 = vrot.slane %v3663_v27, 2  ;;  %v3698_v62 = vrot.slane %v3697_v48, 4  ;;  %v3706_v39 = vadd.f32 %v3705_v59, %v3704_v25  ;;  %v3713_v60 = vsel %vm1860_vm5, %v3632_v34, 0.0 }
 0x99c   : > { %v3673_v23 = vrot.slane %v3672_v15, 2  ;;  %v3690_v53 = vadd.f32 %v3689_v56, %v3688_v54  ;;  %v3656_v31 = vadd.f32 %v3655_v63, %v3654_v13  ;;  %v3682_v1 = vrot.slane %v3681_v3, 2 }
 0x99d   : > { %v3665_v10 = vadd.f32 %v3664_v52, %v3663_v27  ;;  %v3699_v17 = vadd.f32 %v3698_v62, %v3697_v48  ;;  %v3707_v2 = vrot.slane %v3706_v39, 4  ;;  %v3714_v6 = vsel %vm1860_vm5, %v3633_v51, 0.0 }
 0x99e   : > { %v3674_v20 = vadd.f32 %v3673_v23, %v3672_v15  ;;  %v3691_v38 = vrot.slane %v3690_v53, 2  ;;  %v3644_v55 = vunpack.c.l.bf16 %v6624_v57  ;;  %v3657_v36 = vrot.slane %v3656_v31, 1 }
 0x99f   : > { %v3666_v12 = vrot.slane %v3665_v10, 1  ;;  %v3683_v44 = vadd.f32 %v3682_v1, %v3681_v3  ;;  %v3700_v24 = vrot.slane %v3699_v17, 2  ;;  %v3708_v29 = vadd.f32 %v3707_v2, %v3706_v39 }
 0x9a0   : > { %v3675_v14 = vrot.slane %v3674_v20, 1  ;;  %v3715_v46 = vadd.f32 %v3714_v6, %v3713_v60  ;;  %v3645_v34 = vunpack.c.h.bf16 %v6624_v57  ;;  %v3646_v47 = vunpack.c.l.bf16 %v6629_v35 }
 0x9a1   : > { %v3647_v28 = vunpack.c.h.bf16 %v6629_v35  ;;  %v6668_v19 = vadd.f32 %v3691_v38, %v3690_v53  ;;  %v3648_v33 = vunpack.c.l.bf16 %v6635_v21  ;;  %v3649_v51 = vunpack.c.h.bf16 %v6635_v21 }
 0x9a2   : > { %v3684_v40 = vrot.slane %v3683_v44, 1  ;;  %v3716_v32 = vrot.slane %v3715_v46, 4  ;;  %v6672_v54 = vadd.f32 %v3657_v36, %v3656_v31  ;;  %v6674_v9 = vadd.f32 %v3666_v12, %v3665_v10 }
 0x9a3   : > { %v3722_v57 = vsel %vm1860_vm5, %v3634_v58, 0.0  ;;  %v3723_v35 = vsel %vm1860_vm5, %v3635_v18, 0.0  ;;  %v6682_v50 = vadd.f32 %v3675_v14, %v3674_v20  ;;  %v6684_v13 = vadd.f32 %v3700_v24, %v3699_v17 }
 0x9a4   : > { %v3709_v27 = vrot.slane %v3708_v29, 2  ;;  %v3724_v21 = vadd.f32 %v3723_v35, %v3722_v57  ;;  %v3693_v22 = vrot.slane %v6668_v19, 1  ;;  %v3717_v48 = vadd.f32 %v3716_v32, %v3715_v46 }
 0x9a5   : > { %v3731_v15 = vsel %vm1860_vm5, %v3636_v11, 0.0  ;;  %v3732_v58 = vsel %vm1860_vm5, %v3637_v8, 0.0  ;;  %v6693_v61 = vadd.f32 %v3684_v40, %v3683_v44  ;;  %v3740_v25 = vsel %vm1860_vm5, %v3638_v4, 0.0 }
 0x9a6   : > { %v3725_v18 = vrot.slane %v3724_v21, 4  ;;  %v3733_v56 = vadd.f32 %v3732_v58, %v3731_v15  ;;  %v3741_v59 = vsel %vm1860_vm5, %v3639_v42, 0.0  ;;  %v3749_v11 = vsel %vm1860_vm5, %v3640_v37, 0.0 }
 0x9a7   : > { %v3750_v49 = vsel %vm1860_vm5, %v3641_v5, 0.0  ;;  %v3758_v8 = vsel %vm1860_vm5, %v3642_v45, 0.0  ;;  %v3702_v63 = vrot.slane %v6684_v13, 1  ;;  %v3710_v52 = vadd.f32 %v3709_v27, %v3708_v29 }
 0x9a8   : > { %v3726_v4 = vadd.f32 %v3725_v18, %v3724_v21  ;;  %v3734_v3 = vrot.slane %v3733_v56, 4  ;;  %v3718_v26 = vrot.slane %v3717_v48, 2  ;;  %v3742_v62 = vadd.f32 %v3741_v59, %v3740_v25 }
 0x9a9   : > { %v3751_v42 = vadd.f32 %v3750_v49, %v3749_v11  ;;  %v3759_v37 = vsel %vm1860_vm5, %v3643_v43, 0.0  ;;  %v3767_v5 = vsel %vm1860_vm5, %v3644_v55, 0.0  ;;  %v3768_v45 = vsel %vm1860_vm5, %v3645_v34, 0.0 }
 0x9aa   : > { %v3727_v23 = vrot.slane %v3726_v4, 2  ;;  %v3735_v30 = vadd.f32 %v3734_v3, %v3733_v56  ;;  %v3760_v53 = vadd.f32 %v3759_v37, %v3758_v8  ;;  %v3743_v39 = vrot.slane %v3742_v62, 4 }
 0x9ab   : > { %v3752_v60 = vrot.slane %v3751_v42, 4  ;;  %v3776_v31 = vsel %vm1860_vm5, %v3646_v47, 0.0  ;;  %v3711_v10 = vrot.slane %v3710_v52, 1  ;;  %v3769_v41 = vadd.f32 %v3768_v45, %v3767_v5 }
 0x9ac   : > { %v3728_v1 = vadd.f32 %v3727_v23, %v3726_v4  ;;  %v3736_v17 = vrot.slane %v3735_v30, 2  ;;  %v3761_v20 = vrot.slane %v3760_v53, 4  ;;  %v3744_v38 = vadd.f32 %v3743_v39, %v3742_v62 }
 0x9ad   : > { %v3753_v2 = vadd.f32 %v3752_v60, %v3751_v42  ;;  %v3777_v43 = vsel %vm1860_vm5, %v3647_v28, 0.0  ;;  %v3719_v6 = vadd.f32 %v3718_v26, %v3717_v48  ;;  %v3770_v24 = vrot.slane %v3769_v41, 4 }
 0x9ae   : > { %v3737_v36 = vadd.f32 %v3736_v17, %v3735_v30  ;;  %v3762_v12 = vadd.f32 %v3761_v20, %v3760_v53  ;;  %v3778_v44 = vadd.f32 %v3777_v43, %v3776_v31  ;;  %v3745_v55 = vrot.slane %v3744_v38, 2 }
 0x9af   : > { %v3754_v14 = vrot.slane %v3753_v2, 2  ;;  %v3785_v29 = vsel %vm1860_vm5, %v3648_v33, 0.0  ;;  %v3729_v46 = vrot.slane %v3728_v1, 1  ;;  %v3771_v35 = vadd.f32 %v3770_v24, %v3769_v41 }
 0x9b0   : > { %v3738_v34 = vrot.slane %v3737_v36, 1  ;;  %v3763_v47 = vrot.slane %v3762_v12, 2  ;;  %v3779_v40 = vrot.slane %v3778_v44, 4  ;;  %v3746_v32 = vadd.f32 %v3745_v55, %v3744_v38 }
 0x9b1   : > { %v3755_v57 = vadd.f32 %v3754_v14, %v3753_v2  ;;  %v3786_v27 = vsel %vm1860_vm5, %v3649_v51, 0.0  ;;  %v3720_v21 = vrot.slane %v3719_v6, 1  ;;  %v3694_v58 = vadd.f32 %v3693_v22, %v6668_v19 }
 0x9b2   : > { %v3764_v28 = vadd.f32 %v3763_v47, %v3762_v12  ;;  %v3780_v48 = vadd.f32 %v3779_v40, %v3778_v44  ;;  %v3787_v15 = vadd.f32 %v3786_v27, %v3785_v29  ;;  %v3747_v18 = vrot.slane %v3746_v32, 1 }
 0x9b3   : > { %v3756_v56 = vrot.slane %v3755_v57, 1  ;;  %v3772_v25 = vrot.slane %v3771_v35, 2  ;;  %v3703_v33 = vadd.f32 %v3702_v63, %v6684_v13  ;;  %v3712_v8 = vadd.f32 %v3711_v10, %v3710_v52 }
 0x9b4   : > { %v3765_v59 = vrot.slane %v3764_v28, 1  ;;  %v3781_v11 = vrot.slane %v3780_v48, 2  ;;  %v3788_v49 = vrot.slane %v3787_v15, 4  ;;  %v3730_v4 = vadd.f32 %v3729_v46, %v3728_v1 }
 0x9b5   : > { %v3739_v3 = vadd.f32 %v3738_v34, %v3737_v36  ;;  %v3773_v26 = vadd.f32 %v3772_v25, %v3771_v35  ;;  %v3721_v62 = vadd.f32 %v3720_v21, %v3719_v6  ;;  %v3748_v51 = vadd.f32 %v3747_v18, %v3746_v32 }
 0x9b6   : > { %v3782_v42 = vadd.f32 %v3781_v11, %v3780_v48  ;;  %v3789_v37 = vadd.f32 %v3788_v49, %v3787_v15  ;;  %v3757_v23 = vadd.f32 %v3756_v56, %v3755_v57  ;;  %v3794_v19 = vpack.c.bf16 %v6672_v54, %v6672_v54 }
 0x9b7   : > { %v3774_v30 = vrot.slane %v3773_v26, 1  ;;  %v3795_v22 = vpack.c.bf16 %v6674_v9, %v6674_v9  ;;  %v3766_v13 = vadd.f32 %v3765_v59, %v3764_v28  ;;  %v3796_v52 = vpack.c.bf16 %v6682_v50, %v6682_v50 }
 0x9b8   : > { %v3783_v63 = vrot.slane %v3782_v42, 1  ;;  %v3790_v53 = vrot.slane %v3789_v37, 2  ;;  %v3797_v39 = vpack.c.bf16 %v6693_v61, %v6693_v61  ;;  %v3802_v60 = vpack.c.bf16 %v3730_v4, %v3730_v4 }
 0x9b9   : > { %v3775_v5 = vadd.f32 %v3774_v30, %v3773_v26  ;;  %v3803_v45 = vpack.c.bf16 %v3739_v3, %v3739_v3  ;;  %v3798_v1 = vpack.c.bf16 %v3694_v58, %v3694_v58  ;;  %v3804_v17 = vpack.c.bf16 %v3748_v51, %v3748_v51 }
 0x9ba   : > { %v3784_v31 = vadd.f32 %v3783_v63, %v3782_v42  ;;  %v3791_v10 = vadd.f32 %v3790_v53, %v3789_v37  ;;  %v3799_v54 = vpack.c.bf16 %v3703_v33, %v3703_v33  ;;  %v3805_v20 = vpack.c.bf16 %v3757_v23, %v3757_v23 }
 0x9bb   : > { %v3834_v38 = vunpack.c.l.b16 %v3794_v19  ;;  %v3835_v9 = vunpack.c.l.b16 %v3795_v22  ;;  %v3800_v41 = vpack.c.bf16 %v3712_v8, %v3712_v8  ;;  %v3806_v43 = vpack.c.bf16 %v3766_v13, %v3766_v13 }
 0x9bc   : > { %v3792_v2 = vrot.slane %v3791_v10, 1  ;;  %v3836_v6 = vunpack.c.l.b16 %v3796_v52  ;;  %v3801_v36 = vpack.c.bf16 %v3721_v62, %v3721_v62  ;;  %v3807_v50 = vpack.c.bf16 %v3775_v5, %v3775_v5  ;;  %v4351_v62 = vld [vmem:[%s7029_s1] ss:$0 sm:$0xff] }
 0x9bd   : > { %v3842_v12 = vunpack.c.l.b16 %v3802_v60  ;;  %v3843_v44 = vunpack.c.l.b16 %v3803_v45  ;;  %v3808_v61 = vpack.c.bf16 %v3784_v31, %v3784_v31  ;;  %v3837_v14 = vunpack.c.l.b16 %v3797_v39 }
 0x9be   : > { %v3793_v55 = vadd.f32 %v3792_v2, %v3791_v10  ;;  %v3844_v24 = vunpack.c.l.b16 %v3804_v17  ;;  %v3838_v29 = vunpack.c.l.b16 %v3798_v1  ;;  %v3845_v46 = vunpack.c.l.b16 %v3805_v20 }
 0x9bf   : > { %v3850_v34 = vsel %vm2061_vm6, %v3835_v9, %v3834_v38  ;;  %v3857_v47 = vsel %vm2061_vm6, %v3843_v44, %v3842_v12  ;;  %v3846_v32 = vunpack.c.l.b16 %v3806_v43  ;;  %v3839_v27 = vunpack.c.l.b16 %v3799_v54  ;;  %v7030_v54 = vld [vmem:[#allocation24_spill] sm:$0xff]  ;;  %v7031_v9 = vld [vmem:[#allocation23_spill] sm:$0xff] }
 0x9c0   : > { %v3809_v40 = vpack.c.bf16 %v3793_v55, %v3793_v55  ;;  %v3851_v57 = vsel %vm2063_vm7, %v3836_v6, %v3850_v34  ;;  %v3858_v35 = vsel %vm2063_vm7, %v3844_v24, %v3857_v47  ;;  %v3847_v21 = vunpack.c.l.b16 %v3807_v50  ;;  %v6773_v43 = vld [vmem:[%s6918_s28 + $0x8] sm:$0xff] }
 0x9c1   : > { %v3852_v28 = vsel %vm2065_vm8, %v3837_v14, %v3851_v57  ;;  %v3859_v48 = vsel %vm2065_vm8, %v3845_v46, %v3858_v35  ;;  %v3840_v15 = vunpack.c.l.b16 %v3800_v41  ;;  %v3848_v58 = vunpack.c.l.b16 %v3808_v61  ;;  %v6767_v41 = vld [vmem:[%s6918_s28] sm:$0xff] }
 0x9c2   : > { %v3853_v18 = vsel %vm2067_vm9, %v3838_v29, %v3852_v28  ;;  %v3860_v56 = vsel %vm2067_vm9, %v3846_v32, %v3859_v48  ;;  %v3841_v25 = vunpack.c.l.b16 %v3801_v36  ;;  %v3849_v33 = vunpack.c.l.b16 %v3809_v40  ;;  %v7032_v36 = vld [vmem:[#allocation18_spill] sm:$0xff]  ;;  %v7033_v44 = vld [vmem:[#allocation20_spill] sm:$0xff]  ;;  %v7034_v28 = vld [vmem:[#allocation19_spill] sm:$0xff] }
 0x9c3   : > { %v3854_v59 = vsel %vm2069_vm10, %v3839_v27, %v3853_v18  ;;  %v3861_v11 = vsel %vm2069_vm10, %v3847_v21, %v3860_v56  ;;  %v3940_v51 = vmul.f32 %v4351_v62, %v7003_v0  ;;  %v3941_v30 = vmul.f32 %v4351_v62, %v7004_v7 }
 0x9c4   : > { %v3855_v49 = vsel %vm2071_vm11, %v3840_v15, %v3854_v59  ;;  %v3862_v8 = vsel %vm2071_vm11, %v3848_v58, %v3861_v11  ;;  %v4003_v48 = vmul.f32 %v7034_v28, %v7034_v28  ;;  %v7035_v15 = vld [vmem:[#allocation21_spill] sm:$0xff] }
 0x9c5   : > { %v3856_v4 = vsel %vm2073_vm12, %v3841_v25, %v3855_v49  ;;  %v3863_v3 = vsel %vm2073_vm12, %v3849_v33, %v3862_v8  ;;  %v4004_v58 = vmul.f32 %v7035_v15, %v7035_v15 }
 0x9c6   : > { %v3864_v26 = vpack.c.b16 %v3863_v3, %v3856_v4  ;;  %v4007_v18 = vsub.f32 0.0, %v4003_v48 }
 0x9c7   : > { %v4008_v25 = vsub.f32 0.0, %v4004_v58 }
 0x9c8   : > { %4448 = vmatmul.mubr.msk.bf16.vlgmr.msra.gmra.mrb[8].mxu1 %vm1860_vm5, %v3864_v26 }
 0xa9b   : > { %v3926_v42 = vpop.f32.mrb[8].mxu1 }
 0xa9c   : > { %v3942_v37 = vadd.f32 %v3940_v51, %v3926_v42  ;;  %v4449_v23 = vpop.f32.mrb[9].mxu1 }
 0xa9d   : > { %v3929_v19 = vpop.f32.mrb[10].mxu1 }
 0xa9e   : > { %v4353_v22 = vmul.f32 -1.442695, %v3942_v37  ;;  %v3943_v13 = vadd.f32 %v3941_v30, %v3929_v19  ;;  %v4450_v63 = vpop.f32.mrb[11].mxu1 }
 0xaa0   : > { %4793 = vpow2.f32 %v4353_v22  ;;  %v4354_v53 = vmul.f32 -1.442695, %v3943_v13 }
 0xaa2   : > { %4795 = vpow2.f32 %v4354_v53 }
 0xaaa   : > { %v4794_v52 = vpop.eup %4793 }
 0xaab   : > { %v3954_v5 = vadd.f32 1.0, %v4794_v52 }
 0xaac   : > { %v4796_v39 = vpop.eup %4795 }
 0xaad   : > { %4797 = vrcp.f32 %v3954_v5  ;;  %v3955_v60 = vadd.f32 1.0, %v4796_v39 }
 0xaaf   : > { %4799 = vrcp.f32 %v3955_v60  ;;  %v4823_v60 = vld [vmem:[#allocation5] sm:$0x7] }
 0xab7   : > { %v6750_v45 = vpop.eup %4797 }
 0xab8   : > { %v3974_v0 = vmul.f32 0.5, %v6750_v45 }
 0xab9   : > { %v6753_v31 = vpop.eup %4799 }
 0xaba   : > { %v3976_v7 = vmul.f32 2.0, %v3974_v0  ;;  %v3975_v10 = vmul.f32 0.5, %v6753_v31  ;;  %v4048_v0 = vrot.slane %v4823_v60, %v5326_v16  ;;  %v3964_v16 = vstv %s4352_s29 }
 0xabc   : > { %v3978_v1 = vadd.f32 0.5, %v3976_v7  ;;  %v3977_v17 = vmul.f32 2.0, %v3975_v10 }
 0xabe   : > { %v6757_v20 = vmul.f32 %v3978_v1, %v7030_v54  ;;  %v3979_v38 = vadd.f32 0.5, %v3977_v17 }
 0xac0   : > { %3984 = vperm.xlu1 %4535, %v6757_v20   ;;  %v6761_v2 = vmul.f32 %v3979_v38, %v7031_v9 }
 0xac2   : > { %3989 = vperm.xlu0 %4536, %v6761_v2  }
 0xac4   : > { %4038 = vperm.xlu1 %4535, %v6767_v41  }
 0xac8   : > { %4042 = vperm.xlu1 %4535, %v6773_v43  }
 0xb3f   : > { %v3985_v6 = vpop.permute.xlu1 %3984 }
 0xb40   : > { %v3992_v50 = vmul.f32 %v7032_v36, %v3985_v6 }
 0xb41   : > { %v3990_v12 = vpop.permute.xlu0 %3989 }
 0xb42   : > { %v3993_v55 = vmul.f32 %v7033_v44, %v3990_v12  ;;  %v3994_v61 = vsel %vm932_vm13, %v3992_v50, 0.0  ;;  %v7037_v50 = vld [vmem:[#allocation17_spill] sm:$0xff] }
 0xb43   : > { %v4039_v39 = vpop.permute.xlu1 %4038 }
 0xb44   : > { %v3995_v14 = vsel %vm932_vm13, %v3993_v55, 0.0  ;;  %v4049_v10 = vmul.f32 %v4048_v0, %v4039_v39 }
 0xb45   : > { %v3996_v24 = vadd.f32 %v3995_v14, %v3994_v61  ;;  %v3947_v61 = vadd.f32 0.0195141, %v6773_v43  ;;  %v3961_v14 = vmul.f32 2.0, %v6753_v31  ;;  %v4063_v31 = vmul.f32 %v6767_v41, %v6767_v41 }
 0xb47   : > { %v3997_v29 = vrot.slane %v3996_v24, 4  ;;  %v4043_v7 = vpop.permute.xlu1 %4042 }
 0xb48   : > { %v4050_v17 = vmul.f32 %v4048_v0, %v4043_v7 }
 0xb49   : > { %v3998_v46 = vadd.f32 %v3997_v29, %v3996_v24  ;;  %v3966_v24 = vadd.f32 %v3964_v16, %v3947_v61  ;;  %v3946_v29 = vadd.f32 0.0195141, %v6767_v41 }
 0xb4b   : > { %v3999_v34 = vrot.slane %v3998_v46, 2 }
 0xb4d   : > { %v4000_v47 = vadd.f32 %v3999_v34, %v3998_v46  ;;  %v3963_v46 = vsub.f32 1.0, %v3961_v14  ;;  %v3968_v34 = vmul.f32 %v3966_v24, %v3966_v24 }
 0xb4f   : > { %v4001_v40 = vrot.slane %v4000_v47, 1 }
 0xb51   : > { %v4002_v32 = vadd.f32 %v4001_v40, %v4000_v47  ;;  %v3960_v47 = vmul.f32 2.0, %v6750_v45  ;;  %v3965_v40 = vadd.f32 %v3964_v16, %v3946_v29  ;;  %v4064_v45 = vmul.f32 %v6773_v43, %v6773_v43 }
 0xb53   : > { %v4005_v57 = vmul.f32 %v4002_v32, %v3985_v6  ;;  %v4006_v35 = vmul.f32 %v4002_v32, %v3990_v12  ;;  %v7036_v6 = vld [vmem:[#allocation22_spill] sm:$0xff]  ;;  %v3970_v32 = vmul.f32 %v3968_v34, %v3963_v46 }
 0xb55   : > { %v4009_v27 = vmul.f32 4.0, %v4005_v57  ;;  %v4010_v21 = vmul.f32 4.0, %v4006_v35 }
 0xb57   : > { %4801 = vrcp.f32 %v4009_v27  ;;  %v3971_v27 = vstv %s3944_s30 }
 0xb58   : > { %4803 = vrcp.f32 %v4010_v21  ;;  %v3973_v21 = vmul.f32 %v3971_v27, %v3970_v32 }
 0xb61   : > { %v4802_v56 = vpop.eup %4801 }
 0xb62   : > { %v4804_v33 = vpop.eup %4803  ;;  %v4012_v59 = vmul.f32 %v4802_v56, %v4007_v18 }
 0xb63   : > { %v4014_v11 = vmul.f32 %v4804_v33, %v4008_v25 }
 0xb64   : > { %v4015_v49 = vmul.f32 1.442695, %v4012_v59 }
 0xb65   : > { %v4017_v8 = vmul.f32 1.442695, %v4014_v11 }
 0xb66   : > { %4805 = vpow2.f32 %v4015_v49 }
 0xb67   : > { %4807 = vpow2.f32 %v4017_v8 }
 0xb70   : > { %v4806_v4 = vpop.eup %4805 }
 0xb71   : > { %v4808_v3 = vpop.eup %4807  ;;  %v4019_v26 = vmul.f32 %v4806_v4, %v4005_v57  ;;  %v3962_v57 = vsub.f32 1.0, %v3960_v47 }
 0xb72   : > { %v4020_v62 = vmul.f32 %v4808_v3, %v4006_v35  ;;  %v3967_v35 = vmul.f32 %v3965_v40, %v3965_v40 }
 0xb73   : > { %v4021_v51 = vadd.f32 %v4019_v26, %v4003_v48 }
 0xb74   : > { %v4022_v42 = vadd.f32 %v4020_v62, %v4004_v58  ;;  %v3969_v28 = vmul.f32 %v3967_v35, %v3962_v57 }
 0xb75   : > { %4809 = vrsqrt.f32 %v4021_v51  ;;  %vm4025_vm14 = vcmp.eq.f32.partialorder %v4021_v51, inf  ;;  %v4028_v19 = vand.u32 2147483648, %v4021_v51  ;;  %vm4027_vm15 = vcmp.eq.f32.partialorder %v4021_v51, 0.0 }
 0xb76   : > { %4811 = vrsqrt.f32 %v4022_v42  ;;  %vm4032_vm0 = vcmp.eq.f32.partialorder %v4022_v42, inf  ;;  %v4035_v63 = vand.u32 2147483648, %v4022_v42  ;;  %vm4034_vm1 = vcmp.eq.f32.partialorder %v4022_v42, 0.0 }
 0xb77   : > { %v3972_v48 = vmul.f32 %v3971_v27, %v3969_v28 }
 0xb7f   : > { %v4810_v37 = vpop.eup %4809 }
 0xb80   : > { %v4812_v23 = vpop.eup %4811  ;;  %v4024_v30 = vmul.f32 %v4810_v37, %v4021_v51 }
 0xb81   : > { %v4031_v22 = vmul.f32 %v4812_v23, %v4022_v42 }
 0xb82   : > { %v4026_v13 = vsel %vm4025_vm14, %v4021_v51, %v4024_v30 }
 0xb83   : > { %v4029_v53 = vsel %vm4027_vm15, %v4028_v19, %v4026_v13  ;;  %v4033_v52 = vsel %vm4032_vm0, %v4022_v42, %v4031_v22 }
 0xb84   : > { %4813 = vrcp.f32 %v4029_v53  ;;  %v4036_v5 = vsel %vm4034_vm1, %v4035_v63, %v4033_v52 }
 0xb85   : > { %4815 = vrcp.f32 %v4036_v5 }
 0xb86   : > { %4817 = vrcp.f32 %v6757_v20 }
 0xb87   : > { %4819 = vrcp.f32 %v6761_v2 }
 0xb8e   : > { %v4814_v1 = vpop.eup %4813 }
 0xb8f   : > { %v4816_v54 = vpop.eup %4815  ;;  %v4052_v38 = vmul.f32 %v4814_v1, %v4049_v10 }
 0xb90   : > { %v4054_v9 = vmul.f32 %v4816_v54, %v4050_v17  ;;  %v4818_v15 = vpop.eup %4817 }
 0xb91   : > { %v4055_v36 = vmul.f32 %v7036_v6, %v4052_v38  ;;  %v4820_v58 = vpop.eup %4819  ;;  %v4066_v18 = vmul.f32 %v4818_v15, %v4063_v31 }
 0xb92   : > { %v4056_v12 = vmul.f32 %v7037_v50, %v4054_v9  ;;  %v4068_v56 = vmul.f32 %v4820_v58, %v4064_v45 }
 0xb93   : > { %v4057_v44 = vsel %vm932_vm13, %v4055_v36, 0.0 }
 0xb94   : > { %v4060_v55 = vsel %vm932_vm13, %v4056_v12, 0.0  ;;  %4058 = vadd.xlane.f32.xlu0 %v4057_v44  ;;  %vm4092_vm13 = vcmask 0  }
 0xb95   : > { %4061 = vadd.xlane.f32.xlu1 %v4060_v55 }
 0xba6   : > { %4077 = vrot.lane.b32.xlu1 %v3973_v21, %s5018_s27 }
 0xbaa   : > { %4075 = vrot.lane.b32.xlu0 %v3972_v48, %s5018_s27 }
 0xc21   : > { %v4059_v25 = vpop.xlane.xlu0 %4058 }
 0xc22   : > { %v4062_v33 = vpop.xlane.xlu1 %4061  ;;  %v4069_v59 = vadd.f32 %v4066_v18, %v4059_v25 }
 0xc23   : > { %v4070_v11 = vadd.f32 %v4068_v56, %v4062_v33 }
 0xc24   : > { %v4071_v49 = vmul.f32 -68.5828, %v4069_v59 }
 0xc25   : > { %v4072_v8 = vmul.f32 -68.5828, %v4070_v11  ;;  %v4076_v20 = vpop.permute.xlu0 %4075 }
 0xc26   : > { %v4081_v4 = vadd.f32 %v4076_v20, %v4071_v49  ;;  %v4078_v2 = vpop.permute.xlu1 %4077 }
 0xc27   : > { %v4082_v3 = vadd.f32 %v4078_v2, %v4072_v8 }
 0xc28   : > { %v4083_v41 = vsel %vm1176_vm2, %v4081_v4, 0.0 }
 0xc29   : > { %v4084_v26 = vsel %vm1176_vm2, %v4082_v3, 0.0 }
 0xc2a   : > { %v4085_v62 = vadd.f32 %v4084_v26, %v4083_v41 }
 0xc2c   : > { %v4086_v43 = vrot.slane %v4085_v62, 4 }
 0xc2e   : > { %v4087_v51 = vadd.f32 %v4086_v43, %v4085_v62 }
 0xc30   : > { %v4088_v42 = vrot.slane %v4087_v51, 2 }
 0xc32   : > { %v4089_v37 = vadd.f32 %v4088_v42, %v4087_v51 }
 0xc34   : > { %v4090_v23 = vrot.slane %v4089_v37, 1 }
 0xc36   : > { %v4091_v30 = vadd.f32 %v4090_v23, %v4089_v37 }
 0xc38   : > { %4093 = vst.msk [vmem:[%s719_s20] sm:$0x1] %vm4092_vm13, %v4091_v30 }
 0xc39 PF: > { %s7039_s19 = sld [smem:[#allocation16_spill]] }
 0xc3f   : > { %s34_s1 = sadd.s32 1, %s7039_s19  }
 0xc40   : > { %p31_p4 = scmp.ge.s32.totalorder %s34_s1, 4  }
 0xc42   :  { %33 = sbr.rel (!%p31_p4) target bundleno = 13 (0xd), region = 159 }
 0xc49   :  { %4111 = vsyncpa [#allocation3], 1 }
 0xc4a   :  { %4113 = vsyncpa [#allocation3 + $0x1], 1 }
 0xc4b   :  { %4114 = vsyncpa [#allocation7], 1 }
 0xc4c   :  { %4115 = vsyncpa [#allocation10], 1 }
 0xc4d   :  { %4116 = vsyncpa [#allocation4], 1 }
 0xc4e   :  { %4118 = vsyncpa [#allocation4 + $0x1], 1 }

</bundles_post_ra>
